<compile_context>
chip_gen: v7x
topology: tpu7x:2x2x1
jax: 0.10.0
libtpu: 0.0.40
codegen_flags: <defaults>
</compile_context>

<pallas_src>
import functools

import jax
import jax.numpy as jnp
from jax.experimental import pallas as pl
from jax.experimental.pallas import tpu as pltpu


# ----------------------------------------------------------------------------
# helpers
# ----------------------------------------------------------------------------

def _round_up(x, m):
    return (x + m - 1) // m * m


def _divisor_tile(dim, unit, cap):
    """Largest multiple-of-`unit` divisor of `dim` that is <= cap; falls back to
    the full dim (a full-extent block is always a legal BlockSpec dim)."""
    cap = max(unit, min(cap, dim))
    t = (cap // unit) * unit
    while t >= unit:
        if dim % t == 0:
            return t
        t -= unit
    return dim


def _row_tile(m, cap=1024, prefer_split=True):
    """Row (sublane) tile: multiple of 8, <= cap.  When the axis would otherwise be
    a single block, split it so both v7x cores get work / DMA can overlap."""
    t = _divisor_tile(m, 8, cap)
    if prefer_split and t == m and m >= 16:
        t2 = _divisor_tile(m, 8, m // 2)
        if t2 != m:
            t = t2
    return t


def _conv_batch_block(n, ohw, cout_tiles, target_m=512):
    """How many batch samples to fold into one conv block: make the MXU matmul
    M = nb*ohw large (feeds the 256x256 MXUs on v6e/v7x), but keep >= 2 grid
    cells when possible so both v7x TensorCores stay busy."""
    nb = 1
    for d in range(1, n + 1):
        if n % d == 0 and d * ohw <= target_m:
            nb = d
    while nb > 1 and (n // nb) * cout_tiles < 2:
        nb //= 2
        while nb > 1 and n % nb:
            nb -= 1
    return max(nb, 1)


def _default_vmem_limit():
    cap = 64 * 1024 * 1024            # conservative fallback (v7x per-core VMEM)
    try:
        info = pltpu.get_tpu_info()
        cap = int(getattr(info, "vmem_capacity_bytes", cap))
    except Exception:
        pass
    return min(int(cap * 3 // 4), 96 * 1024 * 1024)


_VMEM_LIMIT = _default_vmem_limit()


def _cparams(*sem):
    return pltpu.CompilerParams(dimension_semantics=sem,
                                vmem_limit_bytes=_VMEM_LIMIT)


# ----------------------------------------------------------------------------
# Pallas kernels
# ----------------------------------------------------------------------------

def _conv_kernel(x_ref, w_ref, o_ref, s_ref, ss_ref, acc_ref,
                 *, stride, kh, kw, oh, ow, cin, nb):
    """Direct shifted-window conv for one (batch-group, Cout-tile) grid cell.

    x_ref  : (nb, HPh, WPh, P*cin) bf16 phase-decomposed padded input (P=stride**2)
    w_ref  : (kh*kw, cin, tn)      bf16 weights for this Cout tile
    o_ref  : (nb, oh*ow, tn)       bf16 conv output
    s_ref  : (nb, 1, tn) f32 per-sample spatial sum        (for BN batch stats)
    ss_ref : (nb, 1, tn) f32 per-sample spatial sum-of-sq  (for BN batch stats)
    acc_ref: (nb*oh*ow, tn) f32 VMEM scratch accumulator (bounds vreg pressure)
    """
    m = nb * oh * ow
    acc_ref[...] = jnp.zeros_like(acc_ref)
    for di in range(kh):
        for dj in range(kw):
            ph = (di % stride) * stride + (dj % stride)   # which phase grid
            r0 = di // stride                             # row offset in phase
            c0 = dj // stride                             # col offset in phase
            a = x_ref[:, r0:r0 + oh, c0:c0 + ow, ph * cin:(ph + 1) * cin]
            acc_ref[...] += jnp.dot(a.reshape(m, cin), w_ref[di * kw + dj],
                                    preferred_element_type=jnp.float32)
    acc = acc_ref[...].reshape(nb, oh * ow, acc_ref.shape[-1])
    o_ref[...] = acc.astype(o_ref.dtype)
    s_ref[...] = jnp.sum(acc, axis=1, keepdims=True)
    ss_ref[...] = jnp.sum(acc * acc, axis=1, keepdims=True)


def _affine_kernel(x_ref, sc_ref, sh_ref, o_ref, *, relu):
    """Tiled y = x*scale + shift (+ optional ReLU): the BatchNorm 'apply' pass."""
    y = x_ref[...].astype(jnp.float32) * sc_ref[...] + sh_ref[...]
    if relu:
        y = jnp.maximum(y, 0.0)
    o_ref[...] = y.astype(o_ref.dtype)


def _se_kernel(p_ref, w1_ref, w2_ref, o_ref):
    """SE excitation on the pre-pooled (N, Cp) vector: FC -> ReLU -> FC -> Sigmoid."""
    h = jnp.dot(p_ref[...], w1_ref[...], preferred_element_type=jnp.float32)
    h = jnp.maximum(h, 0.0)
    s = jnp.dot(h.astype(jnp.bfloat16), w2_ref[...],
                preferred_element_type=jnp.float32)
    o_ref[...] = jax.nn.sigmoid(s)


def _tail_kernel(y_ref, ysc_ref, ysh_ref, g_ref, r_ref, rsc_ref, rsh_ref, o_ref):
    """Fused block tail: relu( bn2(y) * se_gate + bn_shortcut(r) )."""
    y = y_ref[...].astype(jnp.float32) * ysc_ref[...] + ysh_ref[...]
    r = r_ref[...].astype(jnp.float32) * rsc_ref[...] + rsh_ref[...]
    o_ref[...] = jnp.maximum(y * g_ref[...] + r, 0.0).astype(o_ref.dtype)


# ----------------------------------------------------------------------------
# Pallas wrappers
# ----------------------------------------------------------------------------

def conv2d(x_flat, w_prep, h, w, *, kh, kw, stride, padding):
    """x_flat: (N, h*w, Cin_p) bf16.  w_prep: (kh*kw, Cin_p, Cout_p) bf16.
    Returns (y (N, oh*ow, Cout_p) bf16,
             spatial sum (N, Cout_p) f32, spatial sumsq (N, Cout_p) f32, oh, ow).
    No bias (exactly cancelled by the following batch-stat BatchNorm)."""
    n = x_flat.shape[0]
    cin_p = x_flat.shape[-1]
    assert w_prep.shape[1] == cin_p, (w_prep.shape, cin_p)
    cout_p = w_prep.shape[-1]

    x4 = x_flat.reshape(n, h, w, cin_p)

    # 1x1 strided conv (shortcut): pre-stride in glue -> plain per-pixel matmul.
    if kh == 1 and kw == 1 and stride > 1:
        x4 = x4[:, ::stride, ::stride, :]
        h, w = x4.shape[1], x4.shape[2]
        stride = 1

    if padding:
        x4 = jnp.pad(x4, ((0, 0), (padding, padding), (padding, padding), (0, 0)))
    hp, wp = x4.shape[1], x4.shape[2]
    oh = (hp - kh) // stride + 1
    ow = (wp - kw) // stride + 1

    s = stride
    hph = oh + (kh - 1) // s
    wph = ow + (kw - 1) // s
    need_h = (s - 1) + s * hph
    need_w = (s - 1) + s * wph
    if need_h > hp or need_w > wp:
        x4 = jnp.pad(x4, ((0, 0), (0, max(0, need_h - hp)),
                          (0, max(0, need_w - wp)), (0, 0)))
    if s == 1:
        x_view = x4[:, :hph, :wph, :]                       # (N, hph, wph, Cin_p)
    else:
        # space-to-batch phase decomposition: every tap becomes an unstrided slice.
        x_view = jnp.concatenate(
            [x4[:, p::s, q::s, :][:, :hph, :wph, :]
             for p in range(s) for q in range(s)], axis=-1)  # (N, hph, wph, s*s*Cin_p)
    x_view = x_view.astype(jnp.bfloat16)

    tn = _divisor_tile(cout_p, 128, 256)          # 256-wide N tile for 256x256 MXUs
    cout_tiles = cout_p // tn
    ohw = oh * ow
    nb = _conv_batch_block(n, ohw, cout_tiles)    # fold batch samples -> bigger M
    bgroups = n // nb

    # Grid order: keep the larger operand resident across the inner grid axis.
    act_bytes = nb * hph * wph * x_view.shape[-1] * 2
    wtile_bytes = kh * kw * cin_p * tn * 2
    batch_outer = act_bytes >= wtile_bytes
    if batch_outer:
        grid = (bgroups, cout_tiles)
        x_map = lambda i, j: (i, 0, 0, 0)
        w_map = lambda i, j: (0, 0, j)
        o_map = lambda i, j: (i, 0, j)
    else:
        grid = (cout_tiles, bgroups)
        x_map = lambda j, i: (i, 0, 0, 0)
        w_map = lambda j, i: (0, 0, j)
        o_map = lambda j, i: (i, 0, j)

    y, sm, ssq = pl.pallas_call(
        functools.partial(_conv_kernel, stride=s, kh=kh, kw=kw, oh=oh, ow=ow,
                          cin=cin_p, nb=nb),
        out_shape=(
            jax.ShapeDtypeStruct((n, ohw, cout_p), jnp.bfloat16),
            jax.ShapeDtypeStruct((n, 1, cout_p), jnp.float32),
            jax.ShapeDtypeStruct((n, 1, cout_p), jnp.float32),
        ),
        grid_spec=pltpu.PrefetchScalarGridSpec(
            num_scalar_prefetch=0,
            grid=grid,
            in_specs=[
                pl.BlockSpec((nb, hph, wph, x_view.shape[-1]), x_map),
                pl.BlockSpec((kh * kw, cin_p, tn), w_map),
            ],
            out_specs=[
                pl.BlockSpec((nb, ohw, tn), o_map),
                pl.BlockSpec((nb, 1, tn), o_map),
                pl.BlockSpec((nb, 1, tn), o_map),
            ],
            scratch_shapes=[pltpu.VMEM((nb * ohw, tn), jnp.float32)],
        ),
        compiler_params=_cparams("parallel", "parallel"),
    )(x_view, w_prep)
    return y, sm[:, 0, :], ssq[:, 0, :], oh, ow


def _bn_scale_shift(sm, ssq, count, gamma, beta, eps=1e-5):
    """Train-mode BatchNorm batch stats from per-sample spatial sums (tiny (1,C)
    XLA glue).  Returns scale/shift such that bn(x) == x*scale + shift."""
    mean = jnp.sum(sm, axis=0, keepdims=True) / count
    var = jnp.maximum(jnp.sum(ssq, axis=0, keepdims=True) / count - mean * mean, 0.0)
    scale = gamma * jax.lax.rsqrt(var + eps)
    shift = beta - mean * scale
    return scale, shift


def affine(x_flat, scale, shift, *, relu):
    """Tiled BatchNorm apply (+ReLU).  x_flat: (N, HW, Cp) bf16; scale/shift (1, Cp)."""
    n, hw, c_p = x_flat.shape
    x2 = x_flat.reshape(n * hw, c_p)
    tm = _row_tile(n * hw, cap=1024)
    tc = _divisor_tile(c_p, 128, 512)
    y = pl.pallas_call(
        functools.partial(_affine_kernel, relu=relu),
        out_shape=jax.ShapeDtypeStruct((n * hw, c_p), jnp.bfloat16),
        grid_spec=pltpu.PrefetchScalarGridSpec(
            num_scalar_prefetch=0,
            grid=(n * hw // tm, c_p // tc),
            in_specs=[
                pl.BlockSpec((tm, tc), lambda i, c: (i, c)),
                pl.BlockSpec((1, tc), lambda i, c: (0, c)),
                pl.BlockSpec((1, tc), lambda i, c: (0, c)),
            ],
            out_specs=pl.BlockSpec((tm, tc), lambda i, c: (i, c)),
        ),
        compiler_params=_cparams("parallel", "parallel"),
    )(x2, scale, shift)
    return y.reshape(n, hw, c_p)


def se_gate(pooled_bn, w1, w2):
    """SE excitation gate from the pre-pooled (N, Cp) vector (tiny, VMEM-resident)."""
    n, c_p = pooled_bn.shape
    return pl.pallas_call(
        _se_kernel,
        out_shape=jax.ShapeDtypeStruct((n, c_p), jnp.float32),
        compiler_params=pltpu.CompilerParams(vmem_limit_bytes=_VMEM_LIMIT),
    )(pooled_bn.astype(jnp.bfloat16), w1, w2)


def fused_tail(y, y_scale, y_shift, gate, r, r_scale, r_shift):
    """One pass over the activation: relu(bn2(y) * gate + bn_shortcut(r))."""
    n, hw, c_p = y.shape
    thw = _row_tile(hw, cap=2048, prefer_split=(n < 2))
    tc = _divisor_tile(c_p, 128, 512)
    return pl.pallas_call(
        _tail_kernel,
        out_shape=jax.ShapeDtypeStruct((n, hw, c_p), jnp.bfloat16),
        grid_spec=pltpu.PrefetchScalarGridSpec(
            num_scalar_prefetch=0,
            grid=(n, hw // thw, c_p // tc),
            in_specs=[
                pl.BlockSpec((1, thw, tc), lambda b, i, c: (b, i, c)),
                pl.BlockSpec((1, 1, tc), lambda b, i, c: (0, 0, c)),
                pl.BlockSpec((1, 1, tc), lambda b, i, c: (0, 0, c)),
                pl.BlockSpec((1, 1, tc), lambda b, i, c: (b, 0, c)),
                pl.BlockSpec((1, thw, tc), lambda b, i, c: (b, i, c)),
                pl.BlockSpec((1, 1, tc), lambda b, i, c: (0, 0, c)),
                pl.BlockSpec((1, 1, tc), lambda b, i, c: (0, 0, c)),
            ],
            out_specs=pl.BlockSpec((1, thw, tc), lambda b, i, c: (b, i, c)),
        ),
        compiler_params=_cparams("parallel", "parallel", "parallel"),
    )(y, y_scale.reshape(1, 1, c_p), y_shift.reshape(1, 1, c_p),
      gate.reshape(n, 1, c_p), r, r_scale.reshape(1, 1, c_p),
      r_shift.reshape(1, 1, c_p))


# ----------------------------------------------------------------------------
# BasiclBlockSE forward
# ----------------------------------------------------------------------------

def basic_block_se(p, x_flat, h, w, cin, cout):
    """One BasiclBlockSE.  x_flat: (N, h*w, Cin_p) bf16 (channel-padded)."""
    downsample = cin != cout              # matches the PyTorch __init__ branch
    stride1 = 2 if downsample else 1
    n = x_flat.shape[0]
    c_p = p["bn1_g"].shape[-1]

    # conv1 -> bn1 (batch stats, stats come free from the conv epilogue) + ReLU
    y1, sm1, sq1, oh, ow = conv2d(x_flat, p["conv1_w"], h, w,
                                  kh=3, kw=3, stride=stride1, padding=1)
    sc1, sh1 = _bn_scale_shift(sm1, sq1, n * oh * ow, p["bn1_g"], p["bn1_b"])
    a1 = affine(y1, sc1, sh1, relu=True)

    # conv2; bn2 + SE + residual + ReLU are fused into one pass over y2 below.
    y2, sm2, sq2, oh, ow = conv2d(a1, p["conv2_w"], oh, ow,
                                  kh=3, kw=3, stride=1, padding=1)
    sc2, sh2 = _bn_scale_shift(sm2, sq2, n * oh * ow, p["bn2_g"], p["bn2_b"])
    # GAP(bn2(y2))_{n,c} = spatial_mean(y2)*scale + shift  -- no activation re-read.
    pooled_bn = (sm2 / float(oh * ow)) * sc2 + sh2          # (N, Cp)
    gate = se_gate(pooled_bn, p["se_w1"], p["se_w2"])       # (N, Cp) sigmoid gate

    if downsample:
        r, smr, sqr, _, _ = conv2d(x_flat, p["sc_w"], h, w,
                                   kh=1, kw=1, stride=2, padding=0)
        scr, shr = _bn_scale_shift(smr, sqr, n * oh * ow, p["sc_bn_g"], p["sc_bn_b"])
    else:
        r = x_flat                                          # identity shortcut
        scr = jnp.ones((1, c_p), jnp.float32)
        shr = jnp.zeros((1, c_p), jnp.float32)

    out = fused_tail(y2, sc2, sh2, gate, r, scr, shr)       # single HBM pass tail
    return out, oh, ow


def model_forward(params, x_nchw, cfgs):
    """Chain of BasiclBlockSE blocks; NCHW in, NCHW out (PyTorch semantics)."""
    n, c, h, w = x_nchw.shape
    c_p = _round_up(c, 128)
    x = jnp.transpose(x_nchw, (0, 2, 3, 1)).astype(jnp.bfloat16)   # NCHW -> NHWC bf16
    x = jnp.pad(x, ((0, 0), (0, 0), (0, 0), (0, c_p - c)))
    x = x.reshape(n, h * w, c_p)
    for p, (cin, cout) in zip(params, cfgs):
        x, h, w = basic_block_se(p, x, h, w, cin, cout)
    cout = cfgs[-1][1]
    x = x.reshape(n, h, w, -1)[:, :, :, :cout].astype(jnp.float32)
    return jnp.transpose(x, (0, 3, 1, 2))                          # NHWC -> NCHW


# ----------------------------------------------------------------------------
# Parameter init (weights pre-transposed / padded / bf16-cast once, at init)
# ----------------------------------------------------------------------------

def _prep_conv_w(w):
    """(Cout, Cin, KH, KW) f32 -> (KH*KW, Cin_p, Cout_p) bf16 matmul layout."""
    cout, cin, kh, kw = w.shape
    cin_p, cout_p = _round_up(cin, 128), _round_up(cout, 128)
    wt = jnp.transpose(w, (2, 3, 1, 0)).reshape(kh * kw, cin, cout)
    wt = jnp.pad(wt, ((0, 0), (0, cin_p - cin), (0, cout_p - cout)))
    return wt.astype(jnp.bfloat16)


def init_block_params(key, cin, cout, reduction=16):
    keys = jax.random.split(key, 5)
    c_p = _round_up(cout, 128)
    mid = cout // reduction
    mid_p = _round_up(mid, 128)

    def nrm(k, shape, std=0.05):
        return jax.random.normal(k, shape, jnp.float32) * std

    def bn_pair():
        g = jnp.pad(jnp.ones((1, cout), jnp.float32), ((0, 0), (0, c_p - cout)))
        b = jnp.zeros((1, c_p), jnp.float32)
        return g, b

    p = {}
    # Conv biases omitted: exactly cancelled by the following batch-stat BatchNorm.
    p["conv1_w"] = _prep_conv_w(nrm(keys[0], (cout, cin, 3, 3)))
    p["bn1_g"], p["bn1_b"] = bn_pair()
    p["conv2_w"] = _prep_conv_w(nrm(keys[1], (cout, cout, 3, 3)))
    p["bn2_g"], p["bn2_b"] = bn_pair()
    # SE Linear weights (bias=False), pre-transposed to (in, out) matmul layout.
    w1 = nrm(keys[2], (mid, cout))      # nn.Linear(cout, cout // 16).weight
    w2 = nrm(keys[3], (cout, mid))      # nn.Linear(cout // 16, cout).weight
    p["se_w1"] = jnp.pad(w1.T, ((0, c_p - cout), (0, mid_p - mid))).astype(jnp.bfloat16)
    p["se_w2"] = jnp.pad(w2.T, ((0, mid_p - mid), (0, c_p - cout))).astype(jnp.bfloat16)
    if cin != cout:
        p["sc_w"] = _prep_conv_w(nrm(keys[4], (cout, cin, 1, 1)))
        p["sc_bn_g"], p["sc_bn_b"] = bn_pair()
    return p


# ----------------------------------------------------------------------------

if __name__ == "__main__":
    key = jax.random.PRNGKey(0)
    k1, k2, kx = jax.random.split(key, 3)

    # Two instantiations of BasiclBlockSE covering both __init__ branches:
    #   (64 -> 128): downsample branch (stride-2 conv1 + 1x1 stride-2 shortcut + BN)
    #   (128 -> 128): identity-shortcut branch
    cfgs = ((64, 128), (128, 128))
    params = [init_block_params(k1, 64, 128), init_block_params(k2, 128, 128)]

    x = jax.random.normal(kx, (2, 64, 16, 16), jnp.float32)

    fwd = jax.jit(functools.partial(model_forward, cfgs=cfgs))
    out = fwd(params, x)
    jax.block_until_ready(out)
    assert out.shape == (2, 128, 8, 8), out.shape
    assert bool(jnp.all(jnp.isfinite(out)))
    print("KERNEL_OK")
</pallas_src>

<mosaic_0001>
module attributes {stable_mosaic.version = 11 : i64} {
  func.func @_conv_kernel(%arg0: i32, %arg1: i32, %arg2: memref<1x8x8x128xbf16, #tpu.memory_space<vmem>>, %arg3: memref<1x128x128xbf16, #tpu.memory_space<vmem>>, %arg4: memref<1x64x128xbf16, #tpu.memory_space<vmem>>, %arg5: memref<1x1x128xf32, #tpu.memory_space<vmem>>, %arg6: memref<1x1x128xf32, #tpu.memory_space<vmem>>, %arg7: memref<64x128xf32, #tpu.memory_space<vmem>>) attributes {dimension_semantics = [#tpu.dimension_semantics<parallel>, #tpu.dimension_semantics<parallel>], iteration_bounds = array<i64: 1, 2>, scalar_prefetch = 0 : i64, scratch_operands = 1 : i64, tpu.core_type = #tpu.core_type<tc>, window_params = [{transform_indices = @transform_0, window_bounds = array<i64: 1, 8, 8, 128>}, {transform_indices = @transform_1, window_bounds = array<i64: 1, 128, 128>}, {transform_indices = @transform_2, window_bounds = array<i64: 1, 64, 128>}, {transform_indices = @transform_3, window_bounds = array<i64: 1, 1, 128>}, {transform_indices = @transform_4, window_bounds = array<i64: 1, 1, 128>}]} {
    %cst = arith.constant 0.000000e+00 : f32
    %0 = vector.broadcast %cst : f32 to vector<64x128xf32>
    %c0 = arith.constant 0 : index
    %c0_0 = arith.constant 0 : index
    %1 = vector.load %arg7[%c0, %c0_0] : memref<64x128xf32, #tpu.memory_space<vmem>>, vector<64x128xf32>
    tpu.vector_store %arg7[%c0, %c0_0], %0 {strides = array<i32>} : memref<64x128xf32, #tpu.memory_space<vmem>>, vector<64x128xf32>,
    %c0_1 = arith.constant 0 : index
    %c0_2 = arith.constant 0 : index
    %c0_3 = arith.constant 0 : index
    %c0_4 = arith.constant 0 : index
    %2 = vector.load %arg2[%c0_1, %c0_2, %c0_3, %c0_4] : memref<1x8x8x128xbf16, #tpu.memory_space<vmem>>, vector<1x8x8x128xbf16>
    %c0_5 = arith.constant 0 : index
    %c0_6 = arith.constant 0 : index
    %3 = vector.load %arg7[%c0_5, %c0_6] : memref<64x128xf32, #tpu.memory_space<vmem>>, vector<64x128xf32>
    %4 = vector.shape_cast %2 : vector<1x8x8x128xbf16> to vector<64x128xbf16>
    %c0_7 = arith.constant 0 : index
    %c0_8 = arith.constant 0 : index
    %c0_9 = arith.constant 0 : index
    %5 = vector.load %arg3[%c0_7, %c0_8, %c0_9] : memref<1x128x128xbf16, #tpu.memory_space<vmem>>, vector<1x128x128xbf16>
    %6 = vector.shape_cast %5 : vector<1x128x128xbf16> to vector<128x128xbf16>
    %cst_10 = arith.constant dense<0.000000e+00> : vector<64x128xf32>
    %7 = tpu.matmul %4, %6, %cst_10 {dimension_numbers = #tpu.dot_dimension_numbers<[1], [0], [0], [1], [0, 0, 1, 1], [], []>} : vector<64x128xbf16>, vector<128x128xbf16>, vector<64x128xf32> -> vector<64x128xf32>
    %8 = arith.addf %3, %7 : vector<64x128xf32>
    %c0_11 = arith.constant 0 : index
    %c0_12 = arith.constant 0 : index
    %9 = vector.load %arg7[%c0_11, %c0_12] : memref<64x128xf32, #tpu.memory_space<vmem>>, vector<64x128xf32>
    tpu.vector_store %arg7[%c0_11, %c0_12], %8 {strides = array<i32>} : memref<64x128xf32, #tpu.memory_space<vmem>>, vector<64x128xf32>,
    %c0_13 = arith.constant 0 : index
    %c0_14 = arith.constant 0 : index
    %10 = vector.load %arg7[%c0_13, %c0_14] : memref<64x128xf32, #tpu.memory_space<vmem>>, vector<64x128xf32>
    %11 = vector.shape_cast %10 : vector<64x128xf32> to vector<1x64x128xf32>
    %12 = arith.truncf %11 : vector<1x64x128xf32> to vector<1x64x128xbf16>
    %c0_15 = arith.constant 0 : index
    %c0_16 = arith.constant 0 : index
    %c0_17 = arith.constant 0 : index
    %13 = vector.load %arg4[%c0_15, %c0_16, %c0_17] : memref<1x64x128xbf16, #tpu.memory_space<vmem>>, vector<1x64x128xbf16>
    tpu.vector_store %arg4[%c0_15, %c0_16, %c0_17], %12 {strides = array<i32>} : memref<1x64x128xbf16, #tpu.memory_space<vmem>>, vector<1x64x128xbf16>,
    %cst_18 = arith.constant dense<0.000000e+00> : vector<1x128xf32>
    %14 = vector.multi_reduction <add>, %11, %cst_18 [1] : vector<1x64x128xf32> to vector<1x128xf32>
    %15 = vector.shape_cast %14 : vector<1x128xf32> to vector<1x1x128xf32>
    %c0_19 = arith.constant 0 : index
    %c0_20 = arith.constant 0 : index
    %c0_21 = arith.constant 0 : index
    %16 = vector.load %arg5[%c0_19, %c0_20, %c0_21] : memref<1x1x128xf32, #tpu.memory_space<vmem>>, vector<1x1x128xf32>
    tpu.vector_store %arg5[%c0_19, %c0_20, %c0_21], %15 {strides = array<i32>} : memref<1x1x128xf32, #tpu.memory_space<vmem>>, vector<1x1x128xf32>,
    %17 = arith.mulf %11, %11 : vector<1x64x128xf32>
    %cst_22 = arith.constant dense<0.000000e+00> : vector<1x128xf32>
    %18 = vector.multi_reduction <add>, %17, %cst_22 [1] : vector<1x64x128xf32> to vector<1x128xf32>
    %19 = vector.shape_cast %18 : vector<1x128xf32> to vector<1x1x128xf32>
    %c0_23 = arith.constant 0 : index
    %c0_24 = arith.constant 0 : index
    %c0_25 = arith.constant 0 : index
    %20 = vector.load %arg6[%c0_23, %c0_24, %c0_25] : memref<1x1x128xf32, #tpu.memory_space<vmem>>, vector<1x1x128xf32>
    tpu.vector_store %arg6[%c0_23, %c0_24, %c0_25], %19 {strides = array<i32>} : memref<1x1x128xf32, #tpu.memory_space<vmem>>, vector<1x1x128xf32>,
    return
  }
  func.func @transform_0(%arg0: i32, %arg1: i32) -> (i32, i32, i32, i32) {
    %c0_i32 = arith.constant 0 : i32
    %c0_i32_0 = arith.constant 0 : i32
    %c0_i32_1 = arith.constant 0 : i32
    %c0_i32_2 = arith.constant 0 : i32
    return %arg1, %c0_i32, %c0_i32_0, %c0_i32_1 : i32, i32, i32, i32
  }
  func.func @transform_1(%arg0: i32, %arg1: i32) -> (i32, i32, i32) {
    %c0_i32 = arith.constant 0 : i32
    %c0_i32_0 = arith.constant 0 : i32
    %c0_i32_1 = arith.constant 0 : i32
    return %c0_i32, %c0_i32_0, %arg0 : i32, i32, i32
  }
  func.func @transform_2(%arg0: i32, %arg1: i32) -> (i32, i32, i32) {
    %c0_i32 = arith.constant 0 : i32
    %c0_i32_0 = arith.constant 0 : i32
    return %arg1, %c0_i32, %arg0 : i32, i32, i32
  }
  func.func @transform_3(%arg0: i32, %arg1: i32) -> (i32, i32, i32) {
    %c0_i32 = arith.constant 0 : i32
    %c0_i32_0 = arith.constant 0 : i32
    return %arg1, %c0_i32, %arg0 : i32, i32, i32
  }
  func.func @transform_4(%arg0: i32, %arg1: i32) -> (i32, i32, i32) {
    %c0_i32 = arith.constant 0 : i32
    %c0_i32_0 = arith.constant 0 : i32
    return %arg1, %c0_i32, %arg0 : i32, i32, i32
  }
}

module attributes {stable_mosaic.version = 11 : i64} {
  func.func @_conv_kernel(%arg0: i32, %arg1: i32, %arg2: memref<1x9x9x512xbf16, #tpu.memory_space<vmem>>, %arg3: memref<9x128x128xbf16, #tpu.memory_space<vmem>>, %arg4: memref<1x64x128xbf16, #tpu.memory_space<vmem>>, %arg5: memref<1x1x128xf32, #tpu.memory_space<vmem>>, %arg6: memref<1x1x128xf32, #tpu.memory_space<vmem>>, %arg7: memref<64x128xf32, #tpu.memory_space<vmem>>) attributes {dimension_semantics = [#tpu.dimension_semantics<parallel>, #tpu.dimension_semantics<parallel>], iteration_bounds = array<i64: 1, 2>, scalar_prefetch = 0 : i64, scratch_operands = 1 : i64, tpu.core_type = #tpu.core_type<tc>, window_params = [{transform_indices = @transform_0, window_bounds = array<i64: 1, 9, 9, 512>}, {transform_indices = @transform_1, window_bounds = array<i64: 9, 128, 128>}, {transform_indices = @transform_2, window_bounds = array<i64: 1, 64, 128>}, {transform_indices = @transform_3, window_bounds = array<i64: 1, 1, 128>}, {transform_indices = @transform_4, window_bounds = array<i64: 1, 1, 128>}]} {
    %cst = arith.constant 0.000000e+00 : f32
    %0 = vector.broadcast %cst : f32 to vector<64x128xf32>
    %c0 = arith.constant 0 : index
    %c0_0 = arith.constant 0 : index
    %1 = vector.load %arg7[%c0, %c0_0] : memref<64x128xf32, #tpu.memory_space<vmem>>, vector<64x128xf32>
    tpu.vector_store %arg7[%c0, %c0_0], %0 {strides = array<i32>} : memref<64x128xf32, #tpu.memory_space<vmem>>, vector<64x128xf32>,
    %c0_1 = arith.constant 0 : index
    %c0_2 = arith.constant 0 : index
    %c0_3 = arith.constant 0 : index
    %c0_4 = arith.constant 0 : index
    %2 = vector.load %arg2[%c0_1, %c0_2, %c0_3, %c0_4] : memref<1x9x9x512xbf16, #tpu.memory_space<vmem>>, vector<1x8x8x128xbf16>
    %c0_5 = arith.constant 0 : index
    %c0_6 = arith.constant 0 : index
    %3 = vector.load %arg7[%c0_5, %c0_6] : memref<64x128xf32, #tpu.memory_space<vmem>>, vector<64x128xf32>
    %4 = vector.shape_cast %2 : vector<1x8x8x128xbf16> to vector<64x128xbf16>
    %c0_7 = arith.constant 0 : index
    %c0_8 = arith.constant 0 : index
    %c0_9 = arith.constant 0 : index
    %5 = vector.load %arg3[%c0_7, %c0_8, %c0_9] : memref<9x128x128xbf16, #tpu.memory_space<vmem>>, vector<1x128x128xbf16>
    %6 = vector.shape_cast %5 : vector<1x128x128xbf16> to vector<128x128xbf16>
    %cst_10 = arith.constant dense<0.000000e+00> : vector<64x128xf32>
    %7 = tpu.matmul %4, %6, %cst_10 {dimension_numbers = #tpu.dot_dimension_numbers<[1], [0], [0], [1], [0, 0, 1, 1], [], []>} : vector<64x128xbf16>, vector<128x128xbf16>, vector<64x128xf32> -> vector<64x128xf32>
    %8 = arith.addf %3, %7 : vector<64x128xf32>
    %c0_11 = arith.constant 0 : index
    %c0_12 = arith.constant 0 : index
    %9 = vector.load %arg7[%c0_11, %c0_12] : memref<64x128xf32, #tpu.memory_space<vmem>>, vector<64x128xf32>
    tpu.vector_store %arg7[%c0_11, %c0_12], %8 {strides = array<i32>} : memref<64x128xf32, #tpu.memory_space<vmem>>, vector<64x128xf32>,
    %c0_13 = arith.constant 0 : index
    %c0_14 = arith.constant 0 : index
    %c0_15 = arith.constant 0 : index
    %c128 = arith.constant 128 : index
    %10 = vector.load %arg2[%c0_13, %c0_14, %c0_15, %c128] : memref<1x9x9x512xbf16, #tpu.memory_space<vmem>>, vector<1x8x8x128xbf16>
    %c0_16 = arith.constant 0 : index
    %c0_17 = arith.constant 0 : index
    %11 = vector.load %arg7[%c0_16, %c0_17] : memref<64x128xf32, #tpu.memory_space<vmem>>, vector<64x128xf32>
    %12 = vector.shape_cast %10 : vector<1x8x8x128xbf16> to vector<64x128xbf16>
    %c1 = arith.constant 1 : index
    %c0_18 = arith.constant 0 : index
    %c0_19 = arith.constant 0 : index
    %13 = vector.load %arg3[%c1, %c0_18, %c0_19] : memref<9x128x128xbf16, #tpu.memory_space<vmem>>, vector<1x128x128xbf16>
    %14 = vector.shape_cast %13 : vector<1x128x128xbf16> to vector<128x128xbf16>
    %cst_20 = arith.constant dense<0.000000e+00> : vector<64x128xf32>
    %15 = tpu.matmul %12, %14, %cst_20 {dimension_numbers = #tpu.dot_dimension_numbers<[1], [0], [0], [1], [0, 0, 1, 1], [], []>} : vector<64x128xbf16>, vector<128x128xbf16>, vector<64x128xf32> -> vector<64x128xf32>
    %16 = arith.addf %11, %15 : vector<64x128xf32>
    %c0_21 = arith.constant 0 : index
    %c0_22 = arith.constant 0 : index
    %17 = vector.load %arg7[%c0_21, %c0_22] : memref<64x128xf32, #tpu.memory_space<vmem>>, vector<64x128xf32>
    tpu.vector_store %arg7[%c0_21, %c0_22], %16 {strides = array<i32>} : memref<64x128xf32, #tpu.memory_space<vmem>>, vector<64x128xf32>,
    %c0_23 = arith.constant 0 : index
    %c0_24 = arith.constant 0 : index
    %c1_25 = arith.constant 1 : index
    %c0_26 = arith.constant 0 : index
    %18 = vector.load %arg2[%c0_23, %c0_24, %c1_25, %c0_26] : memref<1x9x9x512xbf16, #tpu.memory_space<vmem>>, vector<1x8x8x128xbf16>
    %c0_27 = arith.constant 0 : index
    %c0_28 = arith.constant 0 : index
    %19 = vector.load %arg7[%c0_27, %c0_28] : memref<64x128xf32, #tpu.memory_space<vmem>>, vector<64x128xf32>
    %20 = vector.shape_cast %18 : vector<1x8x8x128xbf16> to vector<64x128xbf16>
    %c2 = arith.constant 2 : index
    %c0_29 = arith.constant 0 : index
    %c0_30 = arith.constant 0 : index
    %21 = vector.load %arg3[%c2, %c0_29, %c0_30] : memref<9x128x128xbf16, #tpu.memory_space<vmem>>, vector<1x128x128xbf16>
    %22 = vector.shape_cast %21 : vector<1x128x128xbf16> to vector<128x128xbf16>
    %cst_31 = arith.constant dense<0.000000e+00> : vector<64x128xf32>
    %23 = tpu.matmul %20, %22, %cst_31 {dimension_numbers = #tpu.dot_dimension_numbers<[1], [0], [0], [1], [0, 0, 1, 1], [], []>} : vector<64x128xbf16>, vector<128x128xbf16>, vector<64x128xf32> -> vector<64x128xf32>
    %24 = arith.addf %19, %23 : vector<64x128xf32>
    %c0_32 = arith.constant 0 : index
    %c0_33 = arith.constant 0 : index
    %25 = vector.load %arg7[%c0_32, %c0_33] : memref<64x128xf32, #tpu.memory_space<vmem>>, vector<64x128xf32>
    tpu.vector_store %arg7[%c0_32, %c0_33], %24 {strides = array<i32>} : memref<64x128xf32, #tpu.memory_space<vmem>>, vector<64x128xf32>,
    %c0_34 = arith.constant 0 : index
    %c0_35 = arith.constant 0 : index
    %c0_36 = arith.constant 0 : index
    %c256 = arith.constant 256 : index
    %26 = vector.load %arg2[%c0_34, %c0_35, %c0_36, %c256] : memref<1x9x9x512xbf16, #tpu.memory_space<vmem>>, vector<1x8x8x128xbf16>
    %c0_37 = arith.constant 0 : index
    %c0_38 = arith.constant 0 : index
    %27 = vector.load %arg7[%c0_37, %c0_38] : memref<64x128xf32, #tpu.memory_space<vmem>>, vector<64x128xf32>
    %28 = vector.shape_cast %26 : vector<1x8x8x128xbf16> to vector<64x128xbf16>
    %c3 = arith.constant 3 : index
    %c0_39 = arith.constant 0 : index
    %c0_40 = arith.constant 0 : index
    %29 = vector.load %arg3[%c3, %c0_39, %c0_40] : memref<9x128x128xbf16, #tpu.memory_space<vmem>>, vector<1x128x128xbf16>
    %30 = vector.shape_cast %29 : vector<1x128x128xbf16> to vector<128x128xbf16>
    %cst_41 = arith.constant dense<0.000000e+00> : vector<64x128xf32>
    %31 = tpu.matmul %28, %30, %cst_41 {dimension_numbers = #tpu.dot_dimension_numbers<[1], [0], [0], [1], [0, 0, 1, 1], [], []>} : vector<64x128xbf16>, vector<128x128xbf16>, vector<64x128xf32> -> vector<64x128xf32>
    %32 = arith.addf %27, %31 : vector<64x128xf32>
    %c0_42 = arith.constant 0 : index
    %c0_43 = arith.constant 0 : index
    %33 = vector.load %arg7[%c0_42, %c0_43] : memref<64x128xf32, #tpu.memory_space<vmem>>, vector<64x128xf32>
    tpu.vector_store %arg7[%c0_42, %c0_43], %32 {strides = array<i32>} : memref<64x128xf32, #tpu.memory_space<vmem>>, vector<64x128xf32>,
    %c0_44 = arith.constant 0 : index
    %c0_45 = arith.constant 0 : index
    %c0_46 = arith.constant 0 : index
    %c384 = arith.constant 384 : index
    %34 = vector.load %arg2[%c0_44, %c0_45, %c0_46, %c384] : memref<1x9x9x512xbf16, #tpu.memory_space<vmem>>, vector<1x8x8x128xbf16>
    %c0_47 = arith.constant 0 : index
    %c0_48 = arith.constant 0 : index
    %35 = vector.load %arg7[%c0_47, %c0_48] : memref<64x128xf32, #tpu.memory_space<vmem>>, vector<64x128xf32>
    %36 = vector.shape_cast %34 : vector<1x8x8x128xbf16> to vector<64x128xbf16>
    %c4 = arith.constant 4 : index
    %c0_49 = arith.constant 0 : index
    %c0_50 = arith.constant 0 : index
    %37 = vector.load %arg3[%c4, %c0_49, %c0_50] : memref<9x128x128xbf16, #tpu.memory_space<vmem>>, vector<1x128x128xbf16>
    %38 = vector.shape_cast %37 : vector<1x128x128xbf16> to vector<128x128xbf16>
    %cst_51 = arith.constant dense<0.000000e+00> : vector<64x128xf32>
    %39 = tpu.matmul %36, %38, %cst_51 {dimension_numbers = #tpu.dot_dimension_numbers<[1], [0], [0], [1], [0, 0, 1, 1], [], []>} : vector<64x128xbf16>, vector<128x128xbf16>, vector<64x128xf32> -> vector<64x128xf32>
    %40 = arith.addf %35, %39 : vector<64x128xf32>
    %c0_52 = arith.constant 0 : index
    %c0_53 = arith.constant 0 : index
    %41 = vector.load %arg7[%c0_52, %c0_53] : memref<64x128xf32, #tpu.memory_space<vmem>>, vector<64x128xf32>
    tpu.vector_store %arg7[%c0_52, %c0_53], %40 {strides = array<i32>} : memref<64x128xf32, #tpu.memory_space<vmem>>, vector<64x128xf32>,
    %c0_54 = arith.constant 0 : index
    %c0_55 = arith.constant 0 : index
    %c1_56 = arith.constant 1 : index
    %c256_57 = arith.constant 256 : index
    %42 = vector.load %arg2[%c0_54, %c0_55, %c1_56, %c256_57] : memref<1x9x9x512xbf16, #tpu.memory_space<vmem>>, vector<1x8x8x128xbf16>
    %c0_58 = arith.constant 0 : index
    %c0_59 = arith.constant 0 : index
    %43 = vector.load %arg7[%c0_58, %c0_59] : memref<64x128xf32, #tpu.memory_space<vmem>>, vector<64x128xf32>
    %44 = vector.shape_cast %42 : vector<1x8x8x128xbf16> to vector<64x128xbf16>
    %c5 = arith.constant 5 : index
    %c0_60 = arith.constant 0 : index
    %c0_61 = arith.constant 0 : index
    %45 = vector.load %arg3[%c5, %c0_60, %c0_61] : memref<9x128x128xbf16, #tpu.memory_space<vmem>>, vector<1x128x128xbf16>
    %46 = vector.shape_cast %45 : vector<1x128x128xbf16> to vector<128x128xbf16>
    %cst_62 = arith.constant dense<0.000000e+00> : vector<64x128xf32>
    %47 = tpu.matmul %44, %46, %cst_62 {dimension_numbers = #tpu.dot_dimension_numbers<[1], [0], [0], [1], [0, 0, 1, 1], [], []>} : vector<64x128xbf16>, vector<128x128xbf16>, vector<64x128xf32> -> vector<64x128xf32>
    %48 = arith.addf %43, %47 : vector<64x128xf32>
    %c0_63 = arith.constant 0 : index
    %c0_64 = arith.constant 0 : index
    %49 = vector.load %arg7[%c0_63, %c0_64] : memref<64x128xf32, #tpu.memory_space<vmem>>, vector<64x128xf32>
    tpu.vector_store %arg7[%c0_63, %c0_64], %48 {strides = array<i32>} : memref<64x128xf32, #tpu.memory_space<vmem>>, vector<64x128xf32>,
    %c0_65 = arith.constant 0 : index
    %c1_66 = arith.constant 1 : index
    %c0_67 = arith.constant 0 : index
    %c0_68 = arith.constant 0 : index
    %50 = vector.load %arg2[%c0_65, %c1_66, %c0_67, %c0_68] : memref<1x9x9x512xbf16, #tpu.memory_space<vmem>>, vector<1x8x8x128xbf16>
    %c0_69 = arith.constant 0 : index
    %c0_70 = arith.constant 0 : index
    %51 = vector.load %arg7[%c0_69, %c0_70] : memref<64x128xf32, #tpu.memory_space<vmem>>, vector<64x128xf32>
    %52 = vector.shape_cast %50 : vector<1x8x8x128xbf16> to vector<64x128xbf16>
    %c6 = arith.constant 6 : index
    %c0_71 = arith.constant 0 : index
    %c0_72 = arith.constant 0 : index
    %53 = vector.load %arg3[%c6, %c0_71, %c0_72] : memref<9x128x128xbf16, #tpu.memory_space<vmem>>, vector<1x128x128xbf16>
    %54 = vector.shape_cast %53 : vector<1x128x128xbf16> to vector<128x128xbf16>
    %cst_73 = arith.constant dense<0.000000e+00> : vector<64x128xf32>
    %55 = tpu.matmul %52, %54, %cst_73 {dimension_numbers = #tpu.dot_dimension_numbers<[1], [0], [0], [1], [0, 0, 1, 1], [], []>} : vector<64x128xbf16>, vector<128x128xbf16>, vector<64x128xf32> -> vector<64x128xf32>
    %56 = arith.addf %51, %55 : vector<64x128xf32>
    %c0_74 = arith.constant 0 : index
    %c0_75 = arith.constant 0 : index
    %57 = vector.load %arg7[%c0_74, %c0_75] : memref<64x128xf32, #tpu.memory_space<vmem>>, vector<64x128xf32>
    tpu.vector_store %arg7[%c0_74, %c0_75], %56 {strides = array<i32>} : memref<64x128xf32, #tpu.memory_space<vmem>>, vector<64x128xf32>,
    %c0_76 = arith.constant 0 : index
    %c1_77 = arith.constant 1 : index
    %c0_78 = arith.constant 0 : index
    %c128_79 = arith.constant 128 : index
    %58 = vector.load %arg2[%c0_76, %c1_77, %c0_78, %c128_79] : memref<1x9x9x512xbf16, #tpu.memory_space<vmem>>, vector<1x8x8x128xbf16>
    %c0_80 = arith.constant 0 : index
    %c0_81 = arith.constant 0 : index
    %59 = vector.load %arg7[%c0_80, %c0_81] : memref<64x128xf32, #tpu.memory_space<vmem>>, vector<64x128xf32>
    %60 = vector.shape_cast %58 : vector<1x8x8x128xbf16> to vector<64x128xbf16>
    %c7 = arith.constant 7 : index
    %c0_82 = arith.constant 0 : index
    %c0_83 = arith.constant 0 : index
    %61 = vector.load %arg3[%c7, %c0_82, %c0_83] : memref<9x128x128xbf16, #tpu.memory_space<vmem>>, vector<1x128x128xbf16>
    %62 = vector.shape_cast %61 : vector<1x128x128xbf16> to vector<128x128xbf16>
    %cst_84 = arith.constant dense<0.000000e+00> : vector<64x128xf32>
    %63 = tpu.matmul %60, %62, %cst_84 {dimension_numbers = #tpu.dot_dimension_numbers<[1], [0], [0], [1], [0, 0, 1, 1], [], []>} : vector<64x128xbf16>, vector<128x128xbf16>, vector<64x128xf32> -> vector<64x128xf32>
    %64 = arith.addf %59, %63 : vector<64x128xf32>
    %c0_85 = arith.constant 0 : index
    %c0_86 = arith.constant 0 : index
    %65 = vector.load %arg7[%c0_85, %c0_86] : memref<64x128xf32, #tpu.memory_space<vmem>>, vector<64x128xf32>
    tpu.vector_store %arg7[%c0_85, %c0_86], %64 {strides = array<i32>} : memref<64x128xf32, #tpu.memory_space<vmem>>, vector<64x128xf32>,
    %c0_87 = arith.constant 0 : index
    %c1_88 = arith.constant 1 : index
    %c1_89 = arith.constant 1 : index
    %c0_90 = arith.constant 0 : index
    %66 = vector.load %arg2[%c0_87, %c1_88, %c1_89, %c0_90] : memref<1x9x9x512xbf16, #tpu.memory_space<vmem>>, vector<1x8x8x128xbf16>
    %c0_91 = arith.constant 0 : index
    %c0_92 = arith.constant 0 : index
    %67 = vector.load %arg7[%c0_91, %c0_92] : memref<64x128xf32, #tpu.memory_space<vmem>>, vector<64x128xf32>
    %68 = vector.shape_cast %66 : vector<1x8x8x128xbf16> to vector<64x128xbf16>
    %c8 = arith.constant 8 : index
    %c0_93 = arith.constant 0 : index
    %c0_94 = arith.constant 0 : index
    %69 = vector.load %arg3[%c8, %c0_93, %c0_94] : memref<9x128x128xbf16, #tpu.memory_space<vmem>>, vector<1x128x128xbf16>
    %70 = vector.shape_cast %69 : vector<1x128x128xbf16> to vector<128x128xbf16>
    %cst_95 = arith.constant dense<0.000000e+00> : vector<64x128xf32>
    %71 = tpu.matmul %68, %70, %cst_95 {dimension_numbers = #tpu.dot_dimension_numbers<[1], [0], [0], [1], [0, 0, 1, 1], [], []>} : vector<64x128xbf16>, vector<128x128xbf16>, vector<64x128xf32> -> vector<64x128xf32>
    %72 = arith.addf %67, %71 : vector<64x128xf32>
    %c0_96 = arith.constant 0 : index
    %c0_97 = arith.constant 0 : index
    %73 = vector.load %arg7[%c0_96, %c0_97] : memref<64x128xf32, #tpu.memory_space<vmem>>, vector<64x128xf32>
    tpu.vector_store %arg7[%c0_96, %c0_97], %72 {strides = array<i32>} : memref<64x128xf32, #tpu.memory_space<vmem>>, vector<64x128xf32>,
    %c0_98 = arith.constant 0 : index
    %c0_99 = arith.constant 0 : index
    %74 = vector.load %arg7[%c0_98, %c0_99] : memref<64x128xf32, #tpu.memory_space<vmem>>, vector<64x128xf32>
    %75 = vector.shape_cast %74 : vector<64x128xf32> to vector<1x64x128xf32>
    %76 = arith.truncf %75 : vector<1x64x128xf32> to vector<1x64x128xbf16>
    %c0_100 = arith.constant 0 : index
    %c0_101 = arith.constant 0 : index
    %c0_102 = arith.constant 0 : index
    %77 = vector.load %arg4[%c0_100, %c0_101, %c0_102] : memref<1x64x128xbf16, #tpu.memory_space<vmem>>, vector<1x64x128xbf16>
    tpu.vector_store %arg4[%c0_100, %c0_101, %c0_102], %76 {strides = array<i32>} : memref<1x64x128xbf16, #tpu.memory_space<vmem>>, vector<1x64x128xbf16>,
    %cst_103 = arith.constant dense<0.000000e+00> : vector<1x128xf32>
    %78 = vector.multi_reduction <add>, %75, %cst_103 [1] : vector<1x64x128xf32> to vector<1x128xf32>
    %79 = vector.shape_cast %78 : vector<1x128xf32> to vector<1x1x128xf32>
    %c0_104 = arith.constant 0 : index
    %c0_105 = arith.constant 0 : index
    %c0_106 = arith.constant 0 : index
    %80 = vector.load %arg5[%c0_104, %c0_105, %c0_106] : memref<1x1x128xf32, #tpu.memory_space<vmem>>, vector<1x1x128xf32>
    tpu.vector_store %arg5[%c0_104, %c0_105, %c0_106], %79 {strides = array<i32>} : memref<1x1x128xf32, #tpu.memory_space<vmem>>, vector<1x1x128xf32>,
    %81 = arith.mulf %75, %75 : vector<1x64x128xf32>
    %cst_107 = arith.constant dense<0.000000e+00> : vector<1x128xf32>
    %82 = vector.multi_reduction <add>, %81, %cst_107 [1] : vector<1x64x128xf32> to vector<1x128xf32>
    %83 = vector.shape_cast %82 : vector<1x128xf32> to vector<1x1x128xf32>
    %c0_108 = arith.constant 0 : index
    %c0_109 = arith.constant 0 : index
    %c0_110 = arith.constant 0 : index
    %84 = vector.load %arg6[%c0_108, %c0_109, %c0_110] : memref<1x1x128xf32, #tpu.memory_space<vmem>>, vector<1x1x128xf32>
    tpu.vector_store %arg6[%c0_108, %c0_109, %c0_110], %83 {strides = array<i32>} : memref<1x1x128xf32, #tpu.memory_space<vmem>>, vector<1x1x128xf32>,
    return
  }
  func.func @transform_0(%arg0: i32, %arg1: i32) -> (i32, i32, i32, i32) {
    %c0_i32 = arith.constant 0 : i32
    %c0_i32_0 = arith.constant 0 : i32
    %c0_i32_1 = arith.constant 0 : i32
    %c0_i32_2 = arith.constant 0 : i32
    return %arg1, %c0_i32, %c0_i32_0, %c0_i32_1 : i32, i32, i32, i32
  }
  func.func @transform_1(%arg0: i32, %arg1: i32) -> (i32, i32, i32) {
    %c0_i32 = arith.constant 0 : i32
    %c0_i32_0 = arith.constant 0 : i32
    %c0_i32_1 = arith.constant 0 : i32
    return %c0_i32, %c0_i32_0, %arg0 : i32, i32, i32
  }
  func.func @transform_2(%arg0: i32, %arg1: i32) -> (i32, i32, i32) {
    %c0_i32 = arith.constant 0 : i32
    %c0_i32_0 = arith.constant 0 : i32
    return %arg1, %c0_i32, %arg0 : i32, i32, i32
  }
  func.func @transform_3(%arg0: i32, %arg1: i32) -> (i32, i32, i32) {
    %c0_i32 = arith.constant 0 : i32
    %c0_i32_0 = arith.constant 0 : i32
    return %arg1, %c0_i32, %arg0 : i32, i32, i32
  }
  func.func @transform_4(%arg0: i32, %arg1: i32) -> (i32, i32, i32) {
    %c0_i32 = arith.constant 0 : i32
    %c0_i32_0 = arith.constant 0 : i32
    return %arg1, %c0_i32, %arg0 : i32, i32, i32
  }
}

module attributes {stable_mosaic.version = 11 : i64} {
  func.func @_affine_kernel(%arg0: i32, %arg1: i32, %arg2: memref<64x128xbf16, #tpu.memory_space<vmem>>, %arg3: memref<1x128xf32, #tpu.memory_space<vmem>>, %arg4: memref<1x128xf32, #tpu.memory_space<vmem>>, %arg5: memref<64x128xbf16, #tpu.memory_space<vmem>>) attributes {dimension_semantics = [#tpu.dimension_semantics<parallel>, #tpu.dimension_semantics<parallel>], iteration_bounds = array<i64: 2, 1>, scalar_prefetch = 0 : i64, scratch_operands = 0 : i64, tpu.core_type = #tpu.core_type<tc>, window_params = [{transform_indices = @transform_0, window_bounds = array<i64: 64, 128>}, {transform_indices = @transform_1, window_bounds = array<i64: 1, 128>}, {transform_indices = @transform_2, window_bounds = array<i64: 1, 128>}, {transform_indices = @transform_3, window_bounds = array<i64: 64, 128>}]} {
    %c0 = arith.constant 0 : index
    %c0_0 = arith.constant 0 : index
    %0 = vector.load %arg2[%c0, %c0_0] : memref<64x128xbf16, #tpu.memory_space<vmem>>, vector<64x128xbf16>
    %1 = arith.extf %0 : vector<64x128xbf16> to vector<64x128xf32>
    %c0_1 = arith.constant 0 : index
    %c0_2 = arith.constant 0 : index
    %2 = vector.load %arg3[%c0_1, %c0_2] : memref<1x128xf32, #tpu.memory_space<vmem>>, vector<1x128xf32>
    %3 = vector.broadcast %2 : vector<1x128xf32> to vector<64x128xf32>
    %4 = arith.mulf %1, %3 : vector<64x128xf32>
    %c0_3 = arith.constant 0 : index
    %c0_4 = arith.constant 0 : index
    %5 = vector.load %arg4[%c0_3, %c0_4] : memref<1x128xf32, #tpu.memory_space<vmem>>, vector<1x128xf32>
    %6 = vector.broadcast %5 : vector<1x128xf32> to vector<64x128xf32>
    %7 = arith.addf %4, %6 : vector<64x128xf32>
    %cst = arith.constant 0.000000e+00 : f32
    %8 = vector.broadcast %cst : f32 to vector<64x128xf32>
    %9 = arith.maximumf %7, %8 : vector<64x128xf32>
    %10 = arith.truncf %9 : vector<64x128xf32> to vector<64x128xbf16>
    %c0_5 = arith.constant 0 : index
    %c0_6 = arith.constant 0 : index
    %11 = vector.load %arg5[%c0_5, %c0_6] : memref<64x128xbf16, #tpu.memory_space<vmem>>, vector<64x128xbf16>
    tpu.vector_store %arg5[%c0_5, %c0_6], %10 {strides = array<i32>} : memref<64x128xbf16, #tpu.memory_space<vmem>>, vector<64x128xbf16>,
    return
  }
  func.func @transform_0(%arg0: i32, %arg1: i32) -> (i32, i32) {
    %c0_i32 = arith.constant 0 : i32
    return %arg0, %arg1 : i32, i32
  }
  func.func @transform_1(%arg0: i32, %arg1: i32) -> (i32, i32) {
    %c0_i32 = arith.constant 0 : i32
    %c0_i32_0 = arith.constant 0 : i32
    return %c0_i32, %arg1 : i32, i32
  }
  func.func @transform_2(%arg0: i32, %arg1: i32) -> (i32, i32) {
    %c0_i32 = arith.constant 0 : i32
    %c0_i32_0 = arith.constant 0 : i32
    return %c0_i32, %arg1 : i32, i32
  }
  func.func @transform_3(%arg0: i32, %arg1: i32) -> (i32, i32) {
    %c0_i32 = arith.constant 0 : i32
    return %arg0, %arg1 : i32, i32
  }
}

module attributes {stable_mosaic.version = 11 : i64} {
  func.func @_conv_kernel(%arg0: i32, %arg1: i32, %arg2: memref<1x10x10x128xbf16, #tpu.memory_space<vmem>>, %arg3: memref<9x128x128xbf16, #tpu.memory_space<vmem>>, %arg4: memref<1x64x128xbf16, #tpu.memory_space<vmem>>, %arg5: memref<1x1x128xf32, #tpu.memory_space<vmem>>, %arg6: memref<1x1x128xf32, #tpu.memory_space<vmem>>, %arg7: memref<64x128xf32, #tpu.memory_space<vmem>>) attributes {dimension_semantics = [#tpu.dimension_semantics<parallel>, #tpu.dimension_semantics<parallel>], iteration_bounds = array<i64: 1, 2>, scalar_prefetch = 0 : i64, scratch_operands = 1 : i64, tpu.core_type = #tpu.core_type<tc>, window_params = [{transform_indices = @transform_0, window_bounds = array<i64: 1, 10, 10, 128>}, {transform_indices = @transform_1, window_bounds = array<i64: 9, 128, 128>}, {transform_indices = @transform_2, window_bounds = array<i64: 1, 64, 128>}, {transform_indices = @transform_3, window_bounds = array<i64: 1, 1, 128>}, {transform_indices = @transform_4, window_bounds = array<i64: 1, 1, 128>}]} {
    %cst = arith.constant 0.000000e+00 : f32
    %0 = vector.broadcast %cst : f32 to vector<64x128xf32>
    %c0 = arith.constant 0 : index
    %c0_0 = arith.constant 0 : index
    %1 = vector.load %arg7[%c0, %c0_0] : memref<64x128xf32, #tpu.memory_space<vmem>>, vector<64x128xf32>
    tpu.vector_store %arg7[%c0, %c0_0], %0 {strides = array<i32>} : memref<64x128xf32, #tpu.memory_space<vmem>>, vector<64x128xf32>,
    %c0_1 = arith.constant 0 : index
    %c0_2 = arith.constant 0 : index
    %c0_3 = arith.constant 0 : index
    %c0_4 = arith.constant 0 : index
    %2 = vector.load %arg2[%c0_1, %c0_2, %c0_3, %c0_4] : memref<1x10x10x128xbf16, #tpu.memory_space<vmem>>, vector<1x8x8x128xbf16>
    %c0_5 = arith.constant 0 : index
    %c0_6 = arith.constant 0 : index
    %3 = vector.load %arg7[%c0_5, %c0_6] : memref<64x128xf32, #tpu.memory_space<vmem>>, vector<64x128xf32>
    %4 = vector.shape_cast %2 : vector<1x8x8x128xbf16> to vector<64x128xbf16>
    %c0_7 = arith.constant 0 : index
    %c0_8 = arith.constant 0 : index
    %c0_9 = arith.constant 0 : index
    %5 = vector.load %arg3[%c0_7, %c0_8, %c0_9] : memref<9x128x128xbf16, #tpu.memory_space<vmem>>, vector<1x128x128xbf16>
    %6 = vector.shape_cast %5 : vector<1x128x128xbf16> to vector<128x128xbf16>
    %cst_10 = arith.constant dense<0.000000e+00> : vector<64x128xf32>
    %7 = tpu.matmul %4, %6, %cst_10 {dimension_numbers = #tpu.dot_dimension_numbers<[1], [0], [0], [1], [0, 0, 1, 1], [], []>} : vector<64x128xbf16>, vector<128x128xbf16>, vector<64x128xf32> -> vector<64x128xf32>
    %8 = arith.addf %3, %7 : vector<64x128xf32>
    %c0_11 = arith.constant 0 : index
    %c0_12 = arith.constant 0 : index
    %9 = vector.load %arg7[%c0_11, %c0_12] : memref<64x128xf32, #tpu.memory_space<vmem>>, vector<64x128xf32>
    tpu.vector_store %arg7[%c0_11, %c0_12], %8 {strides = array<i32>} : memref<64x128xf32, #tpu.memory_space<vmem>>, vector<64x128xf32>,
    %c0_13 = arith.constant 0 : index
    %c0_14 = arith.constant 0 : index
    %c1 = arith.constant 1 : index
    %c0_15 = arith.constant 0 : index
    %10 = vector.load %arg2[%c0_13, %c0_14, %c1, %c0_15] : memref<1x10x10x128xbf16, #tpu.memory_space<vmem>>, vector<1x8x8x128xbf16>
    %c0_16 = arith.constant 0 : index
    %c0_17 = arith.constant 0 : index
    %11 = vector.load %arg7[%c0_16, %c0_17] : memref<64x128xf32, #tpu.memory_space<vmem>>, vector<64x128xf32>
    %12 = vector.shape_cast %10 : vector<1x8x8x128xbf16> to vector<64x128xbf16>
    %c1_18 = arith.constant 1 : index
    %c0_19 = arith.constant 0 : index
    %c0_20 = arith.constant 0 : index
    %13 = vector.load %arg3[%c1_18, %c0_19, %c0_20] : memref<9x128x128xbf16, #tpu.memory_space<vmem>>, vector<1x128x128xbf16>
    %14 = vector.shape_cast %13 : vector<1x128x128xbf16> to vector<128x128xbf16>
    %cst_21 = arith.constant dense<0.000000e+00> : vector<64x128xf32>
    %15 = tpu.matmul %12, %14, %cst_21 {dimension_numbers = #tpu.dot_dimension_numbers<[1], [0], [0], [1], [0, 0, 1, 1], [], []>} : vector<64x128xbf16>, vector<128x128xbf16>, vector<64x128xf32> -> vector<64x128xf32>
    %16 = arith.addf %11, %15 : vector<64x128xf32>
    %c0_22 = arith.constant 0 : index
    %c0_23 = arith.constant 0 : index
    %17 = vector.load %arg7[%c0_22, %c0_23] : memref<64x128xf32, #tpu.memory_space<vmem>>, vector<64x128xf32>
    tpu.vector_store %arg7[%c0_22, %c0_23], %16 {strides = array<i32>} : memref<64x128xf32, #tpu.memory_space<vmem>>, vector<64x128xf32>,
    %c0_24 = arith.constant 0 : index
    %c0_25 = arith.constant 0 : index
    %c2 = arith.constant 2 : index
    %c0_26 = arith.constant 0 : index
    %18 = vector.load %arg2[%c0_24, %c0_25, %c2, %c0_26] : memref<1x10x10x128xbf16, #tpu.memory_space<vmem>>, vector<1x8x8x128xbf16>
    %c0_27 = arith.constant 0 : index
    %c0_28 = arith.constant 0 : index
    %19 = vector.load %arg7[%c0_27, %c0_28] : memref<64x128xf32, #tpu.memory_space<vmem>>, vector<64x128xf32>
    %20 = vector.shape_cast %18 : vector<1x8x8x128xbf16> to vector<64x128xbf16>
    %c2_29 = arith.constant 2 : index
    %c0_30 = arith.constant 0 : index
    %c0_31 = arith.constant 0 : index
    %21 = vector.load %arg3[%c2_29, %c0_30, %c0_31] : memref<9x128x128xbf16, #tpu.memory_space<vmem>>, vector<1x128x128xbf16>
    %22 = vector.shape_cast %21 : vector<1x128x128xbf16> to vector<128x128xbf16>
    %cst_32 = arith.constant dense<0.000000e+00> : vector<64x128xf32>
    %23 = tpu.matmul %20, %22, %cst_32 {dimension_numbers = #tpu.dot_dimension_numbers<[1], [0], [0], [1], [0, 0, 1, 1], [], []>} : vector<64x128xbf16>, vector<128x128xbf16>, vector<64x128xf32> -> vector<64x128xf32>
    %24 = arith.addf %19, %23 : vector<64x128xf32>
    %c0_33 = arith.constant 0 : index
    %c0_34 = arith.constant 0 : index
    %25 = vector.load %arg7[%c0_33, %c0_34] : memref<64x128xf32, #tpu.memory_space<vmem>>, vector<64x128xf32>
    tpu.vector_store %arg7[%c0_33, %c0_34], %24 {strides = array<i32>} : memref<64x128xf32, #tpu.memory_space<vmem>>, vector<64x128xf32>,
    %c0_35 = arith.constant 0 : index
    %c1_36 = arith.constant 1 : index
    %c0_37 = arith.constant 0 : index
    %c0_38 = arith.constant 0 : index
    %26 = vector.load %arg2[%c0_35, %c1_36, %c0_37, %c0_38] : memref<1x10x10x128xbf16, #tpu.memory_space<vmem>>, vector<1x8x8x128xbf16>
    %c0_39 = arith.constant 0 : index
    %c0_40 = arith.constant 0 : index
    %27 = vector.load %arg7[%c0_39, %c0_40] : memref<64x128xf32, #tpu.memory_space<vmem>>, vector<64x128xf32>
    %28 = vector.shape_cast %26 : vector<1x8x8x128xbf16> to vector<64x128xbf16>
    %c3 = arith.constant 3 : index
    %c0_41 = arith.constant 0 : index
    %c0_42 = arith.constant 0 : index
    %29 = vector.load %arg3[%c3, %c0_41, %c0_42] : memref<9x128x128xbf16, #tpu.memory_space<vmem>>, vector<1x128x128xbf16>
    %30 = vector.shape_cast %29 : vector<1x128x128xbf16> to vector<128x128xbf16>
    %cst_43 = arith.constant dense<0.000000e+00> : vector<64x128xf32>
    %31 = tpu.matmul %28, %30, %cst_43 {dimension_numbers = #tpu.dot_dimension_numbers<[1], [0], [0], [1], [0, 0, 1, 1], [], []>} : vector<64x128xbf16>, vector<128x128xbf16>, vector<64x128xf32> -> vector<64x128xf32>
    %32 = arith.addf %27, %31 : vector<64x128xf32>
    %c0_44 = arith.constant 0 : index
    %c0_45 = arith.constant 0 : index
    %33 = vector.load %arg7[%c0_44, %c0_45] : memref<64x128xf32, #tpu.memory_space<vmem>>, vector<64x128xf32>
    tpu.vector_store %arg7[%c0_44, %c0_45], %32 {strides = array<i32>} : memref<64x128xf32, #tpu.memory_space<vmem>>, vector<64x128xf32>,
    %c0_46 = arith.constant 0 : index
    %c1_47 = arith.constant 1 : index
    %c1_48 = arith.constant 1 : index
    %c0_49 = arith.constant 0 : index
    %34 = vector.load %arg2[%c0_46, %c1_47, %c1_48, %c0_49] : memref<1x10x10x128xbf16, #tpu.memory_space<vmem>>, vector<1x8x8x128xbf16>
    %c0_50 = arith.constant 0 : index
    %c0_51 = arith.constant 0 : index
    %35 = vector.load %arg7[%c0_50, %c0_51] : memref<64x128xf32, #tpu.memory_space<vmem>>, vector<64x128xf32>
    %36 = vector.shape_cast %34 : vector<1x8x8x128xbf16> to vector<64x128xbf16>
    %c4 = arith.constant 4 : index
    %c0_52 = arith.constant 0 : index
    %c0_53 = arith.constant 0 : index
    %37 = vector.load %arg3[%c4, %c0_52, %c0_53] : memref<9x128x128xbf16, #tpu.memory_space<vmem>>, vector<1x128x128xbf16>
    %38 = vector.shape_cast %37 : vector<1x128x128xbf16> to vector<128x128xbf16>
    %cst_54 = arith.constant dense<0.000000e+00> : vector<64x128xf32>
    %39 = tpu.matmul %36, %38, %cst_54 {dimension_numbers = #tpu.dot_dimension_numbers<[1], [0], [0], [1], [0, 0, 1, 1], [], []>} : vector<64x128xbf16>, vector<128x128xbf16>, vector<64x128xf32> -> vector<64x128xf32>
    %40 = arith.addf %35, %39 : vector<64x128xf32>
    %c0_55 = arith.constant 0 : index
    %c0_56 = arith.constant 0 : index
    %41 = vector.load %arg7[%c0_55, %c0_56] : memref<64x128xf32, #tpu.memory_space<vmem>>, vector<64x128xf32>
    tpu.vector_store %arg7[%c0_55, %c0_56], %40 {strides = array<i32>} : memref<64x128xf32, #tpu.memory_space<vmem>>, vector<64x128xf32>,
    %c0_57 = arith.constant 0 : index
    %c1_58 = arith.constant 1 : index
    %c2_59 = arith.constant 2 : index
    %c0_60 = arith.constant 0 : index
    %42 = vector.load %arg2[%c0_57, %c1_58, %c2_59, %c0_60] : memref<1x10x10x128xbf16, #tpu.memory_space<vmem>>, vector<1x8x8x128xbf16>
    %c0_61 = arith.constant 0 : index
    %c0_62 = arith.constant 0 : index
    %43 = vector.load %arg7[%c0_61, %c0_62] : memref<64x128xf32, #tpu.memory_space<vmem>>, vector<64x128xf32>
    %44 = vector.shape_cast %42 : vector<1x8x8x128xbf16> to vector<64x128xbf16>
    %c5 = arith.constant 5 : index
    %c0_63 = arith.constant 0 : index
    %c0_64 = arith.constant 0 : index
    %45 = vector.load %arg3[%c5, %c0_63, %c0_64] : memref<9x128x128xbf16, #tpu.memory_space<vmem>>, vector<1x128x128xbf16>
    %46 = vector.shape_cast %45 : vector<1x128x128xbf16> to vector<128x128xbf16>
    %cst_65 = arith.constant dense<0.000000e+00> : vector<64x128xf32>
    %47 = tpu.matmul %44, %46, %cst_65 {dimension_numbers = #tpu.dot_dimension_numbers<[1], [0], [0], [1], [0, 0, 1, 1], [], []>} : vector<64x128xbf16>, vector<128x128xbf16>, vector<64x128xf32> -> vector<64x128xf32>
    %48 = arith.addf %43, %47 : vector<64x128xf32>
    %c0_66 = arith.constant 0 : index
    %c0_67 = arith.constant 0 : index
    %49 = vector.load %arg7[%c0_66, %c0_67] : memref<64x128xf32, #tpu.memory_space<vmem>>, vector<64x128xf32>
    tpu.vector_store %arg7[%c0_66, %c0_67], %48 {strides = array<i32>} : memref<64x128xf32, #tpu.memory_space<vmem>>, vector<64x128xf32>,
    %c0_68 = arith.constant 0 : index
    %c2_69 = arith.constant 2 : index
    %c0_70 = arith.constant 0 : index
    %c0_71 = arith.constant 0 : index
    %50 = vector.load %arg2[%c0_68, %c2_69, %c0_70, %c0_71] : memref<1x10x10x128xbf16, #tpu.memory_space<vmem>>, vector<1x8x8x128xbf16>
    %c0_72 = arith.constant 0 : index
    %c0_73 = arith.constant 0 : index
    %51 = vector.load %arg7[%c0_72, %c0_73] : memref<64x128xf32, #tpu.memory_space<vmem>>, vector<64x128xf32>
    %52 = vector.shape_cast %50 : vector<1x8x8x128xbf16> to vector<64x128xbf16>
    %c6 = arith.constant 6 : index
    %c0_74 = arith.constant 0 : index
    %c0_75 = arith.constant 0 : index
    %53 = vector.load %arg3[%c6, %c0_74, %c0_75] : memref<9x128x128xbf16, #tpu.memory_space<vmem>>, vector<1x128x128xbf16>
    %54 = vector.shape_cast %53 : vector<1x128x128xbf16> to vector<128x128xbf16>
    %cst_76 = arith.constant dense<0.000000e+00> : vector<64x128xf32>
    %55 = tpu.matmul %52, %54, %cst_76 {dimension_numbers = #tpu.dot_dimension_numbers<[1], [0], [0], [1], [0, 0, 1, 1], [], []>} : vector<64x128xbf16>, vector<128x128xbf16>, vector<64x128xf32> -> vector<64x128xf32>
    %56 = arith.addf %51, %55 : vector<64x128xf32>
    %c0_77 = arith.constant 0 : index
    %c0_78 = arith.constant 0 : index
    %57 = vector.load %arg7[%c0_77, %c0_78] : memref<64x128xf32, #tpu.memory_space<vmem>>, vector<64x128xf32>
    tpu.vector_store %arg7[%c0_77, %c0_78], %56 {strides = array<i32>} : memref<64x128xf32, #tpu.memory_space<vmem>>, vector<64x128xf32>,
    %c0_79 = arith.constant 0 : index
    %c2_80 = arith.constant 2 : index
    %c1_81 = arith.constant 1 : index
    %c0_82 = arith.constant 0 : index
    %58 = vector.load %arg2[%c0_79, %c2_80, %c1_81, %c0_82] : memref<1x10x10x128xbf16, #tpu.memory_space<vmem>>, vector<1x8x8x128xbf16>
    %c0_83 = arith.constant 0 : index
    %c0_84 = arith.constant 0 : index
    %59 = vector.load %arg7[%c0_83, %c0_84] : memref<64x128xf32, #tpu.memory_space<vmem>>, vector<64x128xf32>
    %60 = vector.shape_cast %58 : vector<1x8x8x128xbf16> to vector<64x128xbf16>
    %c7 = arith.constant 7 : index
    %c0_85 = arith.constant 0 : index
    %c0_86 = arith.constant 0 : index
    %61 = vector.load %arg3[%c7, %c0_85, %c0_86] : memref<9x128x128xbf16, #tpu.memory_space<vmem>>, vector<1x128x128xbf16>
    %62 = vector.shape_cast %61 : vector<1x128x128xbf16> to vector<128x128xbf16>
    %cst_87 = arith.constant dense<0.000000e+00> : vector<64x128xf32>
    %63 = tpu.matmul %60, %62, %cst_87 {dimension_numbers = #tpu.dot_dimension_numbers<[1], [0], [0], [1], [0, 0, 1, 1], [], []>} : vector<64x128xbf16>, vector<128x128xbf16>, vector<64x128xf32> -> vector<64x128xf32>
    %64 = arith.addf %59, %63 : vector<64x128xf32>
    %c0_88 = arith.constant 0 : index
    %c0_89 = arith.constant 0 : index
    %65 = vector.load %arg7[%c0_88, %c0_89] : memref<64x128xf32, #tpu.memory_space<vmem>>, vector<64x128xf32>
    tpu.vector_store %arg7[%c0_88, %c0_89], %64 {strides = array<i32>} : memref<64x128xf32, #tpu.memory_space<vmem>>, vector<64x128xf32>,
    %c0_90 = arith.constant 0 : index
    %c2_91 = arith.constant 2 : index
    %c2_92 = arith.constant 2 : index
    %c0_93 = arith.constant 0 : index
    %66 = vector.load %arg2[%c0_90, %c2_91, %c2_92, %c0_93] : memref<1x10x10x128xbf16, #tpu.memory_space<vmem>>, vector<1x8x8x128xbf16>
    %c0_94 = arith.constant 0 : index
    %c0_95 = arith.constant 0 : index
    %67 = vector.load %arg7[%c0_94, %c0_95] : memref<64x128xf32, #tpu.memory_space<vmem>>, vector<64x128xf32>
    %68 = vector.shape_cast %66 : vector<1x8x8x128xbf16> to vector<64x128xbf16>
    %c8 = arith.constant 8 : index
    %c0_96 = arith.constant 0 : index
    %c0_97 = arith.constant 0 : index
    %69 = vector.load %arg3[%c8, %c0_96, %c0_97] : memref<9x128x128xbf16, #tpu.memory_space<vmem>>, vector<1x128x128xbf16>
    %70 = vector.shape_cast %69 : vector<1x128x128xbf16> to vector<128x128xbf16>
    %cst_98 = arith.constant dense<0.000000e+00> : vector<64x128xf32>
    %71 = tpu.matmul %68, %70, %cst_98 {dimension_numbers = #tpu.dot_dimension_numbers<[1], [0], [0], [1], [0, 0, 1, 1], [], []>} : vector<64x128xbf16>, vector<128x128xbf16>, vector<64x128xf32> -> vector<64x128xf32>
    %72 = arith.addf %67, %71 : vector<64x128xf32>
    %c0_99 = arith.constant 0 : index
    %c0_100 = arith.constant 0 : index
    %73 = vector.load %arg7[%c0_99, %c0_100] : memref<64x128xf32, #tpu.memory_space<vmem>>, vector<64x128xf32>
    tpu.vector_store %arg7[%c0_99, %c0_100], %72 {strides = array<i32>} : memref<64x128xf32, #tpu.memory_space<vmem>>, vector<64x128xf32>,
    %c0_101 = arith.constant 0 : index
    %c0_102 = arith.constant 0 : index
    %74 = vector.load %arg7[%c0_101, %c0_102] : memref<64x128xf32, #tpu.memory_space<vmem>>, vector<64x128xf32>
    %75 = vector.shape_cast %74 : vector<64x128xf32> to vector<1x64x128xf32>
    %76 = arith.truncf %75 : vector<1x64x128xf32> to vector<1x64x128xbf16>
    %c0_103 = arith.constant 0 : index
    %c0_104 = arith.constant 0 : index
    %c0_105 = arith.constant 0 : index
    %77 = vector.load %arg4[%c0_103, %c0_104, %c0_105] : memref<1x64x128xbf16, #tpu.memory_space<vmem>>, vector<1x64x128xbf16>
    tpu.vector_store %arg4[%c0_103, %c0_104, %c0_105], %76 {strides = array<i32>} : memref<1x64x128xbf16, #tpu.memory_space<vmem>>, vector<1x64x128xbf16>,
    %cst_106 = arith.constant dense<0.000000e+00> : vector<1x128xf32>
    %78 = vector.multi_reduction <add>, %75, %cst_106 [1] : vector<1x64x128xf32> to vector<1x128xf32>
    %79 = vector.shape_cast %78 : vector<1x128xf32> to vector<1x1x128xf32>
    %c0_107 = arith.constant 0 : index
    %c0_108 = arith.constant 0 : index
    %c0_109 = arith.constant 0 : index
    %80 = vector.load %arg5[%c0_107, %c0_108, %c0_109] : memref<1x1x128xf32, #tpu.memory_space<vmem>>, vector<1x1x128xf32>
    tpu.vector_store %arg5[%c0_107, %c0_108, %c0_109], %79 {strides = array<i32>} : memref<1x1x128xf32, #tpu.memory_space<vmem>>, vector<1x1x128xf32>,
    %81 = arith.mulf %75, %75 : vector<1x64x128xf32>
    %cst_110 = arith.constant dense<0.000000e+00> : vector<1x128xf32>
    %82 = vector.multi_reduction <add>, %81, %cst_110 [1] : vector<1x64x128xf32> to vector<1x128xf32>
    %83 = vector.shape_cast %82 : vector<1x128xf32> to vector<1x1x128xf32>
    %c0_111 = arith.constant 0 : index
    %c0_112 = arith.constant 0 : index
    %c0_113 = arith.constant 0 : index
    %84 = vector.load %arg6[%c0_111, %c0_112, %c0_113] : memref<1x1x128xf32, #tpu.memory_space<vmem>>, vector<1x1x128xf32>
    tpu.vector_store %arg6[%c0_111, %c0_112, %c0_113], %83 {strides = array<i32>} : memref<1x1x128xf32, #tpu.memory_space<vmem>>, vector<1x1x128xf32>,
    return
  }
  func.func @transform_0(%arg0: i32, %arg1: i32) -> (i32, i32, i32, i32) {
    %c0_i32 = arith.constant 0 : i32
    %c0_i32_0 = arith.constant 0 : i32
    %c0_i32_1 = arith.constant 0 : i32
    %c0_i32_2 = arith.constant 0 : i32
    return %arg1, %c0_i32, %c0_i32_0, %c0_i32_1 : i32, i32, i32, i32
  }
  func.func @transform_1(%arg0: i32, %arg1: i32) -> (i32, i32, i32) {
    %c0_i32 = arith.constant 0 : i32
    %c0_i32_0 = arith.constant 0 : i32
    %c0_i32_1 = arith.constant 0 : i32
    return %c0_i32, %c0_i32_0, %arg0 : i32, i32, i32
  }
  func.func @transform_2(%arg0: i32, %arg1: i32) -> (i32, i32, i32) {
    %c0_i32 = arith.constant 0 : i32
    %c0_i32_0 = arith.constant 0 : i32
    return %arg1, %c0_i32, %arg0 : i32, i32, i32
  }
  func.func @transform_3(%arg0: i32, %arg1: i32) -> (i32, i32, i32) {
    %c0_i32 = arith.constant 0 : i32
    %c0_i32_0 = arith.constant 0 : i32
    return %arg1, %c0_i32, %arg0 : i32, i32, i32
  }
  func.func @transform_4(%arg0: i32, %arg1: i32) -> (i32, i32, i32) {
    %c0_i32 = arith.constant 0 : i32
    %c0_i32_0 = arith.constant 0 : i32
    return %arg1, %c0_i32, %arg0 : i32, i32, i32
  }
}

module attributes {stable_mosaic.version = 11 : i64} {
  func.func @_tail_kernel(%arg0: i32, %arg1: i32, %arg2: i32, %arg3: memref<1x64x128xbf16, #tpu.memory_space<vmem>>, %arg4: memref<1x1x128xf32, #tpu.memory_space<vmem>>, %arg5: memref<1x1x128xf32, #tpu.memory_space<vmem>>, %arg6: memref<1x1x128xf32, #tpu.memory_space<vmem>>, %arg7: memref<1x64x128xbf16, #tpu.memory_space<vmem>>, %arg8: memref<1x1x128xf32, #tpu.memory_space<vmem>>, %arg9: memref<1x1x128xf32, #tpu.memory_space<vmem>>, %arg10: memref<1x64x128xbf16, #tpu.memory_space<vmem>>) attributes {dimension_semantics = [#tpu.dimension_semantics<parallel>, #tpu.dimension_semantics<parallel>, #tpu.dimension_semantics<parallel>], iteration_bounds = array<i64: 2, 1, 1>, scalar_prefetch = 0 : i64, scratch_operands = 0 : i64, tpu.core_type = #tpu.core_type<tc>, window_params = [{transform_indices = @transform_0, window_bounds = array<i64: 1, 64, 128>}, {transform_indices = @transform_1, window_bounds = array<i64: 1, 1, 128>}, {transform_indices = @transform_2, window_bounds = array<i64: 1, 1, 128>}, {transform_indices = @transform_3, window_bounds = array<i64: 1, 1, 128>}, {transform_indices = @transform_4, window_bounds = array<i64: 1, 64, 128>}, {transform_indices = @transform_5, window_bounds = array<i64: 1, 1, 128>}, {transform_indices = @transform_6, window_bounds = array<i64: 1, 1, 128>}, {transform_indices = @transform_7, window_bounds = array<i64: 1, 64, 128>}]} {
    %c0 = arith.constant 0 : index
    %c0_0 = arith.constant 0 : index
    %c0_1 = arith.constant 0 : index
    %0 = vector.load %arg3[%c0, %c0_0, %c0_1] : memref<1x64x128xbf16, #tpu.memory_space<vmem>>, vector<1x64x128xbf16>
    %1 = arith.extf %0 : vector<1x64x128xbf16> to vector<1x64x128xf32>
    %c0_2 = arith.constant 0 : index
    %c0_3 = arith.constant 0 : index
    %c0_4 = arith.constant 0 : index
    %2 = vector.load %arg4[%c0_2, %c0_3, %c0_4] : memref<1x1x128xf32, #tpu.memory_space<vmem>>, vector<1x1x128xf32>
    %3 = vector.broadcast %2 : vector<1x1x128xf32> to vector<1x64x128xf32>
    %4 = arith.mulf %1, %3 : vector<1x64x128xf32>
    %c0_5 = arith.constant 0 : index
    %c0_6 = arith.constant 0 : index
    %c0_7 = arith.constant 0 : index
    %5 = vector.load %arg5[%c0_5, %c0_6, %c0_7] : memref<1x1x128xf32, #tpu.memory_space<vmem>>, vector<1x1x128xf32>
    %6 = vector.broadcast %5 : vector<1x1x128xf32> to vector<1x64x128xf32>
    %7 = arith.addf %4, %6 : vector<1x64x128xf32>
    %c0_8 = arith.constant 0 : index
    %c0_9 = arith.constant 0 : index
    %c0_10 = arith.constant 0 : index
    %8 = vector.load %arg7[%c0_8, %c0_9, %c0_10] : memref<1x64x128xbf16, #tpu.memory_space<vmem>>, vector<1x64x128xbf16>
    %9 = arith.extf %8 : vector<1x64x128xbf16> to vector<1x64x128xf32>
    %c0_11 = arith.constant 0 : index
    %c0_12 = arith.constant 0 : index
    %c0_13 = arith.constant 0 : index
    %10 = vector.load %arg8[%c0_11, %c0_12, %c0_13] : memref<1x1x128xf32, #tpu.memory_space<vmem>>, vector<1x1x128xf32>
    %11 = vector.broadcast %10 : vector<1x1x128xf32> to vector<1x64x128xf32>
    %12 = arith.mulf %9, %11 : vector<1x64x128xf32>
    %c0_14 = arith.constant 0 : index
    %c0_15 = arith.constant 0 : index
    %c0_16 = arith.constant 0 : index
    %13 = vector.load %arg9[%c0_14, %c0_15, %c0_16] : memref<1x1x128xf32, #tpu.memory_space<vmem>>, vector<1x1x128xf32>
    %14 = vector.broadcast %13 : vector<1x1x128xf32> to vector<1x64x128xf32>
    %15 = arith.addf %12, %14 : vector<1x64x128xf32>
    %c0_17 = arith.constant 0 : index
    %c0_18 = arith.constant 0 : index
    %c0_19 = arith.constant 0 : index
    %16 = vector.load %arg6[%c0_17, %c0_18, %c0_19] : memref<1x1x128xf32, #tpu.memory_space<vmem>>, vector<1x1x128xf32>
    %17 = vector.broadcast %16 : vector<1x1x128xf32> to vector<1x64x128xf32>
    %18 = arith.mulf %7, %17 : vector<1x64x128xf32>
    %19 = arith.addf %18, %15 : vector<1x64x128xf32>
    %cst = arith.constant 0.000000e+00 : f32
    %20 = vector.broadcast %cst : f32 to vector<1x64x128xf32>
    %21 = arith.maximumf %19, %20 : vector<1x64x128xf32>
    %22 = arith.truncf %21 : vector<1x64x128xf32> to vector<1x64x128xbf16>
    %c0_20 = arith.constant 0 : index
    %c0_21 = arith.constant 0 : index
    %c0_22 = arith.constant 0 : index
    %23 = vector.load %arg10[%c0_20, %c0_21, %c0_22] : memref<1x64x128xbf16, #tpu.memory_space<vmem>>, vector<1x64x128xbf16>
    tpu.vector_store %arg10[%c0_20, %c0_21, %c0_22], %22 {strides = array<i32>} : memref<1x64x128xbf16, #tpu.memory_space<vmem>>, vector<1x64x128xbf16>,
    return
  }
  func.func @transform_0(%arg0: i32, %arg1: i32, %arg2: i32) -> (i32, i32, i32) {
    %c0_i32 = arith.constant 0 : i32
    return %arg0, %arg1, %arg2 : i32, i32, i32
  }
  func.func @transform_1(%arg0: i32, %arg1: i32, %arg2: i32) -> (i32, i32, i32) {
    %c0_i32 = arith.constant 0 : i32
    %c0_i32_0 = arith.constant 0 : i32
    %c0_i32_1 = arith.constant 0 : i32
    return %c0_i32, %c0_i32_0, %arg2 : i32, i32, i32
  }
  func.func @transform_2(%arg0: i32, %arg1: i32, %arg2: i32) -> (i32, i32, i32) {
    %c0_i32 = arith.constant 0 : i32
    %c0_i32_0 = arith.constant 0 : i32
    %c0_i32_1 = arith.constant 0 : i32
    return %c0_i32, %c0_i32_0, %arg2 : i32, i32, i32
  }
  func.func @transform_3(%arg0: i32, %arg1: i32, %arg2: i32) -> (i32, i32, i32) {
    %c0_i32 = arith.constant 0 : i32
    %c0_i32_0 = arith.constant 0 : i32
    return %arg0, %c0_i32, %arg2 : i32, i32, i32
  }
  func.func @transform_4(%arg0: i32, %arg1: i32, %arg2: i32) -> (i32, i32, i32) {
    %c0_i32 = arith.constant 0 : i32
    return %arg0, %arg1, %arg2 : i32, i32, i32
  }
  func.func @transform_5(%arg0: i32, %arg1: i32, %arg2: i32) -> (i32, i32, i32) {
    %c0_i32 = arith.constant 0 : i32
    %c0_i32_0 = arith.constant 0 : i32
    %c0_i32_1 = arith.constant 0 : i32
    return %c0_i32, %c0_i32_0, %arg2 : i32, i32, i32
  }
  func.func @transform_6(%arg0: i32, %arg1: i32, %arg2: i32) -> (i32, i32, i32) {
    %c0_i32 = arith.constant 0 : i32
    %c0_i32_0 = arith.constant 0 : i32
    %c0_i32_1 = arith.constant 0 : i32
    return %c0_i32, %c0_i32_0, %arg2 : i32, i32, i32
  }
  func.func @transform_7(%arg0: i32, %arg1: i32, %arg2: i32) -> (i32, i32, i32) {
    %c0_i32 = arith.constant 0 : i32
    return %arg0, %arg1, %arg2 : i32, i32, i32
  }
}

module attributes {stable_mosaic.version = 11 : i64} {
  func.func @_se_kernel(%arg0: memref<2x128xbf16, #tpu.memory_space<vmem>>, %arg1: memref<128x128xbf16, #tpu.memory_space<vmem>>, %arg2: memref<128x128xbf16, #tpu.memory_space<vmem>>, %arg3: memref<2x128xf32, #tpu.memory_space<vmem>>) attributes {dimension_semantics = [], scalar_prefetch = 0 : i64, scratch_operands = 0 : i64, tpu.core_type = #tpu.core_type<tc>} {
    %c0 = arith.constant 0 : index
    %c0_0 = arith.constant 0 : index
    %0 = vector.load %arg0[%c0, %c0_0] : memref<2x128xbf16, #tpu.memory_space<vmem>>, vector<2x128xbf16>
    %c0_1 = arith.constant 0 : index
    %c0_2 = arith.constant 0 : index
    %1 = vector.load %arg1[%c0_1, %c0_2] : memref<128x128xbf16, #tpu.memory_space<vmem>>, vector<128x128xbf16>
    %cst = arith.constant dense<0.000000e+00> : vector<2x128xf32>
    %2 = tpu.matmul %0, %1, %cst {dimension_numbers = #tpu.dot_dimension_numbers<[1], [0], [0], [1], [0, 0, 1, 1], [], []>} : vector<2x128xbf16>, vector<128x128xbf16>, vector<2x128xf32> -> vector<2x128xf32>
    %cst_3 = arith.constant 0.000000e+00 : f32
    %3 = vector.broadcast %cst_3 : f32 to vector<2x128xf32>
    %4 = arith.maximumf %2, %3 : vector<2x128xf32>
    %5 = arith.truncf %4 : vector<2x128xf32> to vector<2x128xbf16>
    %c0_4 = arith.constant 0 : index
    %c0_5 = arith.constant 0 : index
    %6 = vector.load %arg2[%c0_4, %c0_5] : memref<128x128xbf16, #tpu.memory_space<vmem>>, vector<128x128xbf16>
    %cst_6 = arith.constant dense<0.000000e+00> : vector<2x128xf32>
    %7 = tpu.matmul %5, %6, %cst_6 {dimension_numbers = #tpu.dot_dimension_numbers<[1], [0], [0], [1], [0, 0, 1, 1], [], []>} : vector<2x128xbf16>, vector<128x128xbf16>, vector<2x128xf32> -> vector<2x128xf32>
    %8 = arith.negf %7 : vector<2x128xf32>
    %9 = math.exp %8 : vector<2x128xf32>
    %cst_7 = arith.constant 1.000000e+00 : f32
    %10 = vector.broadcast %cst_7 : f32 to vector<2x128xf32>
    %11 = arith.addf %10, %9 : vector<2x128xf32>
    %12 = arith.divf %10, %11 : vector<2x128xf32>
    %c0_8 = arith.constant 0 : index
    %c0_9 = arith.constant 0 : index
    %13 = vector.load %arg3[%c0_8, %c0_9] : memref<2x128xf32, #tpu.memory_space<vmem>>, vector<2x128xf32>
    tpu.vector_store %arg3[%c0_8, %c0_9], %12 {strides = array<i32>} : memref<2x128xf32, #tpu.memory_space<vmem>>, vector<2x128xf32>,
    return
  }
}

</mosaic_0001>

<bundles_post_ra>
// kernel: model_forward.15
= control target key start
LH: loop header
LB: loop body
LE: loop exit
PB: predicated region body
PF: predicated region fallthrough
CT: control target
= control target key end

     0   :  { %s911_s15 = smov 0   ;;  %s913_s16 = smov 0   ;;  %s989_s0 = inlined_call_operand.vmem [shape: bf16[2,8,8,128], index: 0, kind: input, shape index: {}]   ;;  %s990_s1 = inlined_call_operand.vmem [shape: bf16[1,128,128], index: 1, kind: input, shape index: {}]   ;;  %s991_s2 = inlined_call_operand.vmem [shape: bf16[2,64,128], index: 2, kind: output, shape index: {0}]   ;;  %s992_s3 = inlined_call_operand.vmem [shape: f32[2,1,128], index: 3, kind: output, shape index: {1}]   ;;  %s993_s4 = inlined_call_operand.vmem [shape: f32[2,1,128], index: 4, kind: output, shape index: {2}]  }
   0x1   :  { %s915_s17 = smov 0  }
   0x2 LB: > { %s24_s18 = sadd.s32 1, %s880_s16  ;;  %p714_p0 = scmp.ge.s32.totalorder %s884_s17, 1  ;;  %s884_s17 = sphi %s915_s17, %s15_s17   ;;  %s880_s16 = sphi %s913_s16, %s995_s16   ;;  %s876_s15 = sphi %s911_s15, %s994_s15  }
   0x3   : > { %p25_p1 = scmp.ge.s32.totalorder %s24_s18, 2  ;;  %p194_p2 = scmp.lt.s32.totalorder %s884_s17, 3 }
   0x5   : > { %s997_s18 = smov (%p25_p1, %s24_s18), 0  ;;  %p195_p3 = pnand %p714_p0, %p194_p2 }
   0x6   : > { %v850_v0 = vld [vmem:[%s990_s1] sm:$0xff] (!%p195_p3)   ;;  %p239_p4 = scmp.lt.s32.totalorder (!%p195_p3), %s876_s15, 1  ;;  %v851_v1 = vld [vmem:[%s990_s1 + $0x8] sm:$0xff] (!%p195_p3)   ;;  %v852_v2 = vld [vmem:[%s990_s1 + $0x10] sm:$0xff] (!%p195_p3)  }
   0x7   : > { %198 = sbr.rel (%p195_p3) target bundleno = 283 (0x11b), region = 28  ;;  %786 = vmatprep.subr.bf16.mxu0 (!%p195_p3), %v850_v0  ;;  %810 = vmatprep.subr.bf16.mxu1 (!%p195_p3), %v850_v0  ;;  %v853_v3 = vld [vmem:[%s990_s1 + $0x18] sm:$0xff] (!%p195_p3)   ;;  %v854_v6 = vld [vmem:[%s990_s1 + $0x20] sm:$0xff] (!%p195_p3)   ;;  %v855_v7 = vld [vmem:[%s990_s1 + $0x28] sm:$0xff] (!%p195_p3)  }
   0x8   : > { %787 = vmatpush3.bf16.msra.mxu0 (!%p195_p3), %v850_v0  ;;  %818 = vmatpush3.bf16.msra.mxu1 (!%p195_p3), %v850_v0  ;;  %v856_v8 = vld [vmem:[%s990_s1 + $0x30] sm:$0xff] (!%p195_p3)   ;;  %v857_v9 = vld [vmem:[%s990_s1 + $0x38] sm:$0xff] (!%p195_p3)  }
   0x9   : > { %788 = vmatprep.subr.bf16.mxu0 (!%p195_p3), %v851_v1  ;;  %811 = vmatprep.subr.bf16.mxu1 (!%p195_p3), %v851_v1 }
   0xc   : > { %789 = vmatpush3.bf16.msra.mxu0 (!%p195_p3), %v851_v1  ;;  %819 = vmatpush3.bf16.msra.mxu1 (!%p195_p3), %v851_v1 }
   0xd   : > { %790 = vmatprep.subr.bf16.mxu0 (!%p195_p3), %v852_v2  ;;  %812 = vmatprep.subr.bf16.mxu1 (!%p195_p3), %v852_v2 }
   0xe   : > { %s999_s15 = smov (!%p239_p4, %s876_s15), 1 }
   0xf   : > { %s741_s25 = sshll.u32 %s999_s15, 5  ;;  %s261_s22 = scalar_lea.vmem %s992_s3, %s999_s15 }
  0x10   : > { %s946_s28 = scalar_lea.vmem %s989_s0, %s741_s25  ;;  %791 = vmatpush3.bf16.msra.mxu0 %v852_v2  ;;  %820 = vmatpush3.bf16.msra.mxu1 %v852_v2  ;;  %s255_s19 = scalar_lea.vmem %s991_s2, %s741_s25 }
  0x11   : > { %v858_v4 = vld [vmem:[%s946_s28] sm:$0xff]   ;;  %v860_v5 = vld [vmem:[%s946_s28 + $0x10] sm:$0xff]   ;;  %792 = vmatprep.subr.bf16.mxu0 %v853_v3  ;;  %813 = vmatprep.subr.bf16.mxu1 %v853_v3  ;;  %v859_v10 = vld [vmem:[%s946_s28 + $0x8] sm:$0xff]   ;;  %s267_s25 = scalar_lea.vmem %s993_s4, %s999_s15 }
  0x12   : > { %802 = vmatprep.mubr.bf16.mxu0 %v858_v4  ;;  %806 = vmatprep.mubr.bf16.mxu1 %v860_v5  ;;  %v861_v11 = vld [vmem:[%s946_s28 + $0x18] sm:$0xff]  }
  0x14   : > { %793 = vmatpush3.bf16.msra.mxu0 %v853_v3  ;;  %821 = vmatpush3.bf16.msra.mxu1 %v853_v3 }
  0x15   : > { %794 = vmatprep.subr.bf16.mxu0 %v854_v6  ;;  %814 = vmatprep.subr.bf16.mxu1 %v854_v6 }
  0x18   : > { %795 = vmatpush3.bf16.msra.mxu0 %v854_v6  ;;  %822 = vmatpush3.bf16.msra.mxu1 %v854_v6 }
  0x19   : > { %796 = vmatprep.subr.bf16.mxu0 %v855_v7  ;;  %815 = vmatprep.subr.bf16.mxu1 %v855_v7 }
  0x1c   : > { %797 = vmatpush3.bf16.msra.mxu0 %v855_v7  ;;  %823 = vmatpush3.bf16.msra.mxu1 %v855_v7 }
  0x1d   : > { %798 = vmatprep.subr.bf16.mxu0 %v856_v8  ;;  %816 = vmatprep.subr.bf16.mxu1 %v856_v8 }
  0x20   : > { %799 = vmatpush3.bf16.msra.mxu0 %v856_v8  ;;  %824 = vmatpush3.bf16.msra.mxu1 %v856_v8 }
  0x21   : > { %800 = vmatprep.subr.bf16.mxu0 %v857_v9  ;;  %817 = vmatprep.subr.bf16.mxu1 %v857_v9 }
  0x24   : > { %801 = vmatpush3.bf16.msra.mxu0 %v857_v9  ;;  %825 = vmatpush3.bf16.msra.mxu1 %v857_v9 }
  0x27   : > { %803 = vmatmul.mubr.bf16.vlgmr.msra.gmra.mrb[0].mxu0 %v859_v10  ;;  %807 = vmatmul.mubr.bf16.vlgmr.msra.gmra.mrb[0].mxu1 %v861_v11 }
  0xfa   : > { %v804_v12 = vpop.f32.mrb[0].mxu0  ;;  %v808_v13 = vpop.f32.mrb[0].mxu1 }
  0xfb   : > { %v415_v14 = vpop.f32.mrb[1].mxu0  ;;  %v431_v15 = vpop.f32.mrb[1].mxu1  ;;  %v526_v27 = vmul.f32 %v804_v12, %v804_v12  ;;  %v530_v39 = vmul.f32 %v808_v13, %v808_v13 }
  0xfc   : > { %v805_v16 = vpop.f32.mrb[2].mxu0  ;;  %v809_v17 = vpop.f32.mrb[2].mxu1  ;;  %v524_v18 = vmul.f32 %v415_v14, %v415_v14  ;;  %v528_v33 = vmul.f32 %v431_v15, %v431_v15 }
  0xfd   : > { %v759_v19 = vpack.c.bf16 %v805_v16, %v804_v12  ;;  %v418_v20 = vpop.f32.mrb[3].mxu0  ;;  %v769_v21 = vpack.c.bf16 %v809_v17, %v808_v13  ;;  %v434_v22 = vpop.f32.mrb[3].mxu1  ;;  %v527_v30 = vmul.f32 %v805_v16, %v805_v16  ;;  %v531_v42 = vmul.f32 %v809_v17, %v809_v17 }
  0xfe   : > { %v754_v23 = vpack.c.bf16 %v418_v20, %v415_v14  ;;  %v510_v24 = vadd.f32 %v418_v20, %v415_v14  ;;  %v525_v25 = vmul.f32 %v418_v20, %v418_v20  ;;  %v764_v26 = vpack.c.bf16 %v434_v22, %v431_v15 }
  0xff   : > { %771 = vst [vmem:[%s255_s19 + $0x8] sm:$0xff] %v759_v19   ;;  %773 = vst [vmem:[%s255_s19 + $0x18] sm:$0xff] %v769_v21   ;;  %v529_v38 = vmul.f32 %v434_v22, %v434_v22 }
 0x100   : > { %755 = vst [vmem:[%s255_s19] sm:$0xff] %v754_v23   ;;  %v511_v28 = vadd.f32 %v804_v12, %v510_v24  ;;  %v532_v29 = vadd.f32 %v525_v25, %v524_v18  ;;  %772 = vst [vmem:[%s255_s19 + $0x10] sm:$0xff] %v764_v26  }
 0x102   : > { %v533_v31 = vadd.f32 %v532_v29, %v526_v27  ;;  %v512_v32 = vadd.f32 %v805_v16, %v511_v28 }
 0x104   : > { %v513_v34 = vadd.f32 %v512_v32, %v431_v15  ;;  %v534_v35 = vadd.f32 %v533_v31, %v527_v30 }
 0x106   : > { %v535_v36 = vadd.f32 %v534_v35, %v528_v33  ;;  %v514_v37 = vadd.f32 %v513_v34, %v434_v22 }
 0x108   : > { %v515_v40 = vadd.f32 %v808_v13, %v514_v37  ;;  %v536_v41 = vadd.f32 %v535_v36, %v529_v38 }
 0x10a   : > { %v516_v43 = vadd.f32 %v809_v17, %v515_v40  ;;  %v537_v44 = vadd.f32 %v536_v41, %v530_v39 }
 0x10c   : > { %v517_v45 = vrot.slane %v516_v43, 4  ;;  %v538_v46 = vadd.f32 %v537_v44, %v531_v42 }
 0x10e   : > { %v518_v47 = vadd.f32 %v517_v45, %v516_v43  ;;  %v539_v48 = vrot.slane %v538_v46, 4 }
 0x110   : > { %v519_v49 = vrot.slane %v518_v47, 2  ;;  %v540_v50 = vadd.f32 %v539_v48, %v538_v46 }
 0x112   : > { %v520_v51 = vadd.f32 %v519_v49, %v518_v47  ;;  %v541_v52 = vrot.slane %v540_v50, 2 }
 0x114   : > { %v521_v53 = vrot.slane %v520_v51, 1  ;;  %v542_v54 = vadd.f32 %v541_v52, %v540_v50 }
 0x116   : > { %v522_v55 = vadd.f32 %v521_v53, %v520_v51  ;;  %v543_v56 = vrot.slane %v542_v54, 1 }
 0x118   : > { %523 = vst [vmem:[%s261_s22] sm:$0x1] %v522_v55  ;;  %v544_v57 = vadd.f32 %v543_v56, %v542_v54 }
 0x11a   : > { %545 = vst [vmem:[%s267_s25] sm:$0x1] %v544_v57 }
 0x11b PF: > { %s15_s17 = sadd.s32 1, %s884_s17   ;;  %s994_s15 = smov %s880_s16 }
 0x11c   : > { %p12_p5 = scmp.ge.s32.totalorder %s15_s17, 4   ;;  %s995_s16 = smov %s997_s18 }
 0x11e   :  { %14 = sbr.rel (!%p12_p5) target bundleno = 2 (0x2), region = 85 }

// kernel: model_forward.12
= control target key start
LH: loop header
LB: loop body
LE: loop exit
PB: predicated region body
PF: predicated region fallthrough
CT: control target
= control target key end

     0   :  { %s570_s12 = smov 0   ;;  %s572_s13 = smov 0   ;;  %s616_s0 = inlined_call_operand.vmem [shape: bf16[128,128], index: 0, kind: input, shape index: {}]   ;;  %s617_s1 = inlined_call_operand.vmem [shape: f32[1,128], index: 1, kind: input, shape index: {}]   ;;  %s618_s2 = inlined_call_operand.vmem [shape: f32[1,128], index: 2, kind: input, shape index: {}]   ;;  %s619_s3 = inlined_call_operand.vmem [shape: bf16[128,128], index: 3, kind: output, shape index: {}]  }
   0x1   :  { %s574_s14 = smov 0  }
   0x2 LB: > { %s25_s15 = sadd.s32 1, %s544_s13  ;;  %p435_p0 = scmp.ge.s32.totalorder %s548_s14, 1  ;;  %s548_s14 = sphi %s574_s14, %s13_s14   ;;  %s544_s13 = sphi %s572_s13, %s621_s13   ;;  %s540_s12 = sphi %s570_s12, %s620_s12  }
   0x3   : > { %p27_p1 = scmp.ge.s32.totalorder %s25_s15, 2  ;;  %p173_p2 = scmp.lt.s32.totalorder %s548_s14, 3 }
   0x5   : > { %s623_s15 = smov (%p27_p1, %s25_s15), 0  ;;  %p174_p3 = pnand %p435_p0, %p173_p2 }
   0x6   : > { %s436_s16 = sshll.u32 (!%p174_p3), %s540_s12, 3  ;;  %v440_v0 = vld [vmem:[%s617_s1] ss:$0 sm:$0xff] (!%p174_p3) }
   0x7   : > { %177 = sbr.rel (%p174_p3) target bundleno = 30 (0x1e), region = 32  ;;  %p210_p4 = scmp.lt.s32.totalorder (!%p174_p3), %s436_s16, 15  ;;  %v441_v9 = vld [vmem:[%s618_s2] ss:$0 sm:$0xff] (!%p174_p3) }
   0xe   : > { %s625_s16 = smov (!%p210_p4, %s436_s16), 15 }
   0xf   : > { %s437_s17 = sshll.u32 %s625_s16, 2 }
  0x10   : > { %s216_s20 = scalar_lea.vmem %s616_s0, %s437_s17  ;;  %s231_s27 = scalar_lea.vmem %s619_s3, %s437_s17 }
  0x11   : > { %v461_v1 = vld [vmem:[%s216_s20] sm:$0xff]   ;;  %v496_v2 = vld [vmem:[%s216_s20 + $0x8] sm:$0xff]   ;;  %v497_v3 = vld [vmem:[%s216_s20 + $0x10] sm:$0xff]  }
  0x12   : > { %v462_v4 = vunpack.c.l.bf16 %v461_v1  ;;  %v463_v5 = vunpack.c.h.bf16 %v461_v1  ;;  %v466_v6 = vunpack.c.l.bf16 %v496_v2  ;;  %v467_v7 = vunpack.c.h.bf16 %v496_v2  ;;  %v498_v8 = vld [vmem:[%s216_s20 + $0x18] sm:$0xff]  }
  0x13   : > { %v470_v10 = vunpack.c.l.bf16 %v497_v3  ;;  %v471_v11 = vunpack.c.h.bf16 %v497_v3  ;;  %v474_v12 = vunpack.c.l.bf16 %v498_v8  ;;  %v475_v13 = vunpack.c.h.bf16 %v498_v8 }
  0x14   : > { %v256_v14 = vmul.f32 %v462_v4, %v440_v0  ;;  %v257_v15 = vmul.f32 %v463_v5, %v440_v0  ;;  %v258_v16 = vmul.f32 %v466_v6, %v440_v0  ;;  %v259_v17 = vmul.f32 %v467_v7, %v440_v0 }
  0x15   : > { %v260_v18 = vmul.f32 %v470_v10, %v440_v0  ;;  %v261_v19 = vmul.f32 %v471_v11, %v440_v0  ;;  %v262_v20 = vmul.f32 %v474_v12, %v440_v0  ;;  %v263_v21 = vmul.f32 %v475_v13, %v440_v0 }
  0x16   : > { %v271_v22 = vadd.f32 %v441_v9, %v256_v14  ;;  %v272_v23 = vadd.f32 %v441_v9, %v257_v15  ;;  %v273_v24 = vadd.f32 %v441_v9, %v258_v16  ;;  %v274_v25 = vadd.f32 %v441_v9, %v259_v17 }
  0x17   : > { %v275_v26 = vadd.f32 %v441_v9, %v260_v18  ;;  %v276_v27 = vadd.f32 %v441_v9, %v261_v19  ;;  %v277_v28 = vadd.f32 %v441_v9, %v262_v20  ;;  %v278_v29 = vadd.f32 %v441_v9, %v263_v21 }
  0x18   : > { %v279_v30 = vmax.f32 %v271_v22, 0.0  ;;  %v280_v31 = vmax.f32 %v272_v23, 0.0  ;;  %v281_v32 = vmax.f32 %v273_v24, 0.0  ;;  %v282_v33 = vmax.f32 %v274_v25, 0.0 }
  0x19   : > { %v283_v34 = vmax.f32 %v275_v26, 0.0  ;;  %v284_v35 = vmax.f32 %v276_v27, 0.0  ;;  %v285_v36 = vmax.f32 %v277_v28, 0.0  ;;  %v286_v37 = vmax.f32 %v278_v29, 0.0 }
  0x1a   : > { %v479_v38 = vpack.c.bf16 %v280_v31, %v279_v30  ;;  %v484_v39 = vpack.c.bf16 %v282_v33, %v281_v32 }
  0x1b   : > { %v489_v40 = vpack.c.bf16 %v284_v35, %v283_v34  ;;  %v494_v41 = vpack.c.bf16 %v286_v37, %v285_v36 }
  0x1c   : > { %480 = vst [vmem:[%s231_s27] sm:$0xff] %v479_v38   ;;  %499 = vst [vmem:[%s231_s27 + $0x8] sm:$0xff] %v484_v39  }
  0x1d   : > { %500 = vst [vmem:[%s231_s27 + $0x10] sm:$0xff] %v489_v40   ;;  %501 = vst [vmem:[%s231_s27 + $0x18] sm:$0xff] %v494_v41  }
  0x1e PF: > { %s13_s14 = sadd.s32 1, %s548_s14   ;;  %s620_s12 = smov %s544_s13 }
  0x1f   : > { %p10_p5 = scmp.ge.s32.totalorder %s13_s14, 4   ;;  %s621_s13 = smov %s623_s15 }
  0x21   :  { %12 = sbr.rel (!%p10_p5) target bundleno = 2 (0x2), region = 68 }

// kernel: model_forward.16
= control target key start
LH: loop header
LB: loop body
LE: loop exit
PB: predicated region body
PF: predicated region fallthrough
CT: control target
= control target key end

     0   :  { %s1009_s24 = smov 0   ;;  %s1011_s25 = smov 0   ;;  %s1133_s0 = inlined_call_operand.vmem [shape: bf16[2,64,128], index: 0, kind: input, shape index: {}]   ;;  %s1134_s1 = inlined_call_operand.vmem [shape: f32[1,1,128], index: 1, kind: input, shape index: {}]   ;;  %s1135_s2 = inlined_call_operand.vmem [shape: f32[1,1,128], index: 2, kind: input, shape index: {}]   ;;  %s1136_s3 = inlined_call_operand.vmem [shape: f32[2,1,128], index: 3, kind: input, shape index: {}]   ;;  %s1137_s4 = inlined_call_operand.vmem [shape: bf16[2,64,128], index: 4, kind: input, shape index: {}]   ;;  %s1138_s5 = inlined_call_operand.vmem [shape: f32[1,1,128], index: 5, kind: input, shape index: {}]   ;;  %s1139_s6 = inlined_call_operand.vmem [shape: f32[1,1,128], index: 6, kind: input, shape index: {}]   ;;  %s1140_s7 = inlined_call_operand.vmem [shape: bf16[2,64,128], index: 7, kind: output, shape index: {}]  }
   0x1   :  { %s1013_s26 = smov 0  }
   0x2 LB: > { %s36_s27 = sadd.s32 1, %s963_s25  ;;  %p827_p0 = scmp.ge.s32.totalorder %s967_s26, 1  ;;  %s967_s26 = sphi %s1013_s26, %s17_s26   ;;  %s963_s25 = sphi %s1011_s25, %s1142_s25   ;;  %s959_s24 = sphi %s1009_s24, %s1141_s24  }
   0x3   : > { %p38_p1 = scmp.ge.s32.totalorder %s36_s27, 2  ;;  %p339_p2 = scmp.lt.s32.totalorder %s967_s26, 3 }
   0x5   : > { %s1144_s27 = smov (%p38_p1, %s36_s27), 0  ;;  %p340_p3 = pnand %p827_p0, %p339_p2 }
   0x6   : > { %p416_p4 = scmp.lt.s32.totalorder (!%p340_p3), %s959_s24, 1  ;;  %v1046_v2 = vld [vmem:[%s1134_s1] ss:$0 sm:$0xff] (!%p340_p3) }
   0x7   : > { %343 = sbr.rel (%p340_p3) target bundleno = 45 (0x2d), region = 48  ;;  %v1055_v6 = vld [vmem:[%s1138_s5] ss:$0 sm:$0xff] (!%p340_p3) }
   0x8   : > { %v1061_v10 = vld [vmem:[%s1135_s2] ss:$0 sm:$0xff] (!%p340_p3) }
   0x9   : > { %v1068_v17 = vld [vmem:[%s1139_s6] ss:$0 sm:$0xff] (!%p340_p3) }
   0xe   : > { %s1146_s24 = smov (!%p416_p4, %s959_s24), 1 }
   0xf   : > { %s1027_s28 = sshll.u32 %s1146_s24, 5  ;;  %s439_s16 = scalar_lea.vmem %s1136_s3, %s1146_s24 }
  0x10   : > { %s1033_s8 = scalar_lea.vmem %s1133_s0, %s1027_s28  ;;  %s1039_s11 = scalar_lea.vmem %s1137_s4, %s1027_s28  ;;  %v1074_v22 = vld [vmem:[%s439_s16] ss:$0 sm:$0xff] }
  0x11   : > { %v861_v0 = vld [vmem:[%s1033_s8] sm:$0xff]   ;;  %v912_v1 = vld [vmem:[%s1033_s8 + $0x8] sm:$0xff]   ;;  %v913_v25 = vld [vmem:[%s1033_s8 + $0x10] sm:$0xff]   ;;  %s1102_s29 = scalar_lea.vmem %s1140_s7, %s1027_s28 }
  0x12   : > { %v862_v3 = vunpack.c.l.bf16 %v861_v0  ;;  %v863_v4 = vunpack.c.h.bf16 %v861_v0  ;;  %v877_v5 = vld [vmem:[%s1039_s11] sm:$0xff]   ;;  %v866_v7 = vunpack.c.l.bf16 %v912_v1  ;;  %v867_v8 = vunpack.c.h.bf16 %v912_v1  ;;  %v915_v9 = vld [vmem:[%s1039_s11 + $0x8] sm:$0xff]   ;;  %v916_v30 = vld [vmem:[%s1039_s11 + $0x10] sm:$0xff]  }
  0x13   : > { %v878_v11 = vunpack.c.l.bf16 %v877_v5  ;;  %v879_v12 = vunpack.c.h.bf16 %v877_v5  ;;  %v882_v13 = vunpack.c.l.bf16 %v915_v9  ;;  %v883_v14 = vunpack.c.h.bf16 %v915_v9  ;;  %v914_v47 = vld [vmem:[%s1033_s8 + $0x18] sm:$0xff]  }
  0x14   : > { %v495_v15 = vmul.f32 %v862_v3, %v1046_v2  ;;  %v496_v16 = vmul.f32 %v863_v4, %v1046_v2  ;;  %v497_v18 = vmul.f32 %v866_v7, %v1046_v2  ;;  %v498_v19 = vmul.f32 %v867_v8, %v1046_v2  ;;  %v917_v56 = vld [vmem:[%s1039_s11 + $0x18] sm:$0xff]  }
  0x15   : > { %v541_v20 = vmul.f32 %v878_v11, %v1055_v6  ;;  %v542_v21 = vmul.f32 %v879_v12, %v1055_v6  ;;  %v543_v23 = vmul.f32 %v882_v13, %v1055_v6  ;;  %v544_v24 = vmul.f32 %v883_v14, %v1055_v6 }
  0x16   : > { %v510_v26 = vadd.f32 %v1061_v10, %v495_v15  ;;  %v511_v27 = vadd.f32 %v1061_v10, %v496_v16  ;;  %v512_v28 = vadd.f32 %v1061_v10, %v497_v18  ;;  %v513_v29 = vadd.f32 %v1061_v10, %v498_v19 }
  0x17   : > { %v556_v31 = vadd.f32 %v1068_v17, %v541_v20  ;;  %v557_v32 = vadd.f32 %v1068_v17, %v542_v21  ;;  %v558_v33 = vadd.f32 %v1068_v17, %v543_v23  ;;  %v559_v34 = vadd.f32 %v1068_v17, %v544_v24 }
  0x18   : > { %v571_v35 = vmul.f32 %v1074_v22, %v510_v26  ;;  %v572_v36 = vmul.f32 %v1074_v22, %v511_v27  ;;  %v573_v37 = vmul.f32 %v1074_v22, %v512_v28  ;;  %v574_v38 = vmul.f32 %v1074_v22, %v513_v29 }
  0x19   : > { %v870_v39 = vunpack.c.l.bf16 %v913_v25  ;;  %v871_v40 = vunpack.c.h.bf16 %v913_v25  ;;  %v886_v41 = vunpack.c.l.bf16 %v916_v30  ;;  %v887_v42 = vunpack.c.h.bf16 %v916_v30 }
  0x1a   : > { %v579_v43 = vadd.f32 %v571_v35, %v556_v31  ;;  %v580_v44 = vadd.f32 %v572_v36, %v557_v32  ;;  %v581_v45 = vadd.f32 %v573_v37, %v558_v33  ;;  %v582_v46 = vadd.f32 %v574_v38, %v559_v34 }
  0x1b   : > { %v499_v48 = vmul.f32 %v870_v39, %v1046_v2  ;;  %v500_v49 = vmul.f32 %v871_v40, %v1046_v2  ;;  %v545_v50 = vmul.f32 %v886_v41, %v1055_v6  ;;  %v546_v51 = vmul.f32 %v887_v42, %v1055_v6 }
  0x1c   : > { %v587_v52 = vmax.f32 %v579_v43, 0.0  ;;  %v588_v53 = vmax.f32 %v580_v44, 0.0  ;;  %v589_v54 = vmax.f32 %v581_v45, 0.0  ;;  %v590_v55 = vmax.f32 %v582_v46, 0.0 }
  0x1d   : > { %v514_v57 = vadd.f32 %v1061_v10, %v499_v48  ;;  %v515_v58 = vadd.f32 %v1061_v10, %v500_v49  ;;  %v560_v59 = vadd.f32 %v1068_v17, %v545_v50  ;;  %v561_v60 = vadd.f32 %v1068_v17, %v546_v51 }
  0x1e   : > { %v895_v61 = vpack.c.bf16 %v588_v53, %v587_v52  ;;  %v900_v62 = vpack.c.bf16 %v590_v55, %v589_v54  ;;  %v874_v63 = vunpack.c.l.bf16 %v914_v47  ;;  %v875_v0 = vunpack.c.h.bf16 %v914_v47 }
  0x1f   : > { %v575_v1 = vmul.f32 %v1074_v22, %v514_v57  ;;  %v576_v3 = vmul.f32 %v1074_v22, %v515_v58  ;;  %v890_v4 = vunpack.c.l.bf16 %v917_v56  ;;  %v891_v5 = vunpack.c.h.bf16 %v917_v56 }
  0x20   : > { %896 = vst [vmem:[%s1102_s29] sm:$0xff] %v895_v61   ;;  %918 = vst [vmem:[%s1102_s29 + $0x8] sm:$0xff] %v900_v62   ;;  %v501_v7 = vmul.f32 %v874_v63, %v1046_v2  ;;  %v502_v8 = vmul.f32 %v875_v0, %v1046_v2 }
  0x21   : > { %v583_v9 = vadd.f32 %v575_v1, %v560_v59  ;;  %v584_v11 = vadd.f32 %v576_v3, %v561_v60  ;;  %v547_v12 = vmul.f32 %v890_v4, %v1055_v6  ;;  %v548_v13 = vmul.f32 %v891_v5, %v1055_v6 }
  0x22   : > { %v516_v14 = vadd.f32 %v1061_v10, %v501_v7  ;;  %v517_v15 = vadd.f32 %v1061_v10, %v502_v8 }
  0x23   : > { %v591_v16 = vmax.f32 %v583_v9, 0.0  ;;  %v592_v18 = vmax.f32 %v584_v11, 0.0  ;;  %v562_v19 = vadd.f32 %v1068_v17, %v547_v12  ;;  %v563_v20 = vadd.f32 %v1068_v17, %v548_v13 }
  0x24   : > { %v577_v2 = vmul.f32 %v1074_v22, %v516_v14  ;;  %v578_v21 = vmul.f32 %v1074_v22, %v517_v15 }
  0x25   : > { %v905_v23 = vpack.c.bf16 %v592_v18, %v591_v16 }
  0x26   : > { %v585_v24 = vadd.f32 %v577_v2, %v562_v19  ;;  %v586_v25 = vadd.f32 %v578_v21, %v563_v20 }
  0x27   : > { %919 = vst [vmem:[%s1102_s29 + $0x10] sm:$0xff] %v905_v23  }
  0x28   : > { %v593_v6 = vmax.f32 %v585_v24, 0.0  ;;  %v594_v26 = vmax.f32 %v586_v25, 0.0 }
  0x2a   : > { %v910_v27 = vpack.c.bf16 %v594_v26, %v593_v6 }
  0x2c   : > { %920 = vst [vmem:[%s1102_s29 + $0x18] sm:$0xff] %v910_v27  }
  0x2d PF: > { %s17_s26 = sadd.s32 1, %s967_s26   ;;  %s1141_s24 = smov %s963_s25 }
  0x2e   : > { %p14_p5 = scmp.ge.s32.totalorder %s17_s26, 4   ;;  %s1142_s25 = smov %s1144_s27 }
  0x30   :  { %16 = sbr.rel (!%p14_p5) target bundleno = 2 (0x2), region = 96 }

// kernel: model_forward.14
= control target key start
LH: loop header
LB: loop body
LE: loop exit
PB: predicated region body
PF: predicated region fallthrough
CT: control target
= control target key end

     0   :  { %v334_v0 = vmov 0.0   ;;  %vm335_vm0 = vmmov 0   ;;  %s410_s1 = inlined_call_operand.vmem [shape: bf16[128,128], index: 1, kind: input, shape index: {}]   ;;  %s411_s2 = inlined_call_operand.vmem [shape: bf16[128,128], index: 2, kind: input, shape index: {}]   ;;  %s412_s0 = inlined_call_operand.vmem [shape: bf16[2,128], index: 0, kind: input, shape index: {}]   ;;  %s413_s3 = inlined_call_operand.vmem [shape: f32[2,128], index: 3, kind: output, shape index: {}]  }
   0x1   :  { %272 = vmatprep.subr.bf16.mxu0 %v334_v0  ;;  %v314_v1 = vld [vmem:[%s410_s1] sm:$0xff]   ;;  %288 = vmatprep.mubr.msk.bf16.mxu0 %vm335_vm0, %v334_v0  ;;  %v315_v2 = vld [vmem:[%s410_s1 + $0x8] sm:$0xff]   ;;  %v316_v3 = vld [vmem:[%s410_s1 + $0x10] sm:$0xff]  }
   0x2   :  { %292 = vmatprep.subr.bf16.mxu1 %v334_v0  ;;  %308 = vmatprep.mubr.msk.bf16.mxu1 %vm335_vm0, %v334_v0  ;;  %v322_v4 = vld [vmem:[%s411_s2] sm:$0xff]   ;;  %v317_v5 = vld [vmem:[%s410_s1 + $0x18] sm:$0xff]   ;;  %v323_v6 = vld [vmem:[%s411_s2 + $0x8] sm:$0xff]  }
   0x3   :  { %273 = vmatpush3.bf16.msra.mxu0 %v314_v1  ;;  %293 = vmatpush3.bf16.msra.mxu1 %v322_v4  ;;  %v318_v7 = vld [vmem:[%s410_s1 + $0x20] sm:$0xff]   ;;  %v324_v8 = vld [vmem:[%s411_s2 + $0x10] sm:$0xff]   ;;  %v319_v9 = vld [vmem:[%s410_s1 + $0x28] sm:$0xff]  }
   0x4   :  { %274 = vmatprep.subr.bf16.mxu0 %v334_v0  ;;  %294 = vmatprep.subr.bf16.mxu1 %v334_v0  ;;  %v325_v10 = vld [vmem:[%s411_s2 + $0x18] sm:$0xff]   ;;  %v320_v11 = vld [vmem:[%s410_s1 + $0x30] sm:$0xff]   ;;  %v326_v12 = vld [vmem:[%s411_s2 + $0x20] sm:$0xff]  }
   0x5   :  { %v321_v13 = vld [vmem:[%s410_s1 + $0x38] sm:$0xff]   ;;  %v327_v14 = vld [vmem:[%s411_s2 + $0x28] sm:$0xff]   ;;  %v15_v15 = vld [vmem:[%s412_s0] sm:$0x1] }
   0x6   :  { %v328_v16 = vld [vmem:[%s411_s2 + $0x30] sm:$0xff]   ;;  %v329_v17 = vld [vmem:[%s411_s2 + $0x38] sm:$0xff]  }
   0x7   :  { %275 = vmatpush3.bf16.msra.mxu0 %v315_v2  ;;  %295 = vmatpush3.bf16.msra.mxu1 %v323_v6 }
   0x8   :  { %276 = vmatprep.subr.bf16.mxu0 %v334_v0  ;;  %296 = vmatprep.subr.bf16.mxu1 %v334_v0 }
   0xb   :  { %277 = vmatpush3.bf16.msra.mxu0 %v316_v3  ;;  %297 = vmatpush3.bf16.msra.mxu1 %v324_v8 }
   0xc   :  { %278 = vmatprep.subr.bf16.mxu0 %v334_v0  ;;  %298 = vmatprep.subr.bf16.mxu1 %v334_v0 }
   0xf   :  { %279 = vmatpush3.bf16.msra.mxu0 %v317_v5  ;;  %299 = vmatpush3.bf16.msra.mxu1 %v325_v10 }
  0x10   :  { %280 = vmatprep.subr.bf16.mxu0 %v334_v0  ;;  %300 = vmatprep.subr.bf16.mxu1 %v334_v0 }
  0x13   :  { %281 = vmatpush3.bf16.msra.mxu0 %v318_v7  ;;  %301 = vmatpush3.bf16.msra.mxu1 %v326_v12 }
  0x14   :  { %282 = vmatprep.subr.bf16.mxu0 %v334_v0  ;;  %302 = vmatprep.subr.bf16.mxu1 %v334_v0 }
  0x17   :  { %283 = vmatpush3.bf16.msra.mxu0 %v319_v9  ;;  %303 = vmatpush3.bf16.msra.mxu1 %v327_v14 }
  0x18   :  { %284 = vmatprep.subr.bf16.mxu0 %v334_v0  ;;  %304 = vmatprep.subr.bf16.mxu1 %v334_v0 }
  0x1b   :  { %285 = vmatpush3.bf16.msra.mxu0 %v320_v11  ;;  %305 = vmatpush3.bf16.msra.mxu1 %v328_v16 }
  0x1c   :  { %286 = vmatprep.subr.bf16.mxu0 %v334_v0  ;;  %306 = vmatprep.subr.bf16.mxu1 %v334_v0 }
  0x1f   :  { %287 = vmatpush3.bf16.msra.mxu0 %v321_v13  ;;  %307 = vmatpush3.bf16.msra.mxu1 %v329_v17 }
  0x22   :  { %289 = vmatmul.mubr.bf16.vlgmr.msra.gmra.mrb[0].mxu0 %v15_v15 }
  0xf5   :  { %v114_v18 = vpop.f32.mrb[0].mxu0 }
  0xf6   :  { %v120_v19 = vmax.f32 %v114_v18, 0.0  ;;  %v290_v20 = vpop.f32.mrb[1].mxu0 }
  0xf7   :  { %v117_v21 = vpop.f32.mrb[2].mxu0 }
  0xf8   :  { %v121_v22 = vpack.c.bf16 %v120_v19, %v120_v19  ;;  %v291_v23 = vpop.f32.mrb[3].mxu0 }
  0xfa   :  { %309 = vmatmul.mubr.bf16.vlgmr.msra.gmra.mrb[0].mxu1 %v121_v22 }
 0x1cd   :  { %v220_v24 = vpop.f32.mrb[0].mxu1 }
 0x1ce   :  { %v253_v25 = vmul.f32 -1.442695, %v220_v24  ;;  %v310_v26 = vpop.f32.mrb[1].mxu1 }
 0x1cf   :  { %v223_v27 = vpop.f32.mrb[2].mxu1 }
 0x1d0   :  { %330 = vpow2.f32 %v253_v25  ;;  %v311_v28 = vpop.f32.mrb[3].mxu1 }
 0x1da   :  { %v331_v29 = vpop.eup %330 }
 0x1db   :  { %v229_v30 = vadd.f32 1.0, %v331_v29 }
 0x1dd   :  { %332 = vrcp.f32 %v229_v30 }
 0x1e7   :  { %v333_v31 = vpop.eup %332 }
 0x1e8   :  { %232 = vst [vmem:[%s413_s3] sm:$0x3] %v333_v31 }

// kernel: model_forward.11
= control target key start
LH: loop header
LB: loop body
LE: loop exit
PB: predicated region body
PF: predicated region fallthrough
CT: control target
= control target key end

     0   :  { %s3406_s15 = smov 0   ;;  %s3408_s16 = smov 0   ;;  %s3825_s0 = inlined_call_operand.vmem [shape: bf16[2,9,9,512], index: 0, kind: input, shape index: {}]   ;;  %s3826_s1 = inlined_call_operand.vmem [shape: bf16[9,128,128], index: 1, kind: input, shape index: {}]   ;;  %s3827_s2 = inlined_call_operand.vmem [shape: bf16[2,64,128], index: 2, kind: output, shape index: {0}]   ;;  %s3828_s3 = inlined_call_operand.vmem [shape: f32[2,1,128], index: 3, kind: output, shape index: {1}]   ;;  %s3829_s4 = inlined_call_operand.vmem [shape: f32[2,1,128], index: 4, kind: output, shape index: {2}]  }
   0x1   :  { %s3410_s17 = smov 0  }
   0x2 LB: > { %s24_s18 = sadd.s32 1, %s3375_s16  ;;  %p2542_p0 = scmp.ge.s32.totalorder %s3379_s17, 1  ;;  %s3379_s17 = sphi %s3410_s17, %s15_s17   ;;  %s3375_s16 = sphi %s3408_s16, %s3833_s16   ;;  %s3371_s15 = sphi %s3406_s15, %s3832_s15  }
   0x3   : > { %p25_p1 = scmp.ge.s32.totalorder %s24_s18, 2  ;;  %p194_p2 = scmp.lt.s32.totalorder %s3379_s17, 3 }
   0x5   : > { %s3835_s18 = smov (%p25_p1, %s24_s18), 0  ;;  %p195_p3 = pnand %p2542_p0, %p194_p2 }
   0x6   : > { %v3285_v0 = vld [vmem:[%s3826_s1] sm:$0xff] (!%p195_p3)   ;;  %p239_p4 = scmp.lt.s32.totalorder (!%p195_p3), %s3371_s15, 1  ;;  %v3287_v2 = vld [vmem:[%s3826_s1 + $0x8] sm:$0xff] (!%p195_p3)   ;;  %v3289_v4 = vld [vmem:[%s3826_s1 + $0x10] sm:$0xff] (!%p195_p3)   ;;  %vm672_vm0 = vsmask.f32 (!%p195_p3), 3328 }
   0x7   : > { %198 = sbr.rel (%p195_p3) target bundleno = 414 (0x19e), region = 28  ;;  %v3286_v1 = vld [vmem:[%s3826_s1 + $0x100] sm:$0xff] (!%p195_p3)   ;;  %2964 = vmatprep.subr.bf16.mxu1 (!%p195_p3), %v3285_v0  ;;  %v3288_v3 = vld [vmem:[%s3826_s1 + $0x108] sm:$0xff] (!%p195_p3)   ;;  %v3290_v5 = vld [vmem:[%s3826_s1 + $0x110] sm:$0xff] (!%p195_p3)   ;;  %vm673_vm1 = vsmask.f32 (!%p195_p3), 7440 }
   0x8   : > { %3060 = vmatprep.subr.bf16.mxu0 (!%p195_p3), %v3286_v1  ;;  %2965 = vmatpush3.bf16.msra.mxu1 (!%p195_p3), %v3285_v0  ;;  %v3291_v6 = vld [vmem:[%s3826_s1 + $0x18] sm:$0xff] (!%p195_p3)   ;;  %v3293_v8 = vld [vmem:[%s3826_s1 + $0x20] sm:$0xff] (!%p195_p3)   ;;  %v3295_v10 = vld [vmem:[%s3826_s1 + $0x28] sm:$0xff] (!%p195_p3)  }
   0x9   : > { %3061 = vmatpush3.bf16.msra.mxu0 (!%p195_p3), %v3286_v1  ;;  %2966 = vmatprep.subr.bf16.mxu1 (!%p195_p3), %v3287_v2  ;;  %v3292_v7 = vld [vmem:[%s3826_s1 + $0x118] sm:$0xff] (!%p195_p3)   ;;  %v3294_v9 = vld [vmem:[%s3826_s1 + $0x120] sm:$0xff] (!%p195_p3)   ;;  %v3296_v13 = vld [vmem:[%s3826_s1 + $0x128] sm:$0xff] (!%p195_p3)  }
   0xa   : > { %3062 = vmatprep.subr.bf16.mxu0 (!%p195_p3), %v3288_v3  ;;  %v3297_v18 = vld [vmem:[%s3826_s1 + $0x30] sm:$0xff] (!%p195_p3)   ;;  %v3299_v20 = vld [vmem:[%s3826_s1 + $0x38] sm:$0xff] (!%p195_p3)   ;;  %v3301_v23 = vld [vmem:[%s3826_s1 + $0x40] sm:$0xff] (!%p195_p3)  }
   0xb   : > { %v3298_v19 = vld [vmem:[%s3826_s1 + $0x130] sm:$0xff] (!%p195_p3)   ;;  %v3300_v21 = vld [vmem:[%s3826_s1 + $0x138] sm:$0xff] (!%p195_p3)   ;;  %v3302_v27 = vld [vmem:[%s3826_s1 + $0x140] sm:$0xff] (!%p195_p3)  }
   0xc   : > { %2967 = vmatpush3.bf16.msra.mxu1 (!%p195_p3), %v3287_v2  ;;  %v3303_v32 = vld [vmem:[%s3826_s1 + $0x48] sm:$0xff] (!%p195_p3)   ;;  %v3305_v37 = vld [vmem:[%s3826_s1 + $0x50] sm:$0xff] (!%p195_p3)   ;;  %v3307_v45 = vld [vmem:[%s3826_s1 + $0x58] sm:$0xff] (!%p195_p3)  }
   0xd   : > { %3063 = vmatpush3.bf16.msra.mxu0 (!%p195_p3), %v3288_v3  ;;  %2968 = vmatprep.subr.bf16.mxu1 (!%p195_p3), %v3289_v4  ;;  %v3304_v35 = vld [vmem:[%s3826_s1 + $0x148] sm:$0xff] (!%p195_p3)   ;;  %v3306_v43 = vld [vmem:[%s3826_s1 + $0x150] sm:$0xff] (!%p195_p3)   ;;  %v3308_v54 = vld [vmem:[%s3826_s1 + $0x158] sm:$0xff] (!%p195_p3)  }
   0xe   : > { %s3837_s15 = smov (!%p239_p4, %s3371_s15), 1  ;;  %3064 = vmatprep.subr.bf16.mxu0 %v3290_v5  ;;  %v3309_v1 = vld [vmem:[%s3826_s1 + $0x60] sm:$0xff]   ;;  %vm3534_vm2 = vmor %vm672_vm0, %vm673_vm1 }
   0xf   : > { %s3260_s9 = smul.u32 288, %s3837_s15  ;;  %v3310_v2 = vld [vmem:[%s3826_s1 + $0x160] sm:$0xff]   ;;  %s2824_s13 = sshll.u32 %s3837_s15, 5 }
  0x10   : > { %2969 = vmatpush3.bf16.msra.mxu1 %v3289_v4  ;;  %s255_s21 = scalar_lea.vmem %s3827_s2, %s2824_s13  ;;  %s261_s24 = scalar_lea.vmem %s3828_s3, %s3837_s15 }
  0x11   : > { %3065 = vmatpush3.bf16.msra.mxu0 %v3290_v5  ;;  %2970 = vmatprep.subr.bf16.mxu1 %v3291_v6  ;;  %s3460_s20 = scalar_lea.vmem %s3825_s0, %s3260_s9  ;;  %s267_s27 = scalar_lea.vmem %s3829_s4, %s3837_s15 }
  0x12   : > { %3066 = vmatprep.subr.bf16.mxu0 %v3292_v7  ;;  %v277_v11 = vld [vmem:[%s3460_s20] sm:$0xf]  ;;  %v1135_v15 = vld [vmem:[%s3460_s20 + $0xc] sm:$0xf]  ;;  %v462_v44 = vld [vmem:[%s3460_s20 + $0x4] sm:$0xf] }
  0x13   : > { %v278_v12 = vld [vmem:[%s3460_s20 + $0x20] sm:$0xf]  ;;  %v1136_v16 = vld [vmem:[%s3460_s20 + $0x2c] sm:$0xf]  ;;  %v463_v47 = vld [vmem:[%s3460_s20 + $0x24] sm:$0xf] }
  0x14   : > { %2971 = vmatpush3.bf16.msra.mxu1 %v3291_v6  ;;  %v2546_v14 = vcombine.low %v277_v11, %v278_v12  ;;  %v2658_v17 = vcombine.low %v1135_v15, %v1136_v16  ;;  %v279_v22 = vld [vmem:[%s3460_s20 + $0x40] sm:$0xf]  ;;  %v1137_v25 = vld [vmem:[%s3460_s20 + $0x4c] sm:$0xf]  ;;  %v1321_v49 = vld [vmem:[%s3460_s20 + $0x8] sm:$0xf]  ;;  %v2574_v55 = vcombine.low %v462_v44, %v463_v47 }
  0x15   : > { %3067 = vmatpush3.bf16.msra.mxu0 %v3292_v7  ;;  %2972 = vmatprep.subr.bf16.mxu1 %v3293_v8  ;;  %v280_v24 = vld [vmem:[%s3460_s20 + $0x60] sm:$0xf]  ;;  %v1138_v26 = vld [vmem:[%s3460_s20 + $0x6c] sm:$0xf]  ;;  %v1322_v50 = vld [vmem:[%s3460_s20 + $0x18] sm:$0x1] }
  0x16   : > { %3068 = vmatprep.subr.bf16.mxu0 %v3294_v9  ;;  %2980 = vmatprep.mubr.bf16.mxu1 %v2546_v14  ;;  %v2547_v28 = vcombine.low %v279_v22, %v280_v24  ;;  %v281_v29 = vld [vmem:[%s3460_s20 + $0x80] sm:$0xf]  ;;  %v2659_v30 = vcombine.low %v1137_v25, %v1138_v26  ;;  %v1139_v33 = vld [vmem:[%s3460_s20 + $0x8c] sm:$0xf]  ;;  %v1323_v51 = vld [vmem:[%s3460_s20 + $0x28] sm:$0xf] }
  0x17   : > { %3076 = vmatprep.mubr.bf16.mxu0 %v2658_v17  ;;  %v282_v31 = vld [vmem:[%s3460_s20 + $0xa0] sm:$0xf]  ;;  %v1140_v34 = vld [vmem:[%s3460_s20 + $0xac] sm:$0xf]  ;;  %v1346_v52 = vshrl.u32 %v1321_v49, 16  ;;  %v1349_v53 = vshll.u32 %v1321_v49, 16 }
  0x18   : > { %2973 = vmatpush3.bf16.msra.mxu1 %v3293_v8  ;;  %v2548_v36 = vcombine.low %v281_v29, %v282_v31  ;;  %v2660_v38 = vcombine.low %v1139_v33, %v1140_v34  ;;  %v283_v39 = vld [vmem:[%s3460_s20 + $0xc0] sm:$0xf]  ;;  %v1141_v41 = vld [vmem:[%s3460_s20 + $0xcc] sm:$0xf]  ;;  %v1324_v56 = vld [vmem:[%s3460_s20 + $0x38] sm:$0x1] }
  0x19   : > { %3069 = vmatpush3.bf16.msra.mxu0 %v3294_v9  ;;  %2974 = vmatprep.subr.bf16.mxu1 %v3295_v10  ;;  %v284_v40 = vld [vmem:[%s3460_s20 + $0xe0] sm:$0xf]  ;;  %v1142_v42 = vld [vmem:[%s3460_s20 + $0xec] sm:$0xf]  ;;  %v1355_v57 = vshll.u32 %v1322_v50, 16  ;;  %v1360_v58 = vshrl.u32 %v1323_v51, 16 }
  0x1a   : > { %3070 = vmatprep.subr.bf16.mxu0 %v3296_v13  ;;  %v2549_v46 = vcombine.low %v283_v39, %v284_v40  ;;  %v2661_v48 = vcombine.low %v1141_v41, %v1142_v42  ;;  %v1363_v59 = vshll.u32 %v1323_v51, 16  ;;  %v1348_v60 = vrot.slane %v1346_v52, 4  ;;  %v1325_v8 = vld [vmem:[%s3460_s20 + $0x48] sm:$0xf]  ;;  %v1326_v9 = vld [vmem:[%s3460_s20 + $0x58] sm:$0x1] }
  0x1b   : > { %v1351_v61 = vrot.slane %v1349_v53, 5  ;;  %v1369_v62 = vshll.u32 %v1324_v56, 16  ;;  %v1362_v63 = vrot.slane %v1360_v58, 4  ;;  %v1357_v5 = vrot.slane %v1355_v57, 5  ;;  %v1328_v12 = vld [vmem:[%s3460_s20 + $0x78] sm:$0x1] }
  0x1c   : > { %2975 = vmatpush3.bf16.msra.mxu1 %v3295_v10  ;;  %v1365_v0 = vrot.slane %v1363_v59, 5  ;;  %v1327_v10 = vld [vmem:[%s3460_s20 + $0x68] sm:$0xf]  ;;  %v1377_v14 = vshll.u32 %v1325_v8, 16  ;;  %v1383_v22 = vshll.u32 %v1326_v9, 16  ;;  %v3317_v40 = vld [vmem:[%s3826_s1 + $0x80] sm:$0xff]  }
  0x1d   : > { %3071 = vmatpush3.bf16.msra.mxu0 %v3296_v13  ;;  %2976 = vmatprep.subr.bf16.mxu1 %v3297_v18  ;;  %v1352_v4 = vor.u32 %v1351_v61, %v1348_v60  ;;  %v1371_v6 = vrot.slane %v1369_v62, 5  ;;  %v1374_v13 = vshrl.u32 %v1325_v8, 16  ;;  %v1388_v16 = vshrl.u32 %v1327_v10, 16  ;;  %v464_v39 = vld [vmem:[%s3460_s20 + $0x44] sm:$0xf]  ;;  %v3319_v62 = vld [vmem:[%s3826_s1 + $0x88] sm:$0xff]  }
  0x1e   : > { %3072 = vmatprep.subr.bf16.mxu0 %v3298_v19  ;;  %v1366_v7 = vor.u32 %v1365_v0, %v1362_v63  ;;  %v1391_v17 = vshll.u32 %v1327_v10, 16  ;;  %v1385_v33 = vrot.slane %v1383_v22, 5  ;;  %v465_v41 = vld [vmem:[%s3460_s20 + $0x64] sm:$0xf]  ;;  %v1329_v47 = vld [vmem:[%s3460_s20 + $0x88] sm:$0xf] }
  0x1f   : > { %v1353_v11 = vrot.slane %v1352_v4, 4  ;;  %v1390_v25 = vrot.slane %v1388_v16, 4  ;;  %v3318_v42 = vld [vmem:[%s3826_s1 + $0x180] sm:$0xff]   ;;  %v1331_v49 = vld [vmem:[%s3460_s20 + $0xa8] sm:$0xf]  ;;  %v1402_v51 = vshrl.u32 %v1329_v47, 16  ;;  %v2575_v57 = vcombine.low %v464_v39, %v465_v41 }
  0x20   : > { %2977 = vmatpush3.bf16.msra.mxu1 %v3297_v18  ;;  %v1367_v15 = vrot.slane %v1366_v7, 4  ;;  %v3311_v18 = vld [vmem:[%s3826_s1 + $0x68] sm:$0xff]   ;;  %v1393_v26 = vrot.slane %v1391_v17, 5  ;;  %v1332_v50 = vld [vmem:[%s3460_s20 + $0xb8] sm:$0x1]  ;;  %v1405_v52 = vshll.u32 %v1329_v47, 16 }
  0x21   : > { %3073 = vmatpush3.bf16.msra.mxu0 %v3298_v19  ;;  %2978 = vmatprep.subr.bf16.mxu1 %v3299_v20  ;;  %v1358_v19 = vsel %vm3534_vm2, %v1353_v11, %v1357_v5  ;;  %v1425_v56 = vshll.u32 %v1332_v50, 16  ;;  %v1404_v58 = vrot.slane %v1402_v51, 4  ;;  %v3586_v5 = vld [vmem:[%s3460_s20 + $0xc4] sm:$0xf]  ;;  %v1333_v7 = vld [vmem:[%s3460_s20 + $0xc8] sm:$0xf] }
  0x22   : > { %3074 = vmatprep.subr.bf16.mxu0 %v3300_v21  ;;  %v1372_v24 = vsel %vm3534_vm2, %v1367_v15, %v1371_v6  ;;  %v1394_v31 = vor.u32 %v1393_v26, %v1390_v25  ;;  %v1407_v59 = vrot.slane %v1405_v52, 5  ;;  %v469_v6 = vld [vmem:[%s3460_s20 + $0xe4] sm:$0xf]  ;;  %v1334_v8 = vld [vmem:[%s3460_s20 + $0xd8] sm:$0x1]  ;;  %v3320_v10 = vld [vmem:[%s3826_s1 + $0x188] sm:$0xff]  }
  0x23   : > { %v2686_v29 = vcombine.low %v1358_v19, %v1372_v24  ;;  %v1335_v9 = vld [vmem:[%s3460_s20 + $0xe8] sm:$0xf]  ;;  %v1439_v15 = vshll.u32 %v1334_v8, 16  ;;  %v3321_v16 = vld [vmem:[%s3826_s1 + $0x90] sm:$0xff]   ;;  %v3324_v50 = vld [vmem:[%s3826_s1 + $0x198] sm:$0xff]  }
  0x24   : > { %2979 = vmatpush3.bf16.msra.mxu1 %v3299_v20  ;;  %v1376_v20 = vrot.slane %v1374_v13, 4  ;;  %v1408_v4 = vor.u32 %v1407_v59, %v1404_v58  ;;  %v1430_v13 = vshrl.u32 %v1333_v7, 16  ;;  %v1447_v19 = vshll.u32 %v1335_v9, 16  ;;  %v3322_v25 = vld [vmem:[%s3826_s1 + $0x190] sm:$0xff]   ;;  %v2699_v58 = vld [vmem:[%s3460_s20 + $0x40] sm:$0xf] }
  0x25   : > { %3075 = vmatpush3.bf16.msra.mxu0 %v3300_v21  ;;  %2988 = vmatprep.subr.bf16.mxu1 %v3301_v23  ;;  %v1379_v21 = vrot.slane %v1377_v14, 5  ;;  %v1433_v14 = vshll.u32 %v1333_v7, 16  ;;  %v1441_v24 = vrot.slane %v1439_v15, 5  ;;  %v651_v39 = vld [vmem:[%s3460_s20 + $0x30] sm:$0x1]  ;;  %v3325_v59 = vld [vmem:[%s3826_s1 + $0xa0] sm:$0xff]  }
  0x26   : > { %3084 = vmatprep.subr.bf16.mxu0 %v3302_v27  ;;  %v1409_v17 = vrot.slane %v1408_v4, 4  ;;  %v1432_v22 = vrot.slane %v1430_v13, 4  ;;  %v654_v4 = vld [vmem:[%s3460_s20 + $0x60] sm:$0xf]  ;;  %v655_v8 = vld [vmem:[%s3460_s20 + $0x70] sm:$0x1] }
  0x27   : > { %2981 = vmatmul.mubr.bf16.vlgmr.msra.gmra.mrb[0].mxu1 %v2547_v28  ;;  %v3313_v28 = vld [vmem:[%s3826_s1 + $0x70] sm:$0xff]   ;;  %v3328_v15 = vld [vmem:[%s3826_s1 + $0x1a8] sm:$0xff]  }
  0x28   : > { %2989 = vmatpush3.bf16.msra.mxu1 %v3301_v23  ;;  %3077 = vmatmul.mubr.bf16.vlgmr.msra.gmra.mrb[0].mxu0 %v2659_v30  ;;  %v3312_v23 = vld [vmem:[%s3826_s1 + $0x168] sm:$0xff]   ;;  %v1380_v30 = vor.u32 %v1379_v21, %v1376_v20 }
  0x29   : > { %3085 = vmatpush3.bf16.msra.mxu0 %v3302_v27  ;;  %2990 = vmatprep.subr.bf16.mxu1 %v3303_v32  ;;  %v1397_v27 = vshll.u32 %v1328_v12, 16  ;;  %v1336_v12 = vld [vmem:[%s3460_s20 + $0xf8] sm:$0x1] }
  0x2a   : > { %3086 = vmatprep.subr.bf16.mxu0 %v3304_v35  ;;  %2984 = vmatprep.mubr.bf16.mxu1 %v2548_v36  ;;  %v1395_v36 = vrot.slane %v1394_v31, 4  ;;  %v1453_v20 = vshll.u32 %v1336_v12, 16  ;;  %v2577_v31 = vcombine.low %v3586_v5, %v469_v6  ;;  %v3326_v6 = vld [vmem:[%s3826_s1 + $0x1a0] sm:$0xff]  }
  0x2b   : > { %3080 = vmatprep.mubr.bf16.mxu0 %v2660_v38  ;;  %v1399_v34 = vrot.slane %v1397_v27, 5  ;;  %v3316_v38 = vld [vmem:[%s3826_s1 + $0x178] sm:$0xff]  }
  0x2c   : > { %2991 = vmatpush3.bf16.msra.mxu1 %v3303_v32  ;;  %v3314_v32 = vld [vmem:[%s3826_s1 + $0x170] sm:$0xff]  }
  0x2d   : > { %3087 = vmatpush3.bf16.msra.mxu0 %v3304_v35  ;;  %2992 = vmatprep.subr.bf16.mxu1 %v3305_v37  ;;  %v1381_v35 = vrot.slane %v1380_v30, 4  ;;  %v1400_v44 = vsel %vm3534_vm2, %v1395_v36, %v1399_v34  ;;  %v649_v34 = vld [vmem:[%s3460_s20 + $0x10] sm:$0x1] }
  0x2e   : > { %3088 = vmatprep.subr.bf16.mxu0 %v3306_v43 }
  0x2f   : > { %2985 = vmatmul.mubr.bf16.gmra.mrb[4].mxu1 %v2549_v46  ;;  %v467_v46 = vld [vmem:[%s3460_s20 + $0xa4] sm:$0xf] }
  0x30   : > { %2993 = vmatpush3.bf16.msra.mxu1 %v3305_v37  ;;  %3081 = vmatmul.mubr.bf16.gmra.mrb[4].mxu0 %v2661_v48  ;;  %v3315_v37 = vld [vmem:[%s3826_s1 + $0x78] sm:$0xff]  }
  0x31   : > { %3089 = vmatpush3.bf16.msra.mxu0 %v3306_v43  ;;  %2994 = vmatprep.subr.bf16.mxu1 %v3307_v45  ;;  %v1386_v43 = vsel %vm3534_vm2, %v1381_v35, %v1385_v33  ;;  %v1330_v48 = vld [vmem:[%s3460_s20 + $0x98] sm:$0x1]  ;;  %v648_v33 = vld [vmem:[%s3460_s20] sm:$0xf] }
  0x32   : > { %3090 = vmatprep.subr.bf16.mxu0 %v3308_v54  ;;  %3004 = vmatprep.mubr.bf16.mxu1 %v2574_v55  ;;  %v1411_v53 = vshll.u32 %v1330_v48, 16  ;;  %v1419_v55 = vshll.u32 %v1331_v49, 16  ;;  %v2687_v61 = vcombine.low %v1386_v43, %v1400_v44  ;;  %v3323_v35 = vld [vmem:[%s3826_s1 + $0x98] sm:$0xff]   ;;  %v679_v41 = vshll.u32 %v648_v33, 16 }
  0x33   : > { %3100 = vmatprep.mubr.bf16.mxu0 %v2686_v29  ;;  %v1455_v29 = vrot.slane %v1453_v20, 5  ;;  %v685_v43 = vshll.u32 %v649_v34, 16  ;;  %v2701_v34 = vld [vmem:[%s3460_s20 + $0x80] sm:$0xf] }
  0x34   : > { %2995 = vmatpush3.bf16.msra.mxu1 %v3307_v45  ;;  %v466_v45 = vld [vmem:[%s3460_s20 + $0x84] sm:$0xf]  ;;  %v1413_v63 = vrot.slane %v1411_v53, 5  ;;  %v1421_v0 = vrot.slane %v1419_v55, 5  ;;  %v681_v48 = vrot.slane %v679_v41, 5 }
  0x35   : > { %3091 = vmatpush3.bf16.msra.mxu0 %v3308_v54  ;;  %2996 = vmatprep.subr.bf16.mxu1 %v3309_v1  ;;  %v1416_v54 = vshrl.u32 %v1331_v49, 16  ;;  %v699_v49 = vshll.u32 %v651_v39, 16  ;;  %v658_v39 = vld [vmem:[%s3460_s20 + $0xa0] sm:$0xf]  ;;  %v659_v41 = vld [vmem:[%s3460_s20 + $0xb0] sm:$0x1] }
  0x36   : > { %3092 = vmatprep.subr.bf16.mxu0 %v3310_v2  ;;  %v1414_v26 = vsel %vm3534_vm2, %v1409_v17, %v1413_v63 }
  0x37   : > { %v1418_v60 = vrot.slane %v1416_v54, 4  ;;  %v2698_v54 = vld [vmem:[%s3460_s20 + $0x20] sm:$0xf] }
  0x38   : > { %2997 = vmatpush3.bf16.msra.mxu1 %v3309_v1  ;;  %v1427_v1 = vrot.slane %v1425_v56, 5  ;;  %v2722_v63 = vcombine.low %v2698_v54, %v2699_v58 }
  0x39   : > { %3093 = vmatpush3.bf16.msra.mxu0 %v3310_v2  ;;  %2998 = vmatprep.subr.bf16.mxu1 %v3311_v18  ;;  %v2576_v2 = vcombine.low %v466_v45, %v467_v46  ;;  %v1422_v11 = vor.u32 %v1421_v0, %v1418_v60  ;;  %v652_v0 = vld [vmem:[%s3460_s20 + $0x40] sm:$0xf] }
  0x3a   : > { %3094 = vmatprep.subr.bf16.mxu0 %v3312_v23  ;;  %v704_v5 = vshrl.u32 %v652_v0, 16 }
  0x3b   : > { %v1423_v21 = vrot.slane %v1422_v11, 4  ;;  %v3327_v11 = vld [vmem:[%s3826_s1 + $0xa8] sm:$0xff]  }
  0x3c   : > { %2999 = vmatpush3.bf16.msra.mxu1 %v3311_v18  ;;  %v1444_v18 = vshrl.u32 %v1335_v9, 16  ;;  %v707_v9 = vshll.u32 %v652_v0, 16  ;;  %v706_v13 = vrot.slane %v704_v5, 4  ;;  %v663_v0 = vld [vmem:[%s3460_s20 + $0xf0] sm:$0x1]  ;;  %v3335_v5 = vld [vmem:[%s3826_s1 + $0xc8] sm:$0xff]  }
  0x3d   : > { %3095 = vmatpush3.bf16.msra.mxu0 %v3312_v23  ;;  %3000 = vmatprep.subr.bf16.mxu1 %v3313_v28  ;;  %v1435_v23 = vrot.slane %v1433_v14, 5  ;;  %v1428_v30 = vsel %vm3534_vm2, %v1423_v21, %v1427_v1  ;;  %v721_v14 = vshll.u32 %v654_v4, 16 }
  0x3e   : > { %3096 = vmatprep.subr.bf16.mxu0 %v3314_v32  ;;  %v1446_v27 = vrot.slane %v1444_v18, 4  ;;  %v2688_v36 = vcombine.low %v1414_v26, %v1428_v30  ;;  %v709_v17 = vrot.slane %v707_v9, 5  ;;  %v3330_v26 = vld [vmem:[%s3826_s1 + $0x1b0] sm:$0xff]   ;;  %v783_v9 = vshll.u32 %v663_v0, 16  ;;  %v2736_v0 = vld [vmem:[%s3460_s20 + $0x64] sm:$0xf] }
  0x3f   : > { %v723_v21 = vrot.slane %v721_v14, 5  ;;  %v3336_v14 = vld [vmem:[%s3826_s1 + $0x1c8] sm:$0xff]  }
  0x40   : > { %3001 = vmatpush3.bf16.msra.mxu1 %v3313_v28  ;;  %v1449_v28 = vrot.slane %v1447_v19, 5 }
  0x41   : > { %3097 = vmatpush3.bf16.msra.mxu0 %v3314_v32  ;;  %3002 = vmatprep.subr.bf16.mxu1 %v3315_v37  ;;  %v1436_v32 = vor.u32 %v1435_v23, %v1432_v22  ;;  %v727_v22 = vshll.u32 %v655_v8, 16  ;;  %v710_v23 = vor.u32 %v709_v17, %v706_v13 }
  0x42   : > { %3098 = vmatprep.subr.bf16.mxu0 %v3316_v38 }
  0x44   : > { %3003 = vmatpush3.bf16.msra.mxu1 %v3315_v37  ;;  %v1450_v37 = vor.u32 %v1449_v28, %v1446_v27  ;;  %v729_v28 = vrot.slane %v727_v22, 5 }
  0x45   : > { %3099 = vmatpush3.bf16.msra.mxu0 %v3316_v38  ;;  %3012 = vmatprep.subr.bf16.mxu1 %v3317_v40  ;;  %v650_v38 = vld [vmem:[%s3460_s20 + $0x20] sm:$0xf] }
  0x46   : > { %3108 = vmatprep.subr.bf16.mxu0 %v3318_v42  ;;  %v690_v44 = vshrl.u32 %v650_v38, 16  ;;  %v693_v45 = vshll.u32 %v650_v38, 16  ;;  %v1451_v46 = vrot.slane %v1450_v37, 4  ;;  %v656_v37 = vld [vmem:[%s3460_s20 + $0x80] sm:$0xf] }
  0x47   : > { %3005 = vmatmul.mubr.bf16.vlgmr.msra.gmra.mrb[0].mxu1 %v2575_v57  ;;  %v687_v57 = vrot.slane %v685_v43, 5  ;;  %v657_v38 = vld [vmem:[%s3460_s20 + $0x90] sm:$0x1]  ;;  %v735_v43 = vshll.u32 %v656_v37, 16 }
  0x48   : > { %3013 = vmatpush3.bf16.msra.mxu1 %v3317_v40  ;;  %3101 = vmatmul.mubr.bf16.vlgmr.msra.gmra.mrb[0].mxu0 %v2687_v61  ;;  %v676_v40 = vshrl.u32 %v648_v33, 16  ;;  %v692_v52 = vrot.slane %v690_v44, 4  ;;  %v695_v53 = vrot.slane %v693_v45, 5  ;;  %v1456_v55 = vsel %vm3534_vm2, %v1451_v46, %v1455_v29  ;;  %v3656_v33 = vld [vmem:[%s3460_s20 + $0x60] sm:$0xf] }
  0x49   : > { %3109 = vmatpush3.bf16.msra.mxu0 %v3318_v42  ;;  %3014 = vmatprep.subr.bf16.mxu1 %v3319_v62  ;;  %v1437_v42 = vrot.slane %v1436_v32, 4  ;;  %v711_v29 = vrot.slane %v710_v23, 4  ;;  %v3332_v32 = vld [vmem:[%s3826_s1 + $0x1b8] sm:$0xff]   ;;  %v741_v44 = vshll.u32 %v657_v38, 16  ;;  %v746_v45 = vshrl.u32 %v658_v39, 16  ;;  %v3334_v46 = vld [vmem:[%s3826_s1 + $0x1c0] sm:$0xff]  }
  0x4a   : > { %3110 = vmatprep.subr.bf16.mxu0 %v3320_v10  ;;  %3008 = vmatprep.mubr.bf16.mxu1 %v2576_v2  ;;  %v678_v47 = vrot.slane %v676_v40, 4  ;;  %v696_v61 = vor.u32 %v695_v53, %v692_v52  ;;  %v653_v2 = vld [vmem:[%s3460_s20 + $0x50] sm:$0x1]  ;;  %v3333_v40 = vld [vmem:[%s3826_s1 + $0xc0] sm:$0xff]   ;;  %v737_v53 = vrot.slane %v735_v43, 5 }
  0x4b   : > { %3104 = vmatprep.mubr.bf16.mxu0 %v2688_v36  ;;  %v1442_v51 = vsel %vm3534_vm2, %v1437_v42, %v1441_v24  ;;  %v713_v18 = vshll.u32 %v653_v2, 16  ;;  %v3329_v24 = vld [vmem:[%s3826_s1 + $0xb0] sm:$0xff]   ;;  %v732_v42 = vshrl.u32 %v656_v37, 16  ;;  %v743_v54 = vrot.slane %v741_v44, 5  ;;  %v2735_v37 = vld [vmem:[%s3460_s20 + $0x44] sm:$0xf] }
  0x4c   : > { %3015 = vmatpush3.bf16.msra.mxu1 %v3319_v62  ;;  %v682_v56 = vor.u32 %v681_v48, %v678_v47  ;;  %v2689_v60 = vcombine.low %v1442_v51, %v1456_v55  ;;  %v701_v62 = vrot.slane %v699_v49, 5  ;;  %v697_v7 = vrot.slane %v696_v61, 4  ;;  %v2703_v51 = vld [vmem:[%s3460_s20 + $0xc0] sm:$0xf]  ;;  %v661_v61 = vld [vmem:[%s3460_s20 + $0xd0] sm:$0x1] }
  0x4d   : > { %3111 = vmatpush3.bf16.msra.mxu0 %v3320_v10  ;;  %3016 = vmatprep.subr.bf16.mxu1 %v3321_v16  ;;  %v718_v10 = vshrl.u32 %v654_v4, 16  ;;  %v715_v27 = vrot.slane %v713_v18, 5  ;;  %v2723_v47 = vcombine.low %v3656_v33, %v2701_v34  ;;  %v749_v48 = vshll.u32 %v658_v39, 16  ;;  %v3339_v33 = vld [vmem:[%s3826_s1 + $0xd8] sm:$0xff]   ;;  %v3342_v43 = vld [vmem:[%s3826_s1 + $0x1e0] sm:$0xff]   ;;  %v3343_v44 = vld [vmem:[%s3826_s1 + $0xe8] sm:$0xff]  }
  0x4e   : > { %3112 = vmatprep.subr.bf16.mxu0 %v3322_v25  ;;  %v683_v1 = vrot.slane %v682_v56, 4  ;;  %v755_v49 = vshll.u32 %v659_v41, 16  ;;  %v734_v52 = vrot.slane %v732_v42, 4  ;;  %v748_v55 = vrot.slane %v746_v45, 4  ;;  %v660_v56 = vld [vmem:[%s3460_s20 + $0xc0] sm:$0xf] }
  0x4f   : > { %3009 = vmatmul.mubr.bf16.gmra.mrb[4].mxu1 %v2577_v31  ;;  %v720_v19 = vrot.slane %v718_v10, 4  ;;  %v3331_v31 = vld [vmem:[%s3826_s1 + $0xb8] sm:$0xff]   ;;  %v751_v58 = vrot.slane %v749_v48, 5  ;;  %v763_v2 = vshll.u32 %v660_v56, 16  ;;  %v769_v4 = vshll.u32 %v661_v61, 16  ;;  %v3341_v42 = vld [vmem:[%s3826_s1 + $0xe0] sm:$0xff]  }
  0x50   : > { %3017 = vmatpush3.bf16.msra.mxu1 %v3321_v16  ;;  %3105 = vmatmul.mubr.bf16.gmra.mrb[4].mxu0 %v2689_v60  ;;  %v688_v12 = vsel %vm3534_vm2, %v683_v1, %v687_v57  ;;  %v702_v16 = vsel %vm3534_vm2, %v697_v7, %v701_v62  ;;  %v662_v62 = vld [vmem:[%s3460_s20 + $0xe0] sm:$0xf]  ;;  %v760_v1 = vshrl.u32 %v660_v56, 16  ;;  %v785_v18 = vrot.slane %v783_v9, 5  ;;  %v3340_v39 = vld [vmem:[%s3826_s1 + $0x1d8] sm:$0xff]   ;;  %v3344_v45 = vld [vmem:[%s3826_s1 + $0x1e8] sm:$0xff]  }
  0x51   : > { %3113 = vmatpush3.bf16.msra.mxu0 %v3322_v25  ;;  %3018 = vmatprep.subr.bf16.mxu1 %v3323_v35  ;;  %v2602_v20 = vcombine.low %v688_v12, %v702_v16  ;;  %v724_v25 = vor.u32 %v723_v21, %v720_v19  ;;  %v774_v7 = vshrl.u32 %v662_v62, 16  ;;  %v777_v8 = vshll.u32 %v662_v62, 16  ;;  %v2704_v21 = vld [vmem:[%s3460_s20 + $0xe0] sm:$0xf]  ;;  %v3345_v48 = vld [vmem:[%s3826_s1 + $0xf0] sm:$0xff]  }
  0x52   : > { %3114 = vmatprep.subr.bf16.mxu0 %v3324_v50  ;;  %3124 = vmatprep.mubr.bf16.mxu0 %v2722_v63  ;;  %v738_v63 = vor.u32 %v737_v53, %v734_v52  ;;  %v765_v12 = vrot.slane %v763_v2, 5  ;;  %v771_v13 = vrot.slane %v769_v4, 5  ;;  %v2771_v2 = vld [vmem:[%s3460_s20 + $0x30] sm:$0x1] }
  0x53   : > { %3028 = vmatprep.mubr.bf16.mxu1 %v2602_v20  ;;  %v725_v30 = vrot.slane %v724_v25, 4  ;;  %v776_v16 = vrot.slane %v774_v7, 4  ;;  %v779_v17 = vrot.slane %v777_v8, 5  ;;  %v3337_v25 = vld [vmem:[%s3826_s1 + $0xd0] sm:$0xff]  }
  0x54   : > { %3019 = vmatpush3.bf16.msra.mxu1 %v3323_v35  ;;  %v716_v35 = vsel %vm3534_vm2, %v711_v29, %v715_v27  ;;  %v739_v10 = vrot.slane %v738_v63, 4  ;;  %v952_v63 = vld [vmem:[%s3460_s20 + $0x68] sm:$0xf]  ;;  %v2773_v8 = vld [vmem:[%s3460_s20 + $0x50] sm:$0x1] }
  0x55   : > { %3115 = vmatpush3.bf16.msra.mxu0 %v3324_v50  ;;  %3020 = vmatprep.subr.bf16.mxu1 %v3325_v59  ;;  %v730_v36 = vsel %vm3534_vm2, %v725_v30, %v729_v28  ;;  %v2702_v50 = vld [vmem:[%s3460_s20 + $0xa0] sm:$0xf]  ;;  %v780_v23 = vor.u32 %v779_v17, %v776_v16  ;;  %v3338_v28 = vld [vmem:[%s3826_s1 + $0x1d0] sm:$0xff]  }
  0x56   : > { %3116 = vmatprep.subr.bf16.mxu0 %v3326_v6  ;;  %v2603_v57 = vcombine.low %v716_v35, %v730_v36  ;;  %v2724_v60 = vcombine.low %v2702_v50, %v2703_v51  ;;  %v744_v19 = vsel %vm3534_vm2, %v739_v10, %v743_v54  ;;  %v2734_v36 = vld [vmem:[%s3460_s20 + $0x24] sm:$0xf]  ;;  %v3346_v50 = vld [vmem:[%s3826_s1 + $0x1f0] sm:$0xff]   ;;  %v2780_v51 = vld [vmem:[%s3460_s20 + $0xc0] sm:$0xf] }
  0x57   : > { %v781_v29 = vrot.slane %v780_v23, 4  ;;  %v2758_v41 = vcombine.low %v2734_v36, %v2735_v37  ;;  %v2087_v61 = vshrl.u32 %v2780_v51, 16  ;;  %v2090_v62 = vshll.u32 %v2780_v51, 16 }
  0x58   : > { %3021 = vmatpush3.bf16.msra.mxu1 %v3325_v59  ;;  %v757_v59 = vrot.slane %v755_v49, 5  ;;  %v2778_v49 = vld [vmem:[%s3460_s20 + $0xa0] sm:$0xf]  ;;  %v2026_v23 = vshll.u32 %v2771_v2, 16 }
  0x59   : > { %3117 = vmatpush3.bf16.msra.mxu0 %v3326_v6  ;;  %3022 = vmatprep.subr.bf16.mxu1 %v3327_v11  ;;  %v752_v6 = vor.u32 %v751_v58, %v748_v55  ;;  %v786_v34 = vsel %vm3534_vm2, %v781_v29, %v785_v18  ;;  %v2073_v56 = vshrl.u32 %v2778_v49, 16  ;;  %v3347_v58 = vld [vmem:[%s3826_s1 + $0xf8] sm:$0xff]   ;;  %v953_v18 = vld [vmem:[%s3460_s20 + $0x88] sm:$0xf] }
  0x5a   : > { %3118 = vmatprep.subr.bf16.mxu0 %v3328_v15 }
  0x5b   : > { %v2075_v9 = vrot.slane %v2073_v56, 4  ;;  %v2774_v56 = vld [vmem:[%s3460_s20 + $0x60] sm:$0xf] }
  0x5c   : > { %3023 = vmatpush3.bf16.msra.mxu1 %v3327_v11  ;;  %v762_v11 = vrot.slane %v760_v1, 4  ;;  %v2737_v1 = vld [vmem:[%s3460_s20 + $0x84] sm:$0xf] }
  0x5d   : > { %3119 = vmatpush3.bf16.msra.mxu0 %v3328_v15  ;;  %3024 = vmatprep.subr.bf16.mxu1 %v3329_v24  ;;  %v753_v15 = vrot.slane %v752_v6, 4  ;;  %v2759_v17 = vcombine.low %v2736_v0, %v2737_v1  ;;  %v2045_v0 = vshrl.u32 %v2774_v56, 16  ;;  %v2048_v1 = vshll.u32 %v2774_v56, 16 }
  0x5e   : > { %3120 = vmatprep.subr.bf16.mxu0 %v3330_v26  ;;  %v766_v20 = vor.u32 %v765_v12, %v762_v11  ;;  %v2089_v11 = vrot.slane %v2087_v61, 4  ;;  %v2092_v12 = vrot.slane %v2090_v62, 5 }
  0x5f   : > { %v758_v22 = vsel %vm3534_vm2, %v753_v15, %v757_v59  ;;  %v3348_v59 = vld [vmem:[%s3826_s1 + $0x1f8] sm:$0xff]   ;;  %v2781_v15 = vld [vmem:[%s3460_s20 + $0xd0] sm:$0x1] }
  0x60   : > { %3025 = vmatpush3.bf16.msra.mxu1 %v3329_v24  ;;  %v2705_v24 = vld [vmem:[%s3460_s20 + $0x100] sm:$0xf]  ;;  %v767_v27 = vrot.slane %v766_v20, 4  ;;  %v2738_v20 = vld [vmem:[%s3460_s20 + $0xa4] sm:$0xf]  ;;  %v2096_v29 = vshll.u32 %v2781_v15, 16 }
  0x61   : > { %3121 = vmatpush3.bf16.msra.mxu0 %v3330_v26  ;;  %3026 = vmatprep.subr.bf16.mxu1 %v3331_v31  ;;  %v2604_v26 = vcombine.low %v744_v19, %v758_v22  ;;  %v2725_v35 = vcombine.low %v2704_v21, %v2705_v24  ;;  %v954_v19 = vld [vmem:[%s3460_s20 + $0xa8] sm:$0xf]  ;;  %v2739_v21 = vld [vmem:[%s3460_s20 + $0xc4] sm:$0xf]  ;;  %v2785_v15 = vld [vmem:[%s3460_s20 + $0x110] sm:$0x1] }
  0x62   : > { %3122 = vmatprep.subr.bf16.mxu0 %v3332_v32  ;;  %v772_v30 = vsel %vm3534_vm2, %v767_v27, %v771_v13  ;;  %v3349_v13 = vld [vmem:[%s3826_s1 + $0x200] sm:$0xff]  }
  0x63   : > { %v2605_v38 = vcombine.low %v772_v30, %v786_v34  ;;  %v3350_v30 = vld [vmem:[%s3826_s1 + $0x208] sm:$0xff]  }
  0x64   : > { %3027 = vmatpush3.bf16.msra.mxu1 %v3331_v31  ;;  %v949_v31 = vld [vmem:[%s3460_s20 + $0x8] sm:$0xf] }
  0x65   : > { %3123 = vmatpush3.bf16.msra.mxu0 %v3332_v32  ;;  %3036 = vmatprep.subr.bf16.mxu1 %v3333_v40  ;;  %v950_v32 = vld [vmem:[%s3460_s20 + $0x28] sm:$0xf] }
  0x66   : > { %3132 = vmatprep.subr.bf16.mxu0 %v3334_v46 }
  0x67   : > { %3029 = vmatmul.mubr.bf16.vlgmr.msra.gmra.mrb[0].mxu1 %v2603_v57  ;;  %v2076_v57 = vshll.u32 %v2778_v49, 16 }
  0x68   : > { %3037 = vmatpush3.bf16.msra.mxu1 %v3333_v40  ;;  %3125 = vmatmul.mubr.bf16.vlgmr.msra.gmra.mrb[0].mxu0 %v2723_v47  ;;  %v2630_v40 = vcombine.low %v949_v31, %v950_v32  ;;  %v2772_v47 = vld [vmem:[%s3460_s20 + $0x40] sm:$0xf]  ;;  %v2632_v31 = vcombine.low %v953_v18, %v954_v19  ;;  %v2760_v32 = vcombine.low %v2738_v20, %v2739_v21  ;;  %v2124_v21 = vshll.u32 %v2785_v15, 16 }
  0x69   : > { %3133 = vmatpush3.bf16.msra.mxu0 %v3334_v46  ;;  %3038 = vmatprep.subr.bf16.mxu1 %v3335_v5  ;;  %v2770_v46 = vld [vmem:[%s3460_s20 + $0x20] sm:$0xf]  ;;  %v2031_v54 = vshrl.u32 %v2772_v47, 16  ;;  %v2034_v55 = vshll.u32 %v2772_v47, 16  ;;  %v2078_v10 = vrot.slane %v2076_v57, 5 }
  0x6a   : > { %3134 = vmatprep.subr.bf16.mxu0 %v3336_v14  ;;  %3128 = vmatprep.mubr.bf16.mxu0 %v2724_v60  ;;  %v2017_v52 = vshrl.u32 %v2770_v46, 16  ;;  %v2020_v53 = vshll.u32 %v2770_v46, 16  ;;  %v951_v60 = vld [vmem:[%s3460_s20 + $0x48] sm:$0xf]  ;;  %v2776_v57 = vld [vmem:[%s3460_s20 + $0x80] sm:$0xf] }
  0x6b   : > { %3032 = vmatprep.mubr.bf16.mxu1 %v2604_v26  ;;  %v2033_v6 = vrot.slane %v2031_v54, 4  ;;  %v2036_v7 = vrot.slane %v2034_v55, 5  ;;  %v2631_v16 = vcombine.low %v951_v60, %v952_v63  ;;  %v2079_v26 = vor.u32 %v2078_v10, %v2075_v9  ;;  %v2784_v54 = vld [vmem:[%s3460_s20 + $0x100] sm:$0xf] }
  0x6c   : > { %3039 = vmatpush3.bf16.msra.mxu1 %v3335_v5  ;;  %v2019_v4 = vrot.slane %v2017_v52, 4  ;;  %v2022_v5 = vrot.slane %v2020_v53, 5  ;;  %v3352_v52 = vld [vmem:[%s3826_s1 + $0x218] sm:$0xff]   ;;  %v2782_v53 = vld [vmem:[%s3460_s20 + $0xe0] sm:$0xf]  ;;  %v2115_v61 = vshrl.u32 %v2784_v54, 16 }
  0x6d   : > { %3135 = vmatpush3.bf16.msra.mxu0 %v3336_v14  ;;  %3040 = vmatprep.subr.bf16.mxu1 %v3337_v25  ;;  %v2779_v14 = vld [vmem:[%s3460_s20 + $0xb0] sm:$0x1]  ;;  %v2037_v24 = vor.u32 %v2036_v7, %v2033_v6  ;;  %v2104_v60 = vshll.u32 %v2782_v53, 16  ;;  %v2118_v62 = vshll.u32 %v2784_v54, 16  ;;  %v3353_v63 = vld [vmem:[%s3826_s1 + $0x220] sm:$0xff]   ;;  %v2059_v2 = vshrl.u32 %v2776_v57, 16 }
  0x6e   : > { %3136 = vmatprep.subr.bf16.mxu0 %v3338_v28  ;;  %v2023_v22 = vor.u32 %v2022_v5, %v2019_v4  ;;  %v2082_v27 = vshll.u32 %v2779_v14, 16  ;;  %v2062_v4 = vshll.u32 %v2776_v57, 16  ;;  %v3354_v5 = vld [vmem:[%s3826_s1 + $0x228] sm:$0xff]   ;;  %v2783_v6 = vld [vmem:[%s3460_s20 + $0xf0] sm:$0x1]  ;;  %v2117_v9 = vrot.slane %v2115_v61, 4 }
  0x6f   : > { %3033 = vmatmul.mubr.bf16.gmra.mrb[4].mxu1 %v2605_v38  ;;  %v2038_v36 = vrot.slane %v2037_v24, 4  ;;  %v956_v38 = vld [vmem:[%s3460_s20 + $0xe8] sm:$0xf]  ;;  %v2120_v10 = vrot.slane %v2118_v62, 5  ;;  %v2110_v19 = vshll.u32 %v2783_v6, 16 }
  0x70   : > { %3041 = vmatpush3.bf16.msra.mxu1 %v3337_v25  ;;  %3129 = vmatmul.mubr.bf16.gmra.mrb[4].mxu0 %v2725_v35  ;;  %v2040_v25 = vshll.u32 %v2773_v8, 16  ;;  %v2024_v34 = vrot.slane %v2023_v22, 4  ;;  %v2028_v35 = vrot.slane %v2026_v23, 5  ;;  %v2106_v8 = vrot.slane %v2104_v60, 5  ;;  %v3355_v22 = vld [vmem:[%s3826_s1 + $0x230] sm:$0xff]  }
  0x71   : > { %3137 = vmatpush3.bf16.msra.mxu0 %v3338_v28  ;;  %3042 = vmatprep.subr.bf16.mxu1 %v3339_v33  ;;  %v2093_v28 = vor.u32 %v2092_v12, %v2089_v11  ;;  %v2047_v11 = vrot.slane %v2045_v0, 4  ;;  %v2050_v12 = vrot.slane %v2048_v1, 5  ;;  %v2064_v14 = vrot.slane %v2062_v4, 5 }
  0x72   : > { %3138 = vmatprep.subr.bf16.mxu0 %v3340_v39  ;;  %3052 = vmatprep.mubr.bf16.mxu1 %v2630_v40  ;;  %v2042_v37 = vrot.slane %v2040_v25, 5  ;;  %v2084_v40 = vrot.slane %v2082_v27, 5  ;;  %v2029_v47 = vsel %vm3534_vm2, %v2024_v34, %v2028_v35  ;;  %v2121_v20 = vor.u32 %v2120_v10, %v2117_v9 }
  0x73   : > { %3148 = vmatprep.mubr.bf16.mxu0 %v2758_v41  ;;  %v2094_v41 = vrot.slane %v2093_v28, 4  ;;  %v2051_v23 = vor.u32 %v2050_v12, %v2047_v11  ;;  %v2112_v28 = vrot.slane %v2110_v19, 5 }
  0x74   : > { %3043 = vmatpush3.bf16.msra.mxu1 %v3339_v33  ;;  %v955_v33 = vld [vmem:[%s3460_s20 + $0xc8] sm:$0xf] }
  0x75   : > { %3139 = vmatpush3.bf16.msra.mxu0 %v3340_v39  ;;  %3044 = vmatprep.subr.bf16.mxu1 %v3341_v42  ;;  %v2080_v39 = vrot.slane %v2079_v26, 4  ;;  %v2633_v46 = vcombine.low %v955_v33, %v956_v38 }
  0x76   : > { %3140 = vmatprep.subr.bf16.mxu0 %v3342_v43 }
  0x78   : > { %3045 = vmatpush3.bf16.msra.mxu1 %v3341_v42  ;;  %v2098_v42 = vrot.slane %v2096_v29, 5  ;;  %v2122_v29 = vrot.slane %v2121_v20, 4 }
  0x79   : > { %3141 = vmatpush3.bf16.msra.mxu0 %v3342_v43  ;;  %3046 = vmatprep.subr.bf16.mxu1 %v3343_v44  ;;  %v2740_v43 = vld [vmem:[%s3460_s20 + $0xe4] sm:$0xf] }
  0x7a   : > { %3142 = vmatprep.subr.bf16.mxu0 %v3344_v45  ;;  %v2099_v51 = vsel %vm3534_vm2, %v2094_v41, %v2098_v42 }
  0x7c   : > { %3047 = vmatpush3.bf16.msra.mxu1 %v3343_v44  ;;  %v2741_v44 = vld [vmem:[%s3460_s20 + $0x104] sm:$0xf] }
  0x7d   : > { %3143 = vmatpush3.bf16.msra.mxu0 %v3344_v45  ;;  %3048 = vmatprep.subr.bf16.mxu1 %v3345_v48  ;;  %v3351_v45 = vld [vmem:[%s3826_s1 + $0x210] sm:$0xff]   ;;  %v2761_v49 = vcombine.low %v2740_v43, %v2741_v44 }
  0x7e   : > { %3144 = vmatprep.subr.bf16.mxu0 %v3346_v50 }
  0x80   : > { %3049 = vmatpush3.bf16.msra.mxu1 %v3345_v48  ;;  %v2043_v48 = vsel %vm3534_vm2, %v2038_v36, %v2042_v37 }
  0x81   : > { %3145 = vmatpush3.bf16.msra.mxu0 %v3346_v50  ;;  %3050 = vmatprep.subr.bf16.mxu1 %v3347_v58  ;;  %v2085_v50 = vsel %vm3534_vm2, %v2080_v39, %v2084_v40  ;;  %v2802_v55 = vcombine.low %v2029_v47, %v2043_v48 }
  0x82   : > { %3146 = vmatprep.subr.bf16.mxu0 %v3348_v59 }
  0x84   : > { %3051 = vmatpush3.bf16.msra.mxu1 %v3347_v58  ;;  %v2804_v58 = vcombine.low %v2085_v50, %v2099_v51 }
  0x85   : > { %3147 = vmatpush3.bf16.msra.mxu0 %v3348_v59  ;;  %3180 = vmatprep.subr.bf16.mxu1 %v3349_v13  ;;  %v2101_v59 = vshrl.u32 %v2782_v53, 16 }
  0x86   : > { %3156 = vmatprep.subr.bf16.mxu0 %v3349_v13 }
  0x87   : > { %3053 = vmatmul.mubr.bf16.vlgmr.msra.gmra.mrb[0].mxu1 %v2631_v16  ;;  %v2103_v7 = vrot.slane %v2101_v59, 4  ;;  %v2775_v16 = vld [vmem:[%s3460_s20 + $0x70] sm:$0x1] }
  0x88   : > { %3149 = vmatmul.mubr.bf16.vlgmr.msra.gmra.mrb[0].mxu0 %v2759_v17  ;;  %3188 = vmatpush3.bf16.msra.mxu1 %v3349_v13  ;;  %v2777_v17 = vld [vmem:[%s3460_s20 + $0x90] sm:$0x1]  ;;  %v2054_v24 = vshll.u32 %v2775_v16, 16 }
  0x89   : > { %3157 = vmatpush3.bf16.msra.mxu0 %v3349_v13  ;;  %3181 = vmatprep.subr.bf16.mxu1 %v3350_v30  ;;  %v2061_v13 = vrot.slane %v2059_v2, 4  ;;  %v2107_v18 = vor.u32 %v2106_v8, %v2103_v7  ;;  %v2068_v26 = vshll.u32 %v2777_v17, 16 }
  0x8a   : > { %3158 = vmatprep.subr.bf16.mxu0 %v3350_v30  ;;  %3056 = vmatprep.mubr.bf16.mxu1 %v2632_v31  ;;  %v3356_v31 = vld [vmem:[%s3826_s1 + $0x238] sm:$0xff]   ;;  %v2056_v33 = vrot.slane %v2054_v24, 5 }
  0x8b   : > { %3152 = vmatprep.mubr.bf16.mxu0 %v2760_v32  ;;  %v2065_v25 = vor.u32 %v2064_v14, %v2061_v13  ;;  %v2108_v27 = vrot.slane %v2107_v18, 4  ;;  %v2052_v32 = vrot.slane %v2051_v23, 4  ;;  %v2070_v35 = vrot.slane %v2068_v26, 5 }
  0x8c   : > { %3189 = vmatpush3.bf16.msra.mxu1 %v3350_v30 }
  0x8d   : > { %3159 = vmatpush3.bf16.msra.mxu0 %v3350_v30  ;;  %3182 = vmatprep.subr.bf16.mxu1 %v3351_v45  ;;  %v2126_v30 = vrot.slane %v2124_v21, 5  ;;  %v2066_v34 = vrot.slane %v2065_v25, 4  ;;  %v2113_v36 = vsel %vm3534_vm2, %v2108_v27, %v2112_v28  ;;  %v2057_v38 = vsel %vm3534_vm2, %v2052_v32, %v2056_v33 }
  0x8e   : > { %3160 = vmatprep.subr.bf16.mxu0 %v3351_v45 }
  0x8f   : > { %3057 = vmatmul.mubr.bf16.gmra.mrb[4].mxu1 %v2633_v46  ;;  %v2127_v37 = vsel %vm3534_vm2, %v2122_v29, %v2126_v30  ;;  %v2071_v39 = vsel %vm3534_vm2, %v2066_v34, %v2070_v35 }
  0x90   : > { %3153 = vmatmul.mubr.bf16.gmra.mrb[4].mxu0 %v2761_v49  ;;  %3190 = vmatpush3.bf16.msra.mxu1 %v3351_v45  ;;  %v2805_v40 = vcombine.low %v2113_v36, %v2127_v37  ;;  %v2803_v41 = vcombine.low %v2057_v38, %v2071_v39 }
  0x91   : > { %3161 = vmatpush3.bf16.msra.mxu0 %v3351_v45  ;;  %3183 = vmatprep.subr.bf16.mxu1 %v3352_v52 }
  0x92   : > { %3162 = vmatprep.subr.bf16.mxu0 %v3352_v52  ;;  %3172 = vmatprep.mubr.bf16.mxu0 %v2802_v55 }
  0x93   : > { %3176 = vmatprep.mubr.bf16.mxu1 %v2804_v58 }
  0x94   : > { %3191 = vmatpush3.bf16.msra.mxu1 %v3352_v52 }
  0x95   : > { %3163 = vmatpush3.bf16.msra.mxu0 %v3352_v52  ;;  %3184 = vmatprep.subr.bf16.mxu1 %v3353_v63 }
  0x96   : > { %3164 = vmatprep.subr.bf16.mxu0 %v3353_v63 }
  0x98   : > { %3192 = vmatpush3.bf16.msra.mxu1 %v3353_v63 }
  0x99   : > { %3165 = vmatpush3.bf16.msra.mxu0 %v3353_v63  ;;  %3185 = vmatprep.subr.bf16.mxu1 %v3354_v5 }
  0x9a   : > { %3166 = vmatprep.subr.bf16.mxu0 %v3354_v5 }
  0x9c   : > { %3193 = vmatpush3.bf16.msra.mxu1 %v3354_v5 }
  0x9d   : > { %3167 = vmatpush3.bf16.msra.mxu0 %v3354_v5  ;;  %3186 = vmatprep.subr.bf16.mxu1 %v3355_v22 }
  0x9e   : > { %3168 = vmatprep.subr.bf16.mxu0 %v3355_v22 }
  0xa0   : > { %3194 = vmatpush3.bf16.msra.mxu1 %v3355_v22 }
  0xa1   : > { %3169 = vmatpush3.bf16.msra.mxu0 %v3355_v22  ;;  %3187 = vmatprep.subr.bf16.mxu1 %v3356_v31 }
  0xa2   : > { %3170 = vmatprep.subr.bf16.mxu0 %v3356_v31 }
  0xa4   : > { %3195 = vmatpush3.bf16.msra.mxu1 %v3356_v31 }
  0xa5   : > { %3171 = vmatpush3.bf16.msra.mxu0 %v3356_v31 }
  0xa7   : > { %3177 = vmatmul.mubr.bf16.vlgmr.msra.gmra.mrb[8].mxu1 %v2805_v40 }
  0xa8   : > { %3173 = vmatmul.mubr.bf16.vlgmr.msra.gmra.mrb[0].mxu0 %v2803_v41 }
 0x15a   : > { %v3054_v42 = vpop.f32.mrb[0].mxu1 }
 0x15b   : > { %v1088_v43 = vpop.f32.mrb[1].mxu1 }
 0x15c   : > { %v3055_v44 = vpop.f32.mrb[2].mxu1 }
 0x15d   : > { %v1091_v45 = vpop.f32.mrb[3].mxu1 }
 0x162   : > { %v3058_v46 = vpop.f32.mrb[4].mxu1 }
 0x163   : > { %v3154_v47 = vpop.f32.mrb[4].mxu0  ;;  %v1104_v48 = vpop.f32.mrb[5].mxu1 }
 0x164   : > { %v3200_v49 = vadd.f32 %v3154_v47, %v3058_v46  ;;  %v1961_v50 = vpop.f32.mrb[5].mxu0  ;;  %v3059_v51 = vpop.f32.mrb[6].mxu1 }
 0x165   : > { %v3202_v3 = vadd.f32 %v1961_v50, %v1104_v48  ;;  %v3155_v52 = vpop.f32.mrb[6].mxu0  ;;  %v1107_v53 = vpop.f32.mrb[7].mxu1 }
 0x166   : > { %v3204_v54 = vadd.f32 %v3155_v52, %v3059_v51  ;;  %v1964_v55 = vpop.f32.mrb[7].mxu0 }
 0x167   : > { %v3206_v56 = vadd.f32 %v1964_v55, %v1107_v53 }
 0x17a   : > { %v3178_v57 = vpop.f32.mrb[8].mxu1 }
 0x17b   : > { %v3174_v58 = vpop.f32.mrb[0].mxu0  ;;  %v3201_v59 = vadd.f32 %v3200_v49, %v3178_v57  ;;  %v2259_v60 = vpop.f32.mrb[9].mxu1 }
 0x17c   : > { %v3196_v61 = vadd.f32 %v3174_v58, %v3054_v42  ;;  %v2243_v62 = vpop.f32.mrb[1].mxu0  ;;  %v3203_v63 = vadd.f32 %v3202_v3, %v2259_v60  ;;  %v3179_v0 = vpop.f32.mrb[10].mxu1 }
 0x17d   : > { %v3197_v1 = vadd.f32 %v2243_v62, %v1088_v43  ;;  %v3175_v2 = vpop.f32.mrb[2].mxu0  ;;  %v3205_v4 = vadd.f32 %v3204_v54, %v3179_v0  ;;  %v2262_v5 = vpop.f32.mrb[11].mxu1  ;;  %v2358_v29 = vmul.f32 %v3201_v59, %v3201_v59 }
 0x17e   : > { %v3198_v6 = vadd.f32 %v3175_v2, %v3055_v44  ;;  %v2246_v7 = vpop.f32.mrb[3].mxu0  ;;  %v3207_v8 = vadd.f32 %v3206_v56, %v2262_v5  ;;  %v2354_v17 = vmul.f32 %v3196_v61, %v3196_v61  ;;  %v2356_v23 = vmul.f32 %v3203_v63, %v3203_v63 }
 0x17f   : > { %v2851_v9 = vpack.c.bf16 %v3205_v4, %v3201_v59  ;;  %v3199_v10 = vadd.f32 %v2246_v7, %v1091_v45  ;;  %v2352_v13 = vmul.f32 %v3197_v1, %v3197_v1  ;;  %v2359_v32 = vmul.f32 %v3205_v4, %v3205_v4 }
 0x180   : > { %v2841_v11 = vpack.c.bf16 %v3198_v6, %v3196_v61  ;;  %v2846_v12 = vpack.c.bf16 %v3207_v8, %v3203_v63  ;;  %v2355_v20 = vmul.f32 %v3198_v6, %v3198_v6  ;;  %v2357_v27 = vmul.f32 %v3207_v8, %v3207_v8 }
 0x181   : > { %2855 = vst [vmem:[%s255_s21 + $0x18] sm:$0xff] %v2851_v9   ;;  %v2836_v14 = vpack.c.bf16 %v3199_v10, %v3197_v1  ;;  %v2338_v15 = vadd.f32 %v3199_v10, %v3197_v1  ;;  %v2353_v16 = vmul.f32 %v3199_v10, %v3199_v10 }
 0x182   : > { %2853 = vst [vmem:[%s255_s21 + $0x8] sm:$0xff] %v2841_v11   ;;  %2854 = vst [vmem:[%s255_s21 + $0x10] sm:$0xff] %v2846_v12  }
 0x183   : > { %2837 = vst [vmem:[%s255_s21] sm:$0xff] %v2836_v14   ;;  %v2339_v18 = vadd.f32 %v3196_v61, %v2338_v15  ;;  %v2360_v19 = vadd.f32 %v2353_v16, %v2352_v13 }
 0x185   : > { %v2361_v21 = vadd.f32 %v2360_v19, %v2354_v17  ;;  %v2340_v22 = vadd.f32 %v3198_v6, %v2339_v18 }
 0x187   : > { %v2341_v24 = vadd.f32 %v3203_v63, %v2340_v22  ;;  %v2362_v25 = vadd.f32 %v2361_v21, %v2355_v20 }
 0x189   : > { %v2342_v26 = vadd.f32 %v3207_v8, %v2341_v24  ;;  %v2363_v28 = vadd.f32 %v2362_v25, %v2356_v23 }
 0x18b   : > { %v2343_v30 = vadd.f32 %v3201_v59, %v2342_v26  ;;  %v2364_v31 = vadd.f32 %v2363_v28, %v2357_v27 }
 0x18d   : > { %v2344_v33 = vadd.f32 %v3205_v4, %v2343_v30  ;;  %v2365_v34 = vadd.f32 %v2364_v31, %v2358_v29 }
 0x18f   : > { %v2345_v35 = vrot.slane %v2344_v33, 4  ;;  %v2366_v36 = vadd.f32 %v2365_v34, %v2359_v32 }
 0x191   : > { %v2346_v37 = vadd.f32 %v2345_v35, %v2344_v33  ;;  %v2367_v38 = vrot.slane %v2366_v36, 4 }
 0x193   : > { %v2347_v39 = vrot.slane %v2346_v37, 2  ;;  %v2368_v40 = vadd.f32 %v2367_v38, %v2366_v36 }
 0x195   : > { %v2348_v41 = vadd.f32 %v2347_v39, %v2346_v37  ;;  %v2369_v42 = vrot.slane %v2368_v40, 2 }
 0x197   : > { %v2349_v43 = vrot.slane %v2348_v41, 1  ;;  %v2370_v44 = vadd.f32 %v2369_v42, %v2368_v40 }
 0x199   : > { %v2350_v45 = vadd.f32 %v2349_v43, %v2348_v41  ;;  %v2371_v46 = vrot.slane %v2370_v44, 1 }
 0x19b   : > { %2351 = vst [vmem:[%s261_s24] sm:$0x1] %v2350_v45  ;;  %v2372_v47 = vadd.f32 %v2371_v46, %v2370_v44 }
 0x19d   : > { %2373 = vst [vmem:[%s267_s27] sm:$0x1] %v2372_v47 }
 0x19e PF: > { %s15_s17 = sadd.s32 1, %s3379_s17   ;;  %s3832_s15 = smov %s3375_s16 }
 0x19f   : > { %p12_p5 = scmp.ge.s32.totalorder %s15_s17, 4   ;;  %s3833_s16 = smov %s3835_s18 }
 0x1a1   :  { %14 = sbr.rel (!%p12_p5) target bundleno = 2 (0x2), region = 94 }

// kernel: model_forward.13
= control target key start
LH: loop header
LB: loop body
LE: loop exit
PB: predicated region body
PF: predicated region fallthrough
CT: control target
= control target key end

     0   :  { %s3638_s15 = smov 0   ;;  %s3640_s16 = smov 0   ;;  %s4117_s0 = inlined_call_operand.vmem [shape: bf16[2,10,10,128], index: 0, kind: input, shape index: {}]   ;;  %s4118_s1 = inlined_call_operand.vmem [shape: bf16[9,128,128], index: 1, kind: input, shape index: {}]   ;;  %s4119_s2 = inlined_call_operand.vmem [shape: bf16[2,64,128], index: 2, kind: output, shape index: {0}]   ;;  %s4120_s3 = inlined_call_operand.vmem [shape: f32[2,1,128], index: 3, kind: output, shape index: {1}]   ;;  %s4121_s4 = inlined_call_operand.vmem [shape: f32[2,1,128], index: 4, kind: output, shape index: {2}]  }
   0x1   :  { %s3642_s17 = smov 0  }
   0x2 LB: > { %s24_s18 = sadd.s32 1, %s3607_s16  ;;  %p2690_p0 = scmp.ge.s32.totalorder %s3611_s17, 1  ;;  %s3611_s17 = sphi %s3642_s17, %s15_s17   ;;  %s3607_s16 = sphi %s3640_s16, %s4127_s16   ;;  %s3603_s15 = sphi %s3638_s15, %s4126_s15  }
   0x3   : > { %p25_p1 = scmp.ge.s32.totalorder %s24_s18, 2  ;;  %p194_p2 = scmp.lt.s32.totalorder %s3611_s17, 3 }
   0x5   : > { %s4129_s18 = smov (%p25_p1, %s24_s18), 0  ;;  %p195_p3 = pnand %p2690_p0, %p194_p2 }
   0x6   : > { %v3505_v0 = vld [vmem:[%s4118_s1] sm:$0xff] (!%p195_p3)   ;;  %v3507_v2 = vld [vmem:[%s4118_s1 + $0x8] sm:$0xff] (!%p195_p3)   ;;  %p239_p4 = scmp.lt.s32.totalorder (!%p195_p3), %s3603_s15, 1  ;;  %v3509_v4 = vld [vmem:[%s4118_s1 + $0x10] sm:$0xff] (!%p195_p3)   ;;  %vm486_vm0 = vsmask.f32 (!%p195_p3), 3328 }
   0x7   : > { %198 = sbr.rel (%p195_p3) target bundleno = 414 (0x19e), region = 28  ;;  %v3506_v1 = vld [vmem:[%s4118_s1 + $0x100] sm:$0xff] (!%p195_p3)   ;;  %3184 = vmatprep.subr.bf16.mxu1 (!%p195_p3), %v3505_v0  ;;  %v3508_v3 = vld [vmem:[%s4118_s1 + $0x108] sm:$0xff] (!%p195_p3)   ;;  %v3510_v5 = vld [vmem:[%s4118_s1 + $0x110] sm:$0xff] (!%p195_p3)   ;;  %vm487_vm1 = vsmask.f32 (!%p195_p3), 7440 }
   0x8   : > { %3280 = vmatprep.subr.bf16.mxu0 (!%p195_p3), %v3506_v1  ;;  %3185 = vmatpush3.bf16.msra.mxu1 (!%p195_p3), %v3505_v0  ;;  %v3511_v6 = vld [vmem:[%s4118_s1 + $0x18] sm:$0xff] (!%p195_p3)   ;;  %v3513_v8 = vld [vmem:[%s4118_s1 + $0x20] sm:$0xff] (!%p195_p3)   ;;  %v3515_v10 = vld [vmem:[%s4118_s1 + $0x28] sm:$0xff] (!%p195_p3)   ;;  %vm803_vm3 = vcmask (!%p195_p3), 1042432   ;;  %vm804_vm4 = vcmask (!%p195_p3), 1046532  }
   0x9   : > { %3281 = vmatpush3.bf16.msra.mxu0 (!%p195_p3), %v3506_v1  ;;  %3186 = vmatprep.subr.bf16.mxu1 (!%p195_p3), %v3507_v2  ;;  %v3512_v7 = vld [vmem:[%s4118_s1 + $0x118] sm:$0xff] (!%p195_p3)   ;;  %v3514_v9 = vld [vmem:[%s4118_s1 + $0x120] sm:$0xff] (!%p195_p3)   ;;  %v3516_v12 = vld [vmem:[%s4118_s1 + $0x128] sm:$0xff] (!%p195_p3)  }
   0xa   : > { %3282 = vmatprep.subr.bf16.mxu0 (!%p195_p3), %v3508_v3  ;;  %v3517_v18 = vld [vmem:[%s4118_s1 + $0x30] sm:$0xff] (!%p195_p3)   ;;  %v3519_v27 = vld [vmem:[%s4118_s1 + $0x38] sm:$0xff] (!%p195_p3)   ;;  %vm3719_vm2 = vmor (!%p195_p3), %vm486_vm0, %vm487_vm1 }
   0xb   : > { %v3518_v23 = vld [vmem:[%s4118_s1 + $0x130] sm:$0xff] (!%p195_p3)   ;;  %v3520_v30 = vld [vmem:[%s4118_s1 + $0x138] sm:$0xff] (!%p195_p3)   ;;  %v3522_v46 = vld [vmem:[%s4118_s1 + $0x40] sm:$0xff] (!%p195_p3)  }
   0xc   : > { %3187 = vmatpush3.bf16.msra.mxu1 (!%p195_p3), %v3507_v2  ;;  %v3523_v52 = vld [vmem:[%s4118_s1 + $0x140] sm:$0xff] (!%p195_p3)   ;;  %v3525_v63 = vld [vmem:[%s4118_s1 + $0x48] sm:$0xff] (!%p195_p3)   ;;  %vm3806_vm5 = vmor (!%p195_p3), %vm803_vm3, %vm804_vm4 }
   0xd   : > { %3283 = vmatpush3.bf16.msra.mxu0 (!%p195_p3), %v3508_v3  ;;  %3188 = vmatprep.subr.bf16.mxu1 (!%p195_p3), %v3509_v4  ;;  %v3526_v3 = vld [vmem:[%s4118_s1 + $0x148] sm:$0xff] (!%p195_p3)  }
   0xe   : > { %s4131_s15 = smov (!%p239_p4, %s3603_s15), 1  ;;  %3284 = vmatprep.subr.bf16.mxu0 %v3510_v5 }
   0xf   : > { %s3480_s9 = smul.u32 80, %s4131_s15  ;;  %s261_s24 = scalar_lea.vmem %s4120_s3, %s4131_s15 }
  0x10   : > { %3189 = vmatpush3.bf16.msra.mxu1 %v3509_v4  ;;  %s267_s27 = scalar_lea.vmem %s4121_s4, %s4131_s15 }
  0x11   : > { %3285 = vmatpush3.bf16.msra.mxu0 %v3510_v5  ;;  %3190 = vmatprep.subr.bf16.mxu1 %v3511_v6  ;;  %s3695_s22 = scalar_lea.vmem %s4117_s0, %s3480_s9  ;;  %v3527_v5 = vld [vmem:[%s4118_s1 + $0x50] sm:$0xff]  }
  0x12   : > { %3286 = vmatprep.subr.bf16.mxu0 %v3512_v7  ;;  %v3521_v11 = vld [vmem:[%s3695_s22] ss:$8 sps:$4 sm:$0xff]   ;;  %v2807_v14 = vld [vmem:[%s3695_s22 + $0xc] sm:$0x1]  ;;  %v2808_v15 = vld [vmem:[%s3695_s22 + $0x10] sm:$0xf] }
  0x13   : > { %3200 = vmatprep.mubr.bf16.mxu1 %v3521_v11  ;;  %v2806_v13 = vld [vmem:[%s3695_s22 + $0x8] sm:$0xf]  ;;  %v2809_v19 = vld [vmem:[%s3695_s22 + $0x14] sm:$0x1]  ;;  %v1221_v20 = vshll.u32 %v2807_v14, 16  ;;  %v1226_v21 = vshrl.u32 %v2808_v15, 16 }
  0x14   : > { %3191 = vmatpush3.bf16.msra.mxu1 %v3511_v6  ;;  %v1212_v16 = vshrl.u32 %v2806_v13, 16  ;;  %v1215_v17 = vshll.u32 %v2806_v13, 16  ;;  %v1229_v22 = vshll.u32 %v2808_v15, 16  ;;  %v1235_v26 = vshll.u32 %v2809_v19, 16  ;;  %v2810_v36 = vld [vmem:[%s3695_s22 + $0x18] sm:$0xf] }
  0x15   : > { %3287 = vmatpush3.bf16.msra.mxu0 %v3512_v7  ;;  %3192 = vmatprep.subr.bf16.mxu1 %v3513_v8  ;;  %v1228_v28 = vrot.slane %v1226_v21, 4  ;;  %v1223_v32 = vrot.slane %v1221_v20, 5  ;;  %v2811_v37 = vld [vmem:[%s3695_s22 + $0x1c] sm:$0x1]  ;;  %v2812_v39 = vld [vmem:[%s3695_s22 + $0x20] sm:$0xf] }
  0x16   : > { %3288 = vmatprep.subr.bf16.mxu0 %v3514_v9  ;;  %v1214_v24 = vrot.slane %v1212_v16, 4  ;;  %v1217_v25 = vrot.slane %v1215_v17, 5  ;;  %v1231_v29 = vrot.slane %v1229_v22, 5  ;;  %v1237_v35 = vrot.slane %v1235_v26, 5  ;;  %v2813_v40 = vld [vmem:[%s3695_s22 + $0x24] sm:$0x1] }
  0x17   : > { %v1240_v41 = vshrl.u32 %v2810_v36, 16  ;;  %v1243_v43 = vshll.u32 %v2810_v36, 16  ;;  %v1249_v44 = vshll.u32 %v2811_v37, 16  ;;  %v1254_v45 = vshrl.u32 %v2812_v39, 16  ;;  %v3524_v53 = vld [vmem:[%s3695_s22 + $0x10] ss:$8 sps:$4 sm:$0xff]  }
  0x18   : > { %3193 = vmatpush3.bf16.msra.mxu1 %v3513_v8  ;;  %v1218_v31 = vor.u32 %v1217_v25, %v1214_v24  ;;  %v1232_v34 = vor.u32 %v1231_v29, %v1228_v28  ;;  %v1257_v49 = vshll.u32 %v2812_v39, 16  ;;  %v1263_v50 = vshll.u32 %v2813_v40, 16  ;;  %v3535_v6 = vld [vmem:[%s3695_s22 + $0x20] ss:$8 sps:$4 sm:$0xff]   ;;  %v3528_v7 = vld [vmem:[%s4118_s1 + $0x150] sm:$0xff]   ;;  %v3529_v8 = vld [vmem:[%s4118_s1 + $0x58] sm:$0xff]  }
  0x19   : > { %3289 = vmatpush3.bf16.msra.mxu0 %v3514_v9  ;;  %3194 = vmatprep.subr.bf16.mxu1 %v3515_v10  ;;  %v1242_v48 = vrot.slane %v1240_v41, 4  ;;  %v1245_v54 = vrot.slane %v1243_v43, 5  ;;  %v1251_v55 = vrot.slane %v1249_v44, 5  ;;  %v1256_v56 = vrot.slane %v1254_v45, 4  ;;  %v2814_v9 = vld [vmem:[%s3695_s22 + $0x28] sm:$0xf] }
  0x1a   : > { %3290 = vmatprep.subr.bf16.mxu0 %v3516_v12  ;;  %v1219_v38 = vrot.slane %v1218_v31, 4  ;;  %v1233_v42 = vrot.slane %v1232_v34, 4  ;;  %v1259_v58 = vrot.slane %v1257_v49, 5  ;;  %v1265_v59 = vrot.slane %v1263_v50, 5  ;;  %v2816_v11 = vld [vmem:[%s3695_s22 + $0x30] sm:$0xf] }
  0x1b   : > { %v1246_v60 = vor.u32 %v1245_v54, %v1242_v48  ;;  %v1268_v13 = vshrl.u32 %v2814_v9, 16  ;;  %v1271_v14 = vshll.u32 %v2814_v9, 16  ;;  %v1282_v16 = vshrl.u32 %v2816_v11, 16  ;;  %v3530_v19 = vld [vmem:[%s4118_s1 + $0x158] sm:$0xff]   ;;  %v3531_v20 = vld [vmem:[%s4118_s1 + $0x60] sm:$0xff]  }
  0x1c   : > { %3195 = vmatpush3.bf16.msra.mxu1 %v3515_v10  ;;  %v1224_v47 = vsel %vm3719_vm2, %v1219_v38, %v1223_v32  ;;  %v1238_v51 = vsel %vm3719_vm2, %v1233_v42, %v1237_v35  ;;  %v1260_v61 = vor.u32 %v1259_v58, %v1256_v56  ;;  %v2815_v10 = vld [vmem:[%s3695_s22 + $0x2c] sm:$0x1]  ;;  %v1285_v17 = vshll.u32 %v2816_v11, 16  ;;  %v2818_v29 = vld [vmem:[%s3695_s22 + $0x38] sm:$0xf]  ;;  %v3532_v38 = vld [vmem:[%s4118_s1 + $0x160] sm:$0xff]  }
  0x1d   : > { %3291 = vmatpush3.bf16.msra.mxu0 %v3516_v12  ;;  %3196 = vmatprep.subr.bf16.mxu1 %v3517_v18  ;;  %v2838_v57 = vcombine.low %v1224_v47, %v1238_v51  ;;  %v1247_v62 = vrot.slane %v1246_v60, 4  ;;  %v2817_v12 = vld [vmem:[%s3695_s22 + $0x34] sm:$0x1]  ;;  %v1277_v15 = vshll.u32 %v2815_v10, 16  ;;  %v1270_v21 = vrot.slane %v1268_v13, 4  ;;  %v3533_v47 = vld [vmem:[%s4118_s1 + $0x68] sm:$0xff]  }
  0x1e   : > { %3292 = vmatprep.subr.bf16.mxu0 %v3518_v23  ;;  %v1261_v0 = vrot.slane %v1260_v61, 4  ;;  %v1273_v22 = vrot.slane %v1271_v14, 5  ;;  %v1284_v24 = vrot.slane %v1282_v16, 4  ;;  %v1287_v25 = vrot.slane %v1285_v17, 5  ;;  %v2820_v31 = vld [vmem:[%s3695_s22 + $0x40] sm:$0xf] }
  0x1f   : > { %3296 = vmatprep.mubr.bf16.mxu0 %v2838_v57  ;;  %v1252_v1 = vsel %vm3719_vm2, %v1247_v62, %v1251_v55  ;;  %v2821_v34 = vld [vmem:[%s3695_s22 + $0x44] sm:$0x1]  ;;  %v1296_v35 = vshrl.u32 %v2818_v29, 16  ;;  %v1299_v36 = vshll.u32 %v2818_v29, 16  ;;  %v1310_v40 = vshrl.u32 %v2820_v31, 16  ;;  %v3534_v56 = vld [vmem:[%s4118_s1 + $0x168] sm:$0xff]  }
  0x20   : > { %3197 = vmatpush3.bf16.msra.mxu1 %v3517_v18  ;;  %v1266_v2 = vsel %vm3719_vm2, %v1261_v0, %v1265_v59  ;;  %v1291_v18 = vshll.u32 %v2817_v12, 16  ;;  %v1274_v28 = vor.u32 %v1273_v22, %v1270_v21  ;;  %v1288_v32 = vor.u32 %v1287_v25, %v1284_v24  ;;  %v462_v54 = vld [vmem:[%s3695_s22] sm:$0xf]  ;;  %v463_v55 = vld [vmem:[%s3695_s22 + $0x4] sm:$0x1]  ;;  %v3536_v57 = vld [vmem:[%s4118_s1 + $0x70] sm:$0xff]  }
  0x21   : > { %3293 = vmatpush3.bf16.msra.mxu0 %v3518_v23  ;;  %3198 = vmatprep.subr.bf16.mxu1 %v3519_v27  ;;  %v2839_v4 = vcombine.low %v1252_v1, %v1266_v2  ;;  %v1279_v23 = vrot.slane %v1277_v15, 5  ;;  %v1313_v41 = vshll.u32 %v2820_v31, 16  ;;  %v1319_v42 = vshll.u32 %v2821_v34, 16  ;;  %v464_v60 = vld [vmem:[%s3695_s22 + $0x8] sm:$0xf]  ;;  %v3537_v13 = vld [vmem:[%s4118_s1 + $0x170] sm:$0xff]  }
  0x22   : > { %3294 = vmatprep.subr.bf16.mxu0 %v3520_v30  ;;  %v1293_v26 = vrot.slane %v1291_v18, 5  ;;  %v1275_v39 = vrot.slane %v1274_v28, 4  ;;  %v1289_v43 = vrot.slane %v1288_v32, 4  ;;  %v1298_v44 = vrot.slane %v1296_v35, 4  ;;  %v465_v61 = vld [vmem:[%s3695_s22 + $0xc] sm:$0x1] }
  0x23   : > { %v1301_v45 = vrot.slane %v1299_v36, 5  ;;  %v1312_v49 = vrot.slane %v1310_v40, 4  ;;  %v1315_v50 = vrot.slane %v1313_v41, 5  ;;  %v1321_v51 = vrot.slane %v1319_v42, 5  ;;  %v2850_v12 = vld [vmem:[%s3695_s22 + $0x8] sm:$0xe] }
  0x24   : > { %3199 = vmatpush3.bf16.msra.mxu1 %v3519_v27  ;;  %v3538_v27 = vld [vmem:[%s3695_s22 + $0x30] ss:$8 sps:$4 sm:$0xff]   ;;  %v1280_v48 = vsel %vm3719_vm2, %v1275_v39, %v1279_v23  ;;  %v490_v62 = vshrl.u32 %v462_v54, 16  ;;  %v499_v1 = vshll.u32 %v463_v55, 16  ;;  %v504_v2 = vshrl.u32 %v464_v60, 16 }
  0x25   : > { %3295 = vmatpush3.bf16.msra.mxu0 %v3520_v30  ;;  %3208 = vmatprep.subr.bf16.mxu1 %v3522_v46  ;;  %v2819_v30 = vld [vmem:[%s3695_s22 + $0x3c] sm:$0x1]  ;;  %v1316_v59 = vor.u32 %v1315_v50, %v1312_v49  ;;  %v2866_v21 = vrot.slane %v2850_v12, 9  ;;  %v2853_v24 = vld [vmem:[%s3695_s22 + $0x14] sm:$0x1]  ;;  %v3541_v50 = vld [vmem:[%s4118_s1 + $0x80] sm:$0xff]  }
  0x26   : > { %3304 = vmatprep.subr.bf16.mxu0 %v3523_v52  ;;  %v1305_v37 = vshll.u32 %v2819_v30, 16  ;;  %v501_v9 = vrot.slane %v499_v1, 5  ;;  %v506_v10 = vrot.slane %v504_v2, 4  ;;  %v3539_v15 = vld [vmem:[%s4118_s1 + $0x78] sm:$0xff]   ;;  %v1531_v28 = vrot.slane %v2853_v24, 5  ;;  %v3545_v12 = vld [vmem:[%s4118_s1 + $0x90] sm:$0xff]  }
  0x27   : > { %3201 = vmatmul.mubr.bf16.vlgmr.msra.gmra.mrb[0].mxu1 %v3524_v53  ;;  %v1302_v53 = vor.u32 %v1301_v45, %v1298_v44  ;;  %v466_v29 = vld [vmem:[%s3695_s22 + $0x10] sm:$0xf]  ;;  %v467_v32 = vld [vmem:[%s3695_s22 + $0x14] sm:$0x1]  ;;  %v468_v34 = vld [vmem:[%s3695_s22 + $0x18] sm:$0xf] }
  0x28   : > { %3209 = vmatpush3.bf16.msra.mxu1 %v3522_v46  ;;  %3297 = vmatmul.mubr.bf16.vlgmr.msra.gmra.mrb[0].mxu0 %v2839_v4  ;;  %v1307_v46 = vrot.slane %v1305_v37, 5  ;;  %v1317_v4 = vrot.slane %v1316_v59, 4  ;;  %v518_v35 = vshrl.u32 %v466_v29, 16  ;;  %v3540_v36 = vld [vmem:[%s4118_s1 + $0x178] sm:$0xff]   ;;  %v521_v40 = vshll.u32 %v466_v29, 16 }
  0x29   : > { %3210 = vmatprep.subr.bf16.mxu1 %v3525_v63  ;;  %3305 = vmatpush3.bf16.msra.mxu0 %v3523_v52  ;;  %v1294_v52 = vsel %vm3719_vm2, %v1289_v43, %v1293_v26  ;;  %v1303_v0 = vrot.slane %v1302_v53, 4  ;;  %v469_v39 = vld [vmem:[%s3695_s22 + $0x1c] sm:$0x1]  ;;  %v527_v41 = vshll.u32 %v467_v32, 16  ;;  %v2854_v42 = vld [vmem:[%s3695_s22 + $0x18] sm:$0xe] }
  0x2a   : > { %3306 = vmatprep.subr.bf16.mxu0 %v3526_v3  ;;  %3204 = vmatprep.mubr.bf16.mxu1 %v3535_v6  ;;  %v2840_v58 = vcombine.low %v1280_v48, %v1294_v52  ;;  %v1322_v14 = vsel %vm3719_vm2, %v1317_v4, %v1321_v51  ;;  %v520_v45 = vrot.slane %v518_v35, 4  ;;  %v2856_v48 = vld [vmem:[%s3695_s22 + $0x20] sm:$0xe]  ;;  %v523_v51 = vrot.slane %v521_v40, 5  ;;  %v2858_v29 = vld [vmem:[%s3695_s22 + $0x28] sm:$0xe] }
  0x2b   : > { %v529_v52 = vrot.slane %v527_v41, 5  ;;  %v535_v53 = vshll.u32 %v468_v34, 16  ;;  %v2859_v32 = vld [vmem:[%s3695_s22 + $0x2c] sm:$0x1]  ;;  %v3547_v35 = vld [vmem:[%s4118_s1 + $0x98] sm:$0xff]  }
  0x2c   : > { %3211 = vmatpush3.bf16.msra.mxu1 %v3525_v63  ;;  %v493_v63 = vshll.u32 %v462_v54, 16  ;;  %3300 = vmatprep.mubr.bf16.mxu0 %v2840_v58  ;;  %v2857_v54 = vld [vmem:[%s3695_s22 + $0x24] sm:$0x1]  ;;  %v524_v59 = vor.u32 %v523_v51, %v520_v45  ;;  %v2993_v33 = vld [vmem:[%s3695_s22 + $0x3c] sm:$0x1] }
  0x2d   : > { %3212 = vmatprep.subr.bf16.mxu1 %v3527_v5  ;;  %3307 = vmatpush3.bf16.msra.mxu0 %v3526_v3  ;;  %v507_v3 = vshll.u32 %v464_v60, 16  ;;  %v537_v60 = vrot.slane %v535_v53, 5  ;;  %v3550_v45 = vld [vmem:[%s4118_s1 + $0x1a0] sm:$0xff]   ;;  %v477_v53 = vld [vmem:[%s3695_s22 + $0x3c] sm:$0x1] }
  0x2e   : > { %3308 = vmatprep.subr.bf16.mxu0 %v3528_v7  ;;  %v495_v6 = vrot.slane %v493_v63, 5  ;;  %v3542_v63 = vld [vmem:[%s4118_s1 + $0x180] sm:$0xff]   ;;  %v525_v1 = vrot.slane %v524_v59, 4  ;;  %v2862_v59 = vld [vmem:[%s3695_s22 + $0x38] sm:$0xe] }
  0x2f   : > { %3205 = vmatmul.mubr.bf16.gmra.mrb[4].mxu1 %v3538_v27  ;;  %v509_v11 = vrot.slane %v507_v3, 5 }
  0x30   : > { %3213 = vmatpush3.bf16.msra.mxu1 %v3527_v5  ;;  %v492_v5 = vrot.slane %v490_v62, 4  ;;  %v1539_v62 = vrot.slane %v2857_v54, 5 }
  0x31   : > { %3214 = vmatprep.subr.bf16.mxu1 %v3529_v8  ;;  %3309 = vmatpush3.bf16.msra.mxu0 %v3528_v7  ;;  %v513_v7 = vshll.u32 %v465_v61, 16  ;;  %v510_v23 = vor.u32 %v509_v11, %v506_v10  ;;  %v2869_v61 = vrot.slane %v2856_v48, 9  ;;  %v3543_v11 = vld [vmem:[%s4118_s1 + $0x88] sm:$0xff]   ;;  %v474_v48 = vld [vmem:[%s3695_s22 + $0x30] sm:$0xf] }
  0x32   : > { %3310 = vmatprep.subr.bf16.mxu0 %v3530_v19  ;;  %v496_v16 = vor.u32 %v495_v6, %v492_v5  ;;  %v530_v5 = vsel %vm3719_vm2, %v525_v1, %v529_v52  ;;  %v476_v52 = vld [vmem:[%s3695_s22 + $0x38] sm:$0xf]  ;;  %v574_v54 = vshrl.u32 %v474_v48, 16  ;;  %v2864_v1 = vld [vmem:[%s3695_s22 + $0x40] sm:$0xe] }
  0x33   : > { %v515_v17 = vrot.slane %v513_v7, 5  ;;  %v511_v30 = vrot.slane %v510_v23, 4  ;;  %v1540_v4 = vsel %vm3806_vm5, %v2869_v61, %v1539_v62 }
  0x34   : > { %3215 = vmatpush3.bf16.msra.mxu1 %v3529_v8  ;;  %v1308_v8 = vsel %vm3719_vm2, %v1303_v0, %v1307_v46  ;;  %v497_v27 = vrot.slane %v496_v16, 4  ;;  %v532_v46 = vshrl.u32 %v468_v34, 16  ;;  %v472_v16 = vld [vmem:[%s3695_s22 + $0x28] sm:$0xf]  ;;  %v2860_v34 = vld [vmem:[%s3695_s22 + $0x30] sm:$0xe] }
  0x35   : > { %3216 = vmatprep.subr.bf16.mxu1 %v3531_v20  ;;  %3311 = vmatpush3.bf16.msra.mxu0 %v3530_v19  ;;  %v2851_v19 = vld [vmem:[%s3695_s22 + $0xc] sm:$0x1]  ;;  %v2841_v22 = vcombine.low %v1308_v8, %v1322_v14  ;;  %v516_v43 = vsel %vm3719_vm2, %v511_v30, %v515_v17  ;;  %v470_v14 = vld [vmem:[%s3695_s22 + $0x20] sm:$0xf]  ;;  %v563_v23 = vshll.u32 %v472_v16, 16  ;;  %v2871_v40 = vrot.slane %v2860_v34, 9 }
  0x36   : > { %3312 = vmatprep.subr.bf16.mxu0 %v3532_v38  ;;  %v1527_v25 = vrot.slane %v2851_v19, 5  ;;  %v502_v37 = vsel %vm3719_vm2, %v497_v27, %v501_v9  ;;  %v534_v55 = vrot.slane %v532_v46, 4  ;;  %v3544_v9 = vld [vmem:[%s4118_s1 + $0x188] sm:$0xff]   ;;  %v546_v19 = vshrl.u32 %v470_v14, 16 }
  0x37   : > { %3301 = vmatmul.mubr.bf16.gmra.mrb[4].mxu0 %v2841_v22  ;;  %v2722_v49 = vcombine.low %v502_v37, %v516_v43  ;;  %v473_v17 = vld [vmem:[%s3695_s22 + $0x2c] sm:$0x1]  ;;  %v560_v22 = vshrl.u32 %v472_v16, 16  ;;  %v2861_v37 = vld [vmem:[%s3695_s22 + $0x34] sm:$0x1]  ;;  %v576_v62 = vrot.slane %v574_v54, 4 }
  0x38   : > { %3217 = vmatpush3.bf16.msra.mxu1 %v3531_v20  ;;  %v2852_v20 = vld [vmem:[%s3695_s22 + $0x10] sm:$0xe]  ;;  %v1528_v31 = vsel %vm3806_vm5, %v2866_v21, %v1527_v25  ;;  %v538_v2 = vor.u32 %v537_v60, %v534_v55  ;;  %v569_v24 = vshll.u32 %v473_v17, 16  ;;  %v3548_v25 = vld [vmem:[%s4118_s1 + $0x198] sm:$0xff]   ;;  %v1547_v43 = vrot.slane %v2861_v37, 5 }
  0x39   : > { %3218 = vmatprep.subr.bf16.mxu1 %v3533_v47  ;;  %3313 = vmatpush3.bf16.msra.mxu0 %v3532_v38  ;;  %v2867_v26 = vrot.slane %v2852_v20, 9  ;;  %v549_v20 = vshll.u32 %v470_v14, 16  ;;  %v2863_v60 = vld [vmem:[%s3695_s22 + $0x3c] sm:$0x1] }
  0x3a   : > { %3314 = vmatprep.subr.bf16.mxu0 %v3534_v56  ;;  %3224 = vmatprep.mubr.bf16.mxu1 %v2722_v49  ;;  %v539_v6 = vrot.slane %v538_v2, 4  ;;  %v475_v49 = vld [vmem:[%s3695_s22 + $0x34] sm:$0x1]  ;;  %v1548_v51 = vsel %vm3806_vm5, %v2871_v40, %v1547_v43  ;;  %v3552_v2 = vld [vmem:[%s4118_s1 + $0x1a8] sm:$0xff]   ;;  %v3556_v37 = vld [vmem:[%s4118_s1 + $0x1b8] sm:$0xff]  }
  0x3b   : > { %v1532_v38 = vsel %vm3806_vm5, %v2867_v26, %v1531_v28  ;;  %v548_v26 = vrot.slane %v546_v19, 4  ;;  %v551_v27 = vrot.slane %v549_v20, 5  ;;  %v562_v28 = vrot.slane %v560_v22, 4  ;;  %v763_v20 = vld [vmem:[%s3695_s22] sm:$0xe] }
  0x3c   : > { %3219 = vmatpush3.bf16.msra.mxu1 %v3533_v47  ;;  %v2890_v44 = vcombine.low %v1528_v31, %v1532_v38  ;;  %v2855_v47 = vld [vmem:[%s3695_s22 + $0x1c] sm:$0x1]  ;;  %v565_v31 = vrot.slane %v563_v23, 5  ;;  %v2870_v38 = vrot.slane %v2858_v29, 9  ;;  %v764_v23 = vld [vmem:[%s3695_s22 + $0x4] sm:$0x1] }
  0x3d   : > { %3220 = vmatprep.subr.bf16.mxu1 %v3536_v57  ;;  %3315 = vmatpush3.bf16.msra.mxu0 %v3534_v56  ;;  %v541_v56 = vshll.u32 %v469_v39, 16  ;;  %v1535_v58 = vrot.slane %v2855_v47, 5  ;;  %v1543_v39 = vrot.slane %v2859_v32, 5  ;;  %v766_v29 = vld [vmem:[%s3695_s22 + $0xc] sm:$0x1]  ;;  %v3553_v32 = vld [vmem:[%s4118_s1 + $0xb0] sm:$0xff]  }
  0x3e   : > { %3316 = vmatprep.subr.bf16.mxu0 %v3537_v13  ;;  %3320 = vmatprep.mubr.bf16.mxu0 %v2890_v44  ;;  %v566_v41 = vor.u32 %v565_v31, %v562_v28  ;;  %v3549_v44 = vld [vmem:[%s4118_s1 + $0xa0] sm:$0xff]   ;;  %v767_v43 = vld [vmem:[%s3695_s22 + $0x10] sm:$0xe] }
  0x3f   : > { %v543_v3 = vrot.slane %v541_v56, 5  ;;  %v1544_v47 = vsel %vm3806_vm5, %v2870_v38, %v1543_v39  ;;  %v3558_v39 = vld [vmem:[%s3695_s22 + $0x10] ss:$8 sps:$4 sm:$0xff]  }
  0x40   : > { %3221 = vmatpush3.bf16.msra.mxu1 %v3536_v57  ;;  %v2868_v57 = vrot.slane %v2854_v42, 9  ;;  %v571_v42 = vrot.slane %v569_v24, 5  ;;  %v2892_v56 = vcombine.low %v1544_v47, %v1548_v51  ;;  %v765_v24 = vld [vmem:[%s3695_s22 + $0x8] sm:$0xe]  ;;  %v770_v47 = vld [vmem:[%s3695_s22 + $0x1c] sm:$0x1] }
  0x41   : > { %3222 = vmatprep.subr.bf16.mxu1 %v3539_v15  ;;  %3317 = vmatpush3.bf16.msra.mxu0 %v3537_v13  ;;  %v544_v8 = vsel %vm3719_vm2, %v539_v6, %v543_v3  ;;  %v3546_v13 = vld [vmem:[%s4118_s1 + $0x190] sm:$0xff]   ;;  %v597_v6 = vshll.u32 %v477_v53, 16  ;;  %v2735_v31 = vrot.slane %v765_v24, 9  ;;  %v820_v51 = vrot.slane %v770_v47, 5  ;;  %v3557_v53 = vld [vmem:[%s4118_s1 + $0xc0] sm:$0xff]  }
  0x42   : > { %v1536_v0 = vsel %vm3806_vm5, %v2868_v57, %v1535_v58  ;;  %3318 = vmatprep.subr.bf16.mxu0 %v3540_v36  ;;  %v2723_v10 = vcombine.low %v530_v5, %v544_v8  ;;  %v577_v57 = vshll.u32 %v474_v48, 16  ;;  %v583_v58 = vshll.u32 %v475_v49, 16  ;;  %v2942_v47 = vld [vmem:[%s3695_s22 + $0x20] sm:$0xf] }
  0x43   : > { %v2891_v7 = vcombine.low %v1536_v0, %v1540_v4  ;;  %v591_v0 = vshll.u32 %v476_v52, 16  ;;  %v599_v14 = vrot.slane %v597_v6, 5  ;;  %v2736_v48 = vrot.slane %v767_v43, 9  ;;  %v3566_v6 = vld [vmem:[%s4118_s1 + $0x1d8] sm:$0xff]  }
  0x44   : > { %3223 = vmatpush3.bf16.msra.mxu1 %v3539_v15  ;;  %v471_v15 = vld [vmem:[%s3695_s22 + $0x24] sm:$0x1]  ;;  %v579_v4 = vrot.slane %v577_v57, 5  ;;  %v585_v5 = vrot.slane %v583_v58, 5  ;;  %v3562_v58 = vld [vmem:[%s4118_s1 + $0x1c8] sm:$0xff]  }
  0x45   : > { %3232 = vmatprep.subr.bf16.mxu1 %v3541_v50  ;;  %3319 = vmatpush3.bf16.msra.mxu0 %v3540_v36  ;;  %v555_v21 = vshll.u32 %v471_v15, 16  ;;  %v552_v36 = vor.u32 %v551_v27, %v548_v26  ;;  %v2873_v15 = vrot.slane %v2864_v1, 9  ;;  %v3554_v26 = vld [vmem:[%s4118_s1 + $0x1b0] sm:$0xff]   ;;  %v774_v1 = vld [vmem:[%s3695_s22 + $0x2c] sm:$0x1] }
  0x46   : > { %3328 = vmatprep.subr.bf16.mxu0 %v3542_v63 }
  0x47   : > { %3225 = vmatmul.mubr.bf16.vlgmr.msra.gmra.mrb[0].mxu1 %v2723_v10  ;;  %v557_v30 = vrot.slane %v555_v21, 5  ;;  %v553_v46 = vrot.slane %v552_v36, 4  ;;  %v2872_v10 = vrot.slane %v2862_v59, 9  ;;  %v3561_v59 = vld [vmem:[%s4118_s1 + $0xc8] sm:$0xff]  }
  0x48   : > { %3321 = vmatmul.mubr.bf16.vlgmr.msra.gmra.mrb[0].mxu0 %v2891_v7  ;;  %3233 = vmatpush3.bf16.msra.mxu1 %v3541_v50  ;;  %v567_v50 = vrot.slane %v566_v41, 4  ;;  %v2865_v7 = vld [vmem:[%s3695_s22 + $0x44] sm:$0x1]  ;;  %v3555_v41 = vld [vmem:[%s4118_s1 + $0xb8] sm:$0xff]  }
  0x49   : > { %3329 = vmatpush3.bf16.msra.mxu0 %v3542_v63  ;;  %3234 = vmatprep.subr.bf16.mxu1 %v3543_v11  ;;  %v558_v55 = vsel %vm3719_vm2, %v553_v46, %v557_v30  ;;  %v588_v63 = vshrl.u32 %v476_v52, 16  ;;  %v1555_v16 = vrot.slane %v2865_v7, 5  ;;  %v808_v30 = vrot.slane %v764_v23, 5  ;;  %v769_v46 = vld [vmem:[%s3695_s22 + $0x18] sm:$0xe]  ;;  %v3559_v52 = vld [vmem:[%s4118_s1 + $0x1c0] sm:$0xff]  }
  0x4a   : > { %3330 = vmatprep.subr.bf16.mxu0 %v3544_v9  ;;  %v572_v61 = vsel %vm3719_vm2, %v567_v50, %v571_v42  ;;  %3324 = vmatprep.mubr.bf16.mxu0 %v2892_v56  ;;  %v2737_v50 = vrot.slane %v769_v46, 9  ;;  %v3560_v56 = vld [vmem:[%s3695_s22 + $0x20] ss:$8 sps:$4 sm:$0xff]  }
  0x4b   : > { %v2724_v3 = vcombine.low %v558_v55, %v572_v61  ;;  %v590_v8 = vrot.slane %v588_v63, 4  ;;  %v1556_v22 = vsel %vm3806_vm5, %v2873_v15, %v1555_v16  ;;  %v3564_v61 = vld [vmem:[%s4118_s1 + $0x1d0] sm:$0xff]   ;;  %v772_v63 = vld [vmem:[%s3695_s22 + $0x24] sm:$0x1]  ;;  %v3573_v23 = vld [vmem:[%s3695_s22 + $0x40] ss:$8 sps:$4 sm:$0xff]  }
  0x4c   : > { %3235 = vmatpush3.bf16.msra.mxu1 %v3543_v11  ;;  %v1551_v11 = vrot.slane %v2863_v60, 5  ;;  %v821_v55 = vsel %vm3806_vm5, %v2737_v50, %v820_v51  ;;  %v3563_v60 = vld [vmem:[%s4118_s1 + $0xd0] sm:$0xff]   ;;  %v2943_v50 = vld [vmem:[%s3695_s22 + $0x24] sm:$0x1]  ;;  %v2944_v51 = vld [vmem:[%s3695_s22 + $0x28] sm:$0xf] }
  0x4d   : > { %3331 = vmatpush3.bf16.msra.mxu0 %v3544_v9  ;;  %3236 = vmatprep.subr.bf16.mxu1 %v3545_v12  ;;  %v593_v9 = vrot.slane %v591_v0, 5  ;;  %v773_v0 = vld [vmem:[%s3695_s22 + $0x28] sm:$0xe] }
  0x4e   : > { %3332 = vmatprep.subr.bf16.mxu0 %v3546_v13  ;;  %3228 = vmatprep.mubr.bf16.mxu1 %v2724_v3  ;;  %v1552_v19 = vsel %vm3806_vm5, %v2872_v10, %v1551_v11  ;;  %v824_v3 = vrot.slane %v772_v63, 5  ;;  %v776_v10 = vld [vmem:[%s3695_s22 + $0x34] sm:$0x1] }
  0x4f   : > { %v594_v17 = vor.u32 %v593_v9, %v590_v8  ;;  %v2893_v28 = vcombine.low %v1552_v19, %v1556_v22  ;;  %v3571_v8 = vld [vmem:[%s3695_s22 + $0x30] ss:$8 sps:$4 sm:$0xff]   ;;  %v832_v15 = vrot.slane %v776_v10, 5 }
  0x50   : > { %3237 = vmatpush3.bf16.msra.mxu1 %v3545_v12  ;;  %v3551_v12 = vld [vmem:[%s4118_s1 + $0xa8] sm:$0xff]   ;;  %v775_v9 = vld [vmem:[%s3695_s22 + $0x30] sm:$0xe] }
  0x51   : > { %3333 = vmatpush3.bf16.msra.mxu0 %v3546_v13  ;;  %3238 = vmatprep.subr.bf16.mxu1 %v3547_v35  ;;  %v580_v13 = vor.u32 %v579_v4, %v576_v62  ;;  %v595_v27 = vrot.slane %v594_v17, 4  ;;  %v771_v62 = vld [vmem:[%s3695_s22 + $0x20] sm:$0xe]  ;;  %v2739_v4 = vrot.slane %v773_v0, 9 }
  0x52   : > { %3334 = vmatprep.subr.bf16.mxu0 %v3548_v25  ;;  %3325 = vmatmul.mubr.bf16.gmra.mrb[4].mxu0 %v2893_v28  ;;  %v3577_v28 = vld [vmem:[%s3695_s22 + $0x8] ss:$8 sps:$4 sm:$0xff]  }
  0x53   : > { %v581_v21 = vrot.slane %v580_v13, 4  ;;  %v600_v36 = vsel %vm3719_vm2, %v595_v27, %v599_v14  ;;  %3344 = vmatprep.mubr.bf16.mxu0 %v3558_v39  ;;  %v778_v13 = vld [vmem:[%s3695_s22 + $0x3c] sm:$0x1]  ;;  %v2740_v14 = vrot.slane %v775_v9, 9  ;;  %v3570_v27 = vld [vmem:[%s4118_s1 + $0x1e8] sm:$0xff]  }
  0x54   : > { %3239 = vmatpush3.bf16.msra.mxu1 %v3547_v35  ;;  %v812_v35 = vrot.slane %v766_v29, 5  ;;  %v836_v19 = vrot.slane %v778_v13, 5  ;;  %v2938_v29 = vld [vmem:[%s3695_s22 + $0x10] sm:$0xf]  ;;  %v2947_v13 = vld [vmem:[%s3695_s22 + $0x34] sm:$0x1] }
  0x55   : > { %3335 = vmatpush3.bf16.msra.mxu0 %v3548_v25  ;;  %3240 = vmatprep.subr.bf16.mxu1 %v3549_v44  ;;  %v2734_v25 = vrot.slane %v763_v20, 9  ;;  %v586_v34 = vsel %vm3719_vm2, %v581_v21, %v585_v5  ;;  %v828_v5 = vrot.slane %v774_v1, 5  ;;  %v3565_v20 = vld [vmem:[%s4118_s1 + $0xd8] sm:$0xff]   ;;  %v833_v21 = vsel %vm3806_vm5, %v2740_v14, %v832_v15 }
  0x56   : > { %3336 = vmatprep.subr.bf16.mxu0 %v3550_v45  ;;  %v2725_v40 = vcombine.low %v586_v34, %v600_v36  ;;  %v813_v42 = vsel %vm3806_vm5, %v2735_v31, %v812_v35  ;;  %v2940_v31 = vld [vmem:[%s3695_s22 + $0x18] sm:$0xf]  ;;  %v1931_v34 = vshrl.u32 %v2938_v29, 16  ;;  %v1934_v35 = vshll.u32 %v2938_v29, 16 }
  0x57   : > { %v809_v38 = vsel %vm3806_vm5, %v2734_v25, %v808_v30  ;;  %v829_v11 = vsel %vm3806_vm5, %v2739_v4, %v828_v5  ;;  %v3568_v25 = vld [vmem:[%s4118_s1 + $0x1e0] sm:$0xff]   ;;  %v2939_v30 = vld [vmem:[%s3695_s22 + $0x14] sm:$0x1]  ;;  %v3575_v1 = vld [vmem:[%s4118_s1 + $0xf8] sm:$0xff]  }
  0x58   : > { %3241 = vmatpush3.bf16.msra.mxu1 %v3549_v44  ;;  %v2758_v44 = vcombine.low %v809_v38, %v813_v42  ;;  %v1940_v36 = vshll.u32 %v2939_v30, 16  ;;  %v1948_v38 = vshll.u32 %v2940_v31, 16  ;;  %v1936_v42 = vrot.slane %v1934_v35, 5  ;;  %v2948_v14 = vld [vmem:[%s3695_s22 + $0x38] sm:$0xf] }
  0x59   : > { %3337 = vmatpush3.bf16.msra.mxu0 %v3550_v45  ;;  %3242 = vmatprep.subr.bf16.mxu1 %v3551_v12  ;;  %v768_v45 = vld [vmem:[%s3695_s22 + $0x14] sm:$0x1]  ;;  %v3578_v30 = vld [vmem:[%s3695_s22 + $0x18] ss:$8 sps:$4 sm:$0xff]  }
  0x5a   : > { %3338 = vmatprep.subr.bf16.mxu0 %v3552_v2  ;;  %3229 = vmatmul.mubr.bf16.gmra.mrb[4].mxu1 %v2725_v40  ;;  %v816_v49 = vrot.slane %v768_v45, 5  ;;  %v3569_v40 = vld [vmem:[%s4118_s1 + $0xe8] sm:$0xff]   ;;  %v1942_v43 = vrot.slane %v1940_v36, 5  ;;  %v1950_v45 = vrot.slane %v1948_v38, 5  ;;  %v2950_v38 = vld [vmem:[%s3695_s22 + $0x40] sm:$0xf] }
  0x5b   : > { %3248 = vmatprep.mubr.bf16.mxu1 %v2758_v44 }
  0x5c   : > { %3243 = vmatpush3.bf16.msra.mxu1 %v3551_v12  ;;  %v817_v54 = vsel %vm3806_vm5, %v2736_v48, %v816_v49  ;;  %v777_v12 = vld [vmem:[%s3695_s22 + $0x38] sm:$0xe]  ;;  %v3572_v48 = vld [vmem:[%s4118_s1 + $0xf0] sm:$0xff]  }
  0x5d   : > { %3339 = vmatpush3.bf16.msra.mxu0 %v3552_v2  ;;  %3244 = vmatprep.subr.bf16.mxu1 %v3553_v32  ;;  %v2759_v57 = vcombine.low %v817_v54, %v821_v55  ;;  %v2738_v2 = vrot.slane %v771_v62, 9  ;;  %v2741_v17 = vrot.slane %v777_v12, 9  ;;  %v1959_v55 = vshrl.u32 %v2942_v47, 16  ;;  %v2946_v12 = vld [vmem:[%s3695_s22 + $0x30] sm:$0xf] }
  0x5e   : > { %3340 = vmatprep.subr.bf16.mxu0 %v3554_v26 }
  0x5f   : > { %v825_v7 = vsel %vm3806_vm5, %v2738_v2, %v824_v3  ;;  %v837_v22 = vsel %vm3806_vm5, %v2741_v17, %v836_v19  ;;  %v1961_v63 = vrot.slane %v1959_v55, 4  ;;  %v3576_v2 = vld [vmem:[%s4118_s1 + $0x1f8] sm:$0xff]   ;;  %v1987_v17 = vshrl.u32 %v2946_v12, 16 }
  0x60   : > { %3245 = vmatpush3.bf16.msra.mxu1 %v3553_v32  ;;  %v2760_v16 = vcombine.low %v825_v7, %v829_v11  ;;  %v2761_v24 = vcombine.low %v833_v21, %v837_v22  ;;  %v2941_v32 = vld [vmem:[%s3695_s22 + $0x1c] sm:$0x1]  ;;  %v1990_v19 = vshll.u32 %v2946_v12, 16  ;;  %v2001_v22 = vshrl.u32 %v2948_v14, 16 }
  0x61   : > { %3341 = vmatpush3.bf16.msra.mxu0 %v3554_v26  ;;  %3246 = vmatprep.subr.bf16.mxu1 %v3555_v41  ;;  %v3567_v26 = vld [vmem:[%s4118_s1 + $0xe0] sm:$0xff]   ;;  %v1954_v39 = vshll.u32 %v2941_v32, 16 }
  0x62   : > { %3342 = vmatprep.subr.bf16.mxu0 %v3556_v37  ;;  %v2003_v32 = vrot.slane %v2001_v22, 4 }
  0x63   : > { %v1956_v46 = vrot.slane %v1954_v39, 5  ;;  %v2951_v39 = vld [vmem:[%s3695_s22 + $0x44] sm:$0x1] }
  0x64   : > { %3247 = vmatpush3.bf16.msra.mxu1 %v3555_v41  ;;  %v1933_v41 = vrot.slane %v1931_v34, 4 }
  0x65   : > { %3343 = vmatpush3.bf16.msra.mxu0 %v3556_v37  ;;  %3256 = vmatprep.subr.bf16.mxu1 %v3557_v53  ;;  %v1945_v37 = vshrl.u32 %v2940_v31, 16 }
  0x66   : > { %3352 = vmatprep.subr.bf16.mxu0 %v3559_v52  ;;  %v1937_v49 = vor.u32 %v1936_v42, %v1933_v41  ;;  %v3580_v41 = vld [vmem:[%s4118_s1 + $0x208] sm:$0xff]  }
  0x67   : > { %3249 = vmatmul.mubr.bf16.vlgmr.msra.gmra.mrb[0].mxu1 %v2759_v57  ;;  %v1947_v44 = vrot.slane %v1945_v37, 4  ;;  %v1968_v57 = vshll.u32 %v2943_v50, 16  ;;  %v3581_v42 = vld [vmem:[%s3695_s22 + $0x28] ss:$8 sps:$4 sm:$0xff]  }
  0x68   : > { %3345 = vmatmul.mubr.bf16.vlgmr.msra.gmra.mrb[0].mxu0 %v3560_v56  ;;  %3257 = vmatpush3.bf16.msra.mxu1 %v3557_v53  ;;  %v3574_v53 = vld [vmem:[%s4118_s1 + $0x1f0] sm:$0xff]   ;;  %v1962_v56 = vshll.u32 %v2942_v47, 16  ;;  %v2024_v47 = vshll.u32 %v2951_v39, 16  ;;  %v2995_v39 = vld [vmem:[%s3695_s22 + $0x44] sm:$0x1] }
  0x69   : > { %3353 = vmatpush3.bf16.msra.mxu0 %v3559_v52  ;;  %3258 = vmatprep.subr.bf16.mxu1 %v3561_v59  ;;  %v2945_v52 = vld [vmem:[%s3695_s22 + $0x2c] sm:$0x1]  ;;  %v1951_v54 = vor.u32 %v1950_v45, %v1947_v44  ;;  %v2015_v45 = vshrl.u32 %v2950_v38, 16 }
  0x6a   : > { %3354 = vmatprep.subr.bf16.mxu0 %v3562_v58  ;;  %3348 = vmatprep.mubr.bf16.mxu0 %v3571_v8  ;;  %v1964_v0 = vrot.slane %v1962_v56, 5  ;;  %v1970_v8 = vrot.slane %v1968_v57, 5  ;;  %v2953_v44 = vld [vmem:[%s3695_s22 + $0x4c] sm:$0x1]  ;;  %v2026_v55 = vrot.slane %v2024_v47, 5  ;;  %v2270_v47 = vrot.slane %v2995_v39, 5 }
  0x6b   : > { %3252 = vmatprep.mubr.bf16.mxu1 %v2760_v16  ;;  %v1952_v62 = vrot.slane %v1951_v54, 4  ;;  %v2949_v16 = vld [vmem:[%s3695_s22 + $0x3c] sm:$0x1] }
  0x6c   : > { %3259 = vmatpush3.bf16.msra.mxu1 %v3561_v59  ;;  %v1973_v59 = vshrl.u32 %v2944_v51, 16  ;;  %v1965_v7 = vor.u32 %v1964_v0, %v1961_v63 }
  0x6d   : > { %3355 = vmatpush3.bf16.msra.mxu0 %v3562_v58  ;;  %3260 = vmatprep.subr.bf16.mxu1 %v3563_v60  ;;  %v1938_v58 = vrot.slane %v1937_v49, 4 }
  0x6e   : > { %3356 = vmatprep.subr.bf16.mxu0 %v3564_v61  ;;  %v1975_v4 = vrot.slane %v1973_v59, 4  ;;  %v1966_v15 = vrot.slane %v1965_v7, 4  ;;  %v2984_v7 = vld [vmem:[%s3695_s22 + $0x18] sm:$0xe] }
  0x6f   : > { %3253 = vmatmul.mubr.bf16.gmra.mrb[4].mxu1 %v2761_v24  ;;  %v1943_v3 = vsel %vm3719_vm2, %v1938_v58, %v1942_v43  ;;  %v2010_v24 = vshll.u32 %v2949_v16, 16 }
  0x70   : > { %3261 = vmatpush3.bf16.msra.mxu1 %v3563_v60  ;;  %3349 = vmatmul.mubr.bf16.gmra.mrb[4].mxu0 %v3573_v23  ;;  %v1976_v60 = vshll.u32 %v2944_v51, 16  ;;  %v2004_v23 = vshll.u32 %v2948_v14, 16  ;;  %v2038_v51 = vshll.u32 %v2953_v44, 16  ;;  %v2990_v14 = vld [vmem:[%s3695_s22 + $0x30] sm:$0xe] }
  0x71   : > { %3357 = vmatpush3.bf16.msra.mxu0 %v3564_v61  ;;  %3262 = vmatprep.subr.bf16.mxu1 %v3565_v20  ;;  %v1982_v61 = vshll.u32 %v2945_v52, 16  ;;  %v2012_v35 = vrot.slane %v2010_v24, 5 }
  0x72   : > { %3358 = vmatprep.subr.bf16.mxu0 %v3566_v6  ;;  %3272 = vmatprep.mubr.bf16.mxu1 %v3577_v28  ;;  %v1978_v5 = vrot.slane %v1976_v60, 5  ;;  %v1992_v28 = vrot.slane %v1990_v19, 5  ;;  %v2006_v34 = vrot.slane %v2004_v23, 5  ;;  %v2040_v59 = vrot.slane %v2038_v51, 5  ;;  %v3583_v60 = vld [vmem:[%s4118_s1 + $0x210] sm:$0xff]  }
  0x73   : > { %v1984_v9 = vrot.slane %v1982_v61, 5  ;;  %v2992_v19 = vld [vmem:[%s3695_s22 + $0x38] sm:$0xe] }
  0x74   : > { %3263 = vmatpush3.bf16.msra.mxu1 %v3565_v20  ;;  %v1979_v11 = vor.u32 %v1978_v5, %v1975_v4  ;;  %v1996_v20 = vshll.u32 %v2947_v13, 16  ;;  %v2007_v43 = vor.u32 %v2006_v34, %v2003_v32  ;;  %v2982_v4 = vld [vmem:[%s3695_s22 + $0x10] sm:$0xe]  ;;  %v2999_v13 = vrot.slane %v2984_v7, 9  ;;  %v2986_v34 = vld [vmem:[%s3695_s22 + $0x20] sm:$0xe] }
  0x75   : > { %3359 = vmatpush3.bf16.msra.mxu0 %v3566_v6  ;;  %3264 = vmatprep.subr.bf16.mxu1 %v3567_v26  ;;  %v1957_v6 = vsel %vm3719_vm2, %v1952_v62, %v1956_v46  ;;  %v2018_v46 = vshll.u32 %v2950_v38, 16  ;;  %v3003_v23 = vrot.slane %v2992_v19, 9  ;;  %v3587_v32 = vld [vmem:[%s4118_s1 + $0x230] sm:$0xff]   ;;  %v2994_v38 = vld [vmem:[%s3695_s22 + $0x40] sm:$0xe] }
  0x76   : > { %3360 = vmatprep.subr.bf16.mxu0 %v3568_v25  ;;  %v2970_v10 = vcombine.low %v1943_v3, %v1957_v6  ;;  %v1980_v21 = vrot.slane %v1979_v11, 4  ;;  %v1998_v29 = vrot.slane %v1996_v20, 5  ;;  %v2008_v52 = vrot.slane %v2007_v43, 4  ;;  %v2983_v6 = vld [vmem:[%s3695_s22 + $0x14] sm:$0x1] }
  0x77   : > { %v2020_v54 = vrot.slane %v2018_v46, 5  ;;  %v2998_v11 = vrot.slane %v2982_v4, 9  ;;  %v2246_v12 = vrot.slane %v2983_v6, 5  ;;  %v3002_v20 = vrot.slane %v2990_v14, 9 }
  0x78   : > { %3265 = vmatpush3.bf16.msra.mxu1 %v3567_v26  ;;  %3368 = vmatprep.mubr.bf16.mxu0 %v2970_v10  ;;  %v3579_v26 = vld [vmem:[%s4118_s1 + $0x200] sm:$0xff]   ;;  %v1985_v31 = vsel %vm3719_vm2, %v1980_v21, %v1984_v9  ;;  %v2013_v61 = vsel %vm3719_vm2, %v2008_v52, %v2012_v35  ;;  %v3584_v10 = vld [vmem:[%s4118_s1 + $0x218] sm:$0xff]   ;;  %v3004_v46 = vrot.slane %v2994_v38, 9 }
  0x79   : > { %3361 = vmatpush3.bf16.msra.mxu0 %v3568_v25  ;;  %3266 = vmatprep.subr.bf16.mxu1 %v3569_v40  ;;  %v1971_v25 = vsel %vm3719_vm2, %v1966_v15, %v1970_v8  ;;  %v2985_v8 = vld [vmem:[%s3695_s22 + $0x1c] sm:$0x1]  ;;  %v2247_v21 = vsel %vm3806_vm5, %v2998_v11, %v2246_v12  ;;  %v2987_v35 = vld [vmem:[%s3695_s22 + $0x24] sm:$0x1] }
  0x7a   : > { %3362 = vmatprep.subr.bf16.mxu0 %v3570_v27  ;;  %v2971_v36 = vcombine.low %v1971_v25, %v1985_v31  ;;  %v2250_v16 = vrot.slane %v2985_v8, 5  ;;  %v2266_v25 = vrot.slane %v2993_v33, 5  ;;  %v3586_v31 = vld [vmem:[%s4118_s1 + $0x228] sm:$0xff]   ;;  %v2254_v43 = vrot.slane %v2987_v35, 5 }
  0x7c   : > { %3267 = vmatpush3.bf16.msra.mxu1 %v3569_v40  ;;  %v2952_v40 = vld [vmem:[%s3695_s22 + $0x48] sm:$0xf]  ;;  %v2251_v24 = vsel %vm3806_vm5, %v2999_v13, %v2250_v16 }
  0x7d   : > { %3363 = vmatpush3.bf16.msra.mxu0 %v3570_v27  ;;  %3268 = vmatprep.subr.bf16.mxu1 %v3572_v48  ;;  %v1989_v27 = vrot.slane %v1987_v17, 4  ;;  %v2029_v49 = vshrl.u32 %v2952_v40, 16  ;;  %v2032_v50 = vshll.u32 %v2952_v40, 16  ;;  %v2991_v17 = vld [vmem:[%s3695_s22 + $0x34] sm:$0x1] }
  0x7e   : > { %3364 = vmatprep.subr.bf16.mxu0 %v3574_v53  ;;  %v2262_v22 = vrot.slane %v2991_v17, 5  ;;  %v2996_v40 = vld [vmem:[%s3695_s22 + $0x48] sm:$0xe] }
  0x7f   : > { %v1993_v37 = vor.u32 %v1992_v28, %v1989_v27  ;;  %v2031_v57 = vrot.slane %v2029_v49, 4  ;;  %v2034_v58 = vrot.slane %v2032_v50, 5  ;;  %v3585_v28 = vld [vmem:[%s4118_s1 + $0x220] sm:$0xff]   ;;  %v3588_v50 = vld [vmem:[%s4118_s1 + $0x238] sm:$0xff]  }
  0x80   : > { %3269 = vmatpush3.bf16.msra.mxu1 %v3572_v48  ;;  %v2263_v27 = vsel %vm3806_vm5, %v3002_v20, %v2262_v22 }
  0x81   : > { %3365 = vmatpush3.bf16.msra.mxu0 %v3574_v53  ;;  %3270 = vmatprep.subr.bf16.mxu1 %v3575_v1  ;;  %v1994_v48 = vrot.slane %v1993_v37, 4  ;;  %v2017_v53 = vrot.slane %v2015_v45, 4  ;;  %v2035_v0 = vor.u32 %v2034_v58, %v2031_v57  ;;  %v2989_v37 = vld [vmem:[%s3695_s22 + $0x2c] sm:$0x1] }
  0x82   : > { %3366 = vmatprep.subr.bf16.mxu0 %v3576_v2  ;;  %v2258_v45 = vrot.slane %v2989_v37, 5 }
  0x83   : > { %v1999_v56 = vsel %vm3719_vm2, %v1994_v48, %v1998_v29  ;;  %v2021_v62 = vor.u32 %v2020_v54, %v2017_v53  ;;  %v2036_v3 = vrot.slane %v2035_v0, 4  ;;  %v2267_v29 = vsel %vm3806_vm5, %v3003_v23, %v2266_v25 }
  0x84   : > { %3271 = vmatpush3.bf16.msra.mxu1 %v3575_v1  ;;  %v2972_v63 = vcombine.low %v1999_v56, %v2013_v61  ;;  %v3582_v1 = vld [vmem:[%s3695_s22 + $0x38] ss:$8 sps:$4 sm:$0xff]   ;;  %v3005_v48 = vrot.slane %v2996_v40, 9  ;;  %v2271_v53 = vsel %vm3806_vm5, %v3004_v46, %v2270_v47 }
  0x85   : > { %3367 = vmatpush3.bf16.msra.mxu0 %v3576_v2  ;;  %3400 = vmatprep.subr.bf16.mxu1 %v3579_v26  ;;  %v2022_v2 = vrot.slane %v2021_v62, 4  ;;  %v2041_v9 = vsel %vm3719_vm2, %v2036_v3, %v2040_v59 }
  0x86   : > { %3376 = vmatprep.subr.bf16.mxu0 %v3579_v26 }
  0x87   : > { %3273 = vmatmul.mubr.bf16.vlgmr.msra.gmra.mrb[0].mxu1 %v3578_v30  ;;  %v2027_v5 = vsel %vm3719_vm2, %v2022_v2, %v2026_v55  ;;  %v3024_v30 = vcombine.low %v2263_v27, %v2267_v29 }
  0x88   : > { %3369 = vmatmul.mubr.bf16.vlgmr.msra.gmra.mrb[0].mxu0 %v2971_v36  ;;  %3408 = vmatpush3.bf16.msra.mxu1 %v3579_v26  ;;  %v2973_v15 = vcombine.low %v2027_v5, %v2041_v9  ;;  %v2988_v36 = vld [vmem:[%s3695_s22 + $0x28] sm:$0xe] }
  0x89   : > { %3377 = vmatpush3.bf16.msra.mxu0 %v3579_v26  ;;  %3401 = vmatprep.subr.bf16.mxu1 %v3580_v41  ;;  %v3022_v26 = vcombine.low %v2247_v21, %v2251_v24  ;;  %v3001_v44 = vrot.slane %v2988_v36, 9 }
  0x8a   : > { %3378 = vmatprep.subr.bf16.mxu0 %v3580_v41  ;;  %3276 = vmatprep.mubr.bf16.mxu1 %v3581_v42  ;;  %v3000_v42 = vrot.slane %v2986_v34, 9 }
  0x8b   : > { %3372 = vmatprep.mubr.bf16.mxu0 %v2972_v63  ;;  %v2259_v52 = vsel %vm3806_vm5, %v3001_v44, %v2258_v45 }
  0x8c   : > { %3409 = vmatpush3.bf16.msra.mxu1 %v3580_v41  ;;  %v2255_v51 = vsel %vm3806_vm5, %v3000_v42, %v2254_v43 }
  0x8d   : > { %3379 = vmatpush3.bf16.msra.mxu0 %v3580_v41  ;;  %3402 = vmatprep.subr.bf16.mxu1 %v3583_v60  ;;  %v2997_v41 = vld [vmem:[%s3695_s22 + $0x4c] sm:$0x1]  ;;  %v3023_v55 = vcombine.low %v2255_v51, %v2259_v52  ;;  %s3044_s22 = sshll.u32 %s4131_s15, 5 }
  0x8e   : > { %3380 = vmatprep.subr.bf16.mxu0 %v3583_v60  ;;  %v2274_v49 = vrot.slane %v2997_v41, 5  ;;  %s255_s20 = scalar_lea.vmem %s4119_s2, %s3044_s22 }
  0x8f   : > { %3277 = vmatmul.mubr.bf16.gmra.mrb[4].mxu1 %v3582_v1 }
  0x90   : > { %3373 = vmatmul.mubr.bf16.gmra.mrb[4].mxu0 %v2973_v15  ;;  %3410 = vmatpush3.bf16.msra.mxu1 %v3583_v60  ;;  %v2275_v54 = vsel %vm3806_vm5, %v3005_v48, %v2274_v49 }
  0x91   : > { %3381 = vmatpush3.bf16.msra.mxu0 %v3583_v60  ;;  %3403 = vmatprep.subr.bf16.mxu1 %v3584_v10  ;;  %v3025_v56 = vcombine.low %v2271_v53, %v2275_v54 }
  0x92   : > { %3382 = vmatprep.subr.bf16.mxu0 %v3584_v10  ;;  %3392 = vmatprep.mubr.bf16.mxu0 %v3022_v26 }
  0x93   : > { %3396 = vmatprep.mubr.bf16.mxu1 %v3024_v30 }
  0x94   : > { %3411 = vmatpush3.bf16.msra.mxu1 %v3584_v10 }
  0x95   : > { %3383 = vmatpush3.bf16.msra.mxu0 %v3584_v10  ;;  %3404 = vmatprep.subr.bf16.mxu1 %v3585_v28 }
  0x96   : > { %3384 = vmatprep.subr.bf16.mxu0 %v3585_v28 }
  0x98   : > { %3412 = vmatpush3.bf16.msra.mxu1 %v3585_v28 }
  0x99   : > { %3385 = vmatpush3.bf16.msra.mxu0 %v3585_v28  ;;  %3405 = vmatprep.subr.bf16.mxu1 %v3586_v31 }
  0x9a   : > { %3386 = vmatprep.subr.bf16.mxu0 %v3586_v31 }
  0x9c   : > { %3413 = vmatpush3.bf16.msra.mxu1 %v3586_v31 }
  0x9d   : > { %3387 = vmatpush3.bf16.msra.mxu0 %v3586_v31  ;;  %3406 = vmatprep.subr.bf16.mxu1 %v3587_v32 }
  0x9e   : > { %3388 = vmatprep.subr.bf16.mxu0 %v3587_v32 }
  0xa0   : > { %3414 = vmatpush3.bf16.msra.mxu1 %v3587_v32 }
  0xa1   : > { %3389 = vmatpush3.bf16.msra.mxu0 %v3587_v32  ;;  %3407 = vmatprep.subr.bf16.mxu1 %v3588_v50 }
  0xa2   : > { %3390 = vmatprep.subr.bf16.mxu0 %v3588_v50 }
  0xa4   : > { %3415 = vmatpush3.bf16.msra.mxu1 %v3588_v50 }
  0xa5   : > { %3391 = vmatpush3.bf16.msra.mxu0 %v3588_v50 }
  0xa7   : > { %3397 = vmatmul.mubr.bf16.vlgmr.msra.gmra.mrb[8].mxu1 %v3025_v56 }
  0xa8   : > { %3393 = vmatmul.mubr.bf16.vlgmr.msra.gmra.mrb[0].mxu0 %v3023_v55 }
 0x15a   : > { %v3274_v57 = vpop.f32.mrb[0].mxu1 }
 0x15b   : > { %v1140_v58 = vpop.f32.mrb[1].mxu1 }
 0x15c   : > { %v3275_v59 = vpop.f32.mrb[2].mxu1 }
 0x15d   : > { %v1143_v60 = vpop.f32.mrb[3].mxu1 }
 0x162   : > { %v3278_v61 = vpop.f32.mrb[4].mxu1 }
 0x163   : > { %v3374_v62 = vpop.f32.mrb[4].mxu0  ;;  %v1156_v0 = vpop.f32.mrb[5].mxu1 }
 0x164   : > { %v3420_v63 = vadd.f32 %v3374_v62, %v3278_v61  ;;  %v2173_v1 = vpop.f32.mrb[5].mxu0  ;;  %v3279_v2 = vpop.f32.mrb[6].mxu1 }
 0x165   : > { %v3422_v18 = vadd.f32 %v2173_v1, %v1156_v0  ;;  %v3375_v3 = vpop.f32.mrb[6].mxu0  ;;  %v1159_v5 = vpop.f32.mrb[7].mxu1 }
 0x166   : > { %v3424_v4 = vadd.f32 %v3375_v3, %v3279_v2  ;;  %v2176_v6 = vpop.f32.mrb[7].mxu0 }
 0x167   : > { %v3426_v7 = vadd.f32 %v2176_v6, %v1159_v5 }
 0x17a   : > { %v3398_v9 = vpop.f32.mrb[8].mxu1 }
 0x17b   : > { %v3394_v8 = vpop.f32.mrb[0].mxu0  ;;  %v3421_v11 = vadd.f32 %v3420_v63, %v3398_v9  ;;  %v2407_v13 = vpop.f32.mrb[9].mxu1 }
 0x17c   : > { %v3416_v10 = vadd.f32 %v3394_v8, %v3274_v57  ;;  %v2391_v12 = vpop.f32.mrb[1].mxu0  ;;  %v3423_v15 = vadd.f32 %v3422_v18, %v2407_v13  ;;  %v3399_v17 = vpop.f32.mrb[10].mxu1 }
 0x17d   : > { %v3417_v14 = vadd.f32 %v2391_v12, %v1140_v58  ;;  %v3395_v16 = vpop.f32.mrb[2].mxu0  ;;  %v3425_v20 = vadd.f32 %v3424_v4, %v3399_v17  ;;  %v2410_v33 = vpop.f32.mrb[11].mxu1  ;;  %v2506_v44 = vmul.f32 %v3421_v11, %v3421_v11 }
 0x17e   : > { %v3418_v19 = vadd.f32 %v3395_v16, %v3275_v59  ;;  %v2394_v21 = vpop.f32.mrb[3].mxu0  ;;  %v3427_v23 = vadd.f32 %v3426_v7, %v2410_v33  ;;  %v2502_v31 = vmul.f32 %v3416_v10, %v3416_v10  ;;  %v2504_v38 = vmul.f32 %v3423_v15, %v3423_v15 }
 0x17f   : > { %v3419_v22 = vadd.f32 %v2394_v21, %v1143_v60  ;;  %v2500_v24 = vmul.f32 %v3417_v14, %v3417_v14  ;;  %v3071_v26 = vpack.c.bf16 %v3425_v20, %v3421_v11  ;;  %v2507_v47 = vmul.f32 %v3425_v20, %v3425_v20 }
 0x180   : > { %v3061_v25 = vpack.c.bf16 %v3418_v19, %v3416_v10  ;;  %v3066_v30 = vpack.c.bf16 %v3427_v23, %v3423_v15  ;;  %v2503_v35 = vmul.f32 %v3418_v19, %v3418_v19  ;;  %v2505_v42 = vmul.f32 %v3427_v23, %v3427_v23 }
 0x181   : > { %v3056_v27 = vpack.c.bf16 %v3419_v22, %v3417_v14  ;;  %v2486_v28 = vadd.f32 %v3419_v22, %v3417_v14  ;;  %v2501_v29 = vmul.f32 %v3419_v22, %v3419_v22  ;;  %3075 = vst [vmem:[%s255_s20 + $0x18] sm:$0xff] %v3071_v26  }
 0x182   : > { %3073 = vst [vmem:[%s255_s20 + $0x8] sm:$0xff] %v3061_v25   ;;  %3074 = vst [vmem:[%s255_s20 + $0x10] sm:$0xff] %v3066_v30  }
 0x183   : > { %3057 = vst [vmem:[%s255_s20] sm:$0xff] %v3056_v27   ;;  %v2487_v32 = vadd.f32 %v3416_v10, %v2486_v28  ;;  %v2508_v34 = vadd.f32 %v2501_v29, %v2500_v24 }
 0x185   : > { %v2509_v36 = vadd.f32 %v2508_v34, %v2502_v31  ;;  %v2488_v37 = vadd.f32 %v3418_v19, %v2487_v32 }
 0x187   : > { %v2489_v39 = vadd.f32 %v3423_v15, %v2488_v37  ;;  %v2510_v40 = vadd.f32 %v2509_v36, %v2503_v35 }
 0x189   : > { %v2490_v41 = vadd.f32 %v3427_v23, %v2489_v39  ;;  %v2511_v43 = vadd.f32 %v2510_v40, %v2504_v38 }
 0x18b   : > { %v2491_v45 = vadd.f32 %v3421_v11, %v2490_v41  ;;  %v2512_v46 = vadd.f32 %v2511_v43, %v2505_v42 }
 0x18d   : > { %v2492_v48 = vadd.f32 %v3425_v20, %v2491_v45  ;;  %v2513_v49 = vadd.f32 %v2512_v46, %v2506_v44 }
 0x18f   : > { %v2493_v50 = vrot.slane %v2492_v48, 4  ;;  %v2514_v51 = vadd.f32 %v2513_v49, %v2507_v47 }
 0x191   : > { %v2494_v52 = vadd.f32 %v2493_v50, %v2492_v48  ;;  %v2515_v53 = vrot.slane %v2514_v51, 4 }
 0x193   : > { %v2495_v54 = vrot.slane %v2494_v52, 2  ;;  %v2516_v55 = vadd.f32 %v2515_v53, %v2514_v51 }
 0x195   : > { %v2496_v56 = vadd.f32 %v2495_v54, %v2494_v52  ;;  %v2517_v57 = vrot.slane %v2516_v55, 2 }
 0x197   : > { %v2497_v58 = vrot.slane %v2496_v56, 1  ;;  %v2518_v59 = vadd.f32 %v2517_v57, %v2516_v55 }
 0x199   : > { %v2498_v60 = vadd.f32 %v2497_v58, %v2496_v56  ;;  %v2519_v61 = vrot.slane %v2518_v59, 1 }
 0x19b   : > { %2499 = vst [vmem:[%s261_s24] sm:$0x1] %v2498_v60  ;;  %v2520_v62 = vadd.f32 %v2519_v61, %v2518_v59 }
 0x19d   : > { %2521 = vst [vmem:[%s267_s27] sm:$0x1] %v2520_v62 }
 0x19e PF: > { %s15_s17 = sadd.s32 1, %s3611_s17   ;;  %s4126_s15 = smov %s3607_s16 }
 0x19f   : > { %p12_p5 = scmp.ge.s32.totalorder %s15_s17, 4   ;;  %s4127_s16 = smov %s4129_s18 }
 0x1a1   :  { %14 = sbr.rel (!%p12_p5) target bundleno = 2 (0x2), region = 95 }

</bundles_post_ra>
